<compile_context>
chip_gen: v7x
topology: tpu7x:2x2x1
jax: 0.10.0
libtpu: 0.0.40
codegen_flags: <defaults>
</compile_context>

<pallas_src>
import functools

import jax
import jax.numpy as jnp
import numpy as np
from jax.experimental import pallas as pl
from jax.experimental.pallas import tpu as pltpu

NUM_FG_CLASSES = 20       # len(tools.VOC_CLASSES)
_LANE = 128
_NUM_FEATS = 13           # px, py, dist_p[4], dist_t[4], ctr_p, ctr_t, cls_t
_NUM_PARTIALS = 5         # focal, n_pos, bbox, ctr-denominator, bce


def _fcos_loss_kernel(logit_ref, feat_ref, out_ref,
                      acc_focal, acc_npos, acc_bbox, acc_cden, acc_bce,
                      *, alpha, gamma, tile_r, num_classes, num_rows,
                      steps_per_core):
    c = pl.program_id(0)              # core (parallel) axis
    i = pl.program_id(1)              # per-core step (arbitrary) axis

    @pl.when(i == 0)
    def _init():
        zero = jnp.zeros((8, _LANE), jnp.float32)
        acc_focal[...] = zero
        acc_npos[...] = zero
        acc_bbox[...] = zero
        acc_cden[...] = zero
        acc_bce[...] = zero

    def _red(x):
        # (tile_r, 128) -> (8, 128): pure cross-vreg VALU adds, no XLU, keeps
        # accumulator VMEM/vst traffic independent of tile size.
        return x.reshape(tile_r // 8, 8, _LANE).sum(axis=0)

    cls_tf = feat_ref[12]                            # class target (float ids)

    # ---- sigmoid focal classification loss (lane-dense, classes unrolled) ----
    focal_rows = jnp.zeros((tile_r, _LANE), jnp.float32)
    gamma_is_int = float(gamma).is_integer() and gamma >= 0.0
    one_m_alpha = 1.0 - alpha
    two_alpha_m1 = 2.0 * alpha - 1.0
    for cc in range(num_classes):
        x = logit_ref[cc]                            # (tile_r, 128)
        fg = (cls_tf == float(cc + 1)).astype(jnp.float32)
        e = jnp.exp(-jnp.abs(x))                     # single exp, reused below
        d = 1.0 + e
        r0 = pl.reciprocal(d, approx=True)           # EUP vrcp (free slot)
        inv = r0 * (2.0 - d * r0)                    # one Newton step, ~1e-7
        sig = jnp.where(x >= 0.0, inv, e * inv)      # sigmoid(x) from same exp
        ce = jnp.maximum(x, 0.0) - x * fg + jnp.log(d)
        one_m_pt = sig + fg * (1.0 - 2.0 * sig)      # == 1 - p_t (fg in {0,1})
        if gamma_is_int:
            mod = None
            for _ in range(int(gamma)):
                mod = one_m_pt if mod is None else mod * one_m_pt
        else:
            mod = jnp.power(one_m_pt, gamma)
        a_t = one_m_alpha + two_alpha_m1 * fg        # == alpha_t (single FMA)
        term = ce * a_t if mod is None else ce * mod * a_t
        focal_rows = focal_rows + term

    # Tail-gated masking: only blocks containing padded rows pay for the iota
    # mask (padded logits are 0, would otherwise add log(2)-like terms).
    gblock = c * steps_per_core + i
    needs_mask = (gblock + 1) * (tile_r * _LANE) > num_rows

    @pl.when(needs_mask)
    def _acc_focal_masked():
        r_iota = jax.lax.broadcasted_iota(jnp.int32, (tile_r, _LANE), 0)
        l_iota = jax.lax.broadcasted_iota(jnp.int32, (tile_r, _LANE), 1)
        row_idx = (gblock * tile_r + r_iota) * _LANE + l_iota
        acc_focal[...] += _red(jnp.where(row_idx < num_rows, focal_rows, 0.0))

    @pl.when(jnp.logical_not(needs_mask))
    def _acc_focal_full():
        acc_focal[...] += _red(focal_rows)

    # Positive locations: padded rows have cls_tf == 0, so no extra mask.
    pos = cls_tf > 0.5

    # ---- decoded-box IoU loss on positives (feature reads deferred here to
    #      keep live ranges short across the unrolled focal loop) ----
    px, py = feat_ref[0], feat_ref[1]
    dpl, dpt, dpr, dpb = feat_ref[2], feat_ref[3], feat_ref[4], feat_ref[5]
    dtl, dtt, dtr, dtb = feat_ref[6], feat_ref[7], feat_ref[8], feat_ref[9]
    ctr_p, ctr_t = feat_ref[10], feat_ref[11]

    x1p = px - dpl; y1p = py - dpt; x2p = px + dpr; y2p = py + dpb
    x1t = px - dtl; y1t = py - dtt; x2t = px + dtr; y2t = py + dtb
    area_p = (x2p - x1p) * (y2p - y1p)
    area_t = (x2t - x1t) * (y2t - y1t)
    iw = jnp.maximum(jnp.minimum(x2p, x2t) - jnp.maximum(x1p, x1t), 0.0)
    ih = jnp.maximum(jnp.minimum(y2p, y2t) - jnp.maximum(y1p, y1t), 0.0)
    inter = iw * ih
    union = area_p + area_t - inter
    # exact divide kept here (approx reciprocal would risk the 1e-4 tolerance
    # through the log); runs once vs 20x in the focal loop.
    iou = inter / jnp.where(pos, union, 1.0)
    iou_loss = -jnp.log(jnp.maximum(iou, 1e-6))

    # ---- centerness BCE-with-logits on positives ----
    e_c = jnp.exp(-jnp.abs(ctr_p))
    bce = jnp.maximum(ctr_p, 0.0) - ctr_p * ctr_t + jnp.log(1.0 + e_c)

    acc_npos[...] += _red(pos.astype(jnp.float32))
    acc_bbox[...] += _red(jnp.where(pos, ctr_t * iou_loss, 0.0))
    acc_cden[...] += _red(jnp.where(pos, ctr_t, 0.0))
    acc_bce[...] += _red(jnp.where(pos, bce, 0.0))

    # ---- per-core epilogue: dump lane-dense partial sums, combine outside ----
    @pl.when(i == pl.num_programs(1) - 1)
    def _fin():
        out_ref[0, 0] = acc_focal[...]
        out_ref[0, 1] = acc_npos[...]
        out_ref[0, 2] = acc_bbox[...]
        out_ref[0, 3] = acc_cden[...]
        out_ref[0, 4] = acc_bce[...]


def fcos_loss_pallas(pred, target, points, focal_alpha=0.25, focal_gamma=2.0,
                     rows_per_block=65536, num_cores=2,
                     vmem_limit_bytes=40 * 1024 * 1024,
                     allow_input_fusion=False):
    """FCOS loss.  rows_per_block=65536 (tile_r=512) fits every generation,
    including v7x (64 MiB physical VMEM; ~19 MiB used double-buffered).
    num_cores=2 shards the parallel grid axis across v7x's 2 TensorCores and
    is harmless (sequential) on single-core chips."""
    cls_p = pred['class'].reshape(-1, NUM_FG_CLASSES).astype(jnp.float32)
    dist_p = pred['distance'].reshape(-1, 4).astype(jnp.float32)
    ctr_p = pred['centerness'].reshape(-1).astype(jnp.float32)
    cls_t = target['class'].reshape(-1).astype(jnp.float32)   # small ints, exact
    dist_t = target['distance'].reshape(-1, 4).astype(jnp.float32)
    ctr_t = target['centerness'].reshape(-1).astype(jnp.float32)
    pts = points.reshape(-1, 2).astype(jnp.float32)

    m = cls_p.shape[0]
    r_total = -(-m // _LANE)                       # rows of 128 locations
    tile_r = max(8, (rows_per_block // _LANE) // 8 * 8)
    tile_r = min(tile_r, -(-r_total // 8) * 8)     # shrink for tiny inputs
    grid_r = -(-r_total // tile_r)
    grid_total = -(-grid_r // num_cores) * num_cores
    steps_per_core = grid_total // num_cores
    m_pad = grid_total * tile_r * _LANE

    # Pack the narrow per-row features into one lane-dense (13, R, 128) bundle.
    feat = jnp.stack([pts[:, 0], pts[:, 1],
                      dist_p[:, 0], dist_p[:, 1], dist_p[:, 2], dist_p[:, 3],
                      dist_t[:, 0], dist_t[:, 1], dist_t[:, 2], dist_t[:, 3],
                      ctr_p, ctr_t, cls_t], axis=0)            # (13, M)
    feat = jnp.pad(feat, ((0, 0), (0, m_pad - m)))
    feat = feat.reshape(_NUM_FEATS, -1, _LANE)                 # (13, R, 128)

    # Class logits: (M, C) -> lane-dense (C, R, 128).
    logits = jnp.pad(cls_p, ((0, m_pad - m), (0, 0)))
    logits = logits.T.reshape(NUM_FG_CLASSES, -1, _LANE)       # (20, R, 128)

    kernel = functools.partial(
        _fcos_loss_kernel, alpha=float(focal_alpha), gamma=float(focal_gamma),
        tile_r=tile_r, num_classes=NUM_FG_CLASSES, num_rows=m,
        steps_per_core=steps_per_core)

    cost = pl.CostEstimate(
        flops=560 * m,
        transcendentals=45 * m,
        bytes_accessed=(NUM_FG_CLASSES + _NUM_FEATS) * m * 4)

    fusion = [True, True] if allow_input_fusion else None

    partials = pl.pallas_call(
        kernel,
        out_shape=jax.ShapeDtypeStruct((num_cores, _NUM_PARTIALS, 8, _LANE),
                                       jnp.float32),
        grid=(num_cores, steps_per_core),
        in_specs=[
            pl.BlockSpec((NUM_FG_CLASSES, tile_r, _LANE),
                         lambda c, i: (0, c * steps_per_core + i, 0)),
            pl.BlockSpec((_NUM_FEATS, tile_r, _LANE),
                         lambda c, i: (0, c * steps_per_core + i, 0)),
        ],
        out_specs=pl.BlockSpec((1, _NUM_PARTIALS, 8, _LANE),
                               lambda c, i: (c, 0, 0, 0)),
        scratch_shapes=[pltpu.VMEM((8, _LANE), jnp.float32)
                        for _ in range(_NUM_PARTIALS)],
        compiler_params=pltpu.CompilerParams(
            dimension_semantics=("parallel", "arbitrary"),
            vmem_limit_bytes=vmem_limit_bytes,
            allow_input_fusion=fusion),
        cost_estimate=cost,
    )(logits, feat)

    sums = jnp.sum(partials, axis=(0, 2, 3))       # (5,) tiny combine outside
    loss_cls = sums[0] / sums[1]
    loss_bbox = sums[2] / sums[3]
    loss_centerness = sums[4] / sums[1]
    return loss_cls, loss_bbox, loss_centerness


def fcos_loss_ref(pred, target, points, alpha, gamma):
    """Plain-JAX reference following the PyTorch forward (gather-based)."""
    cls_p = pred['class'].reshape(-1, NUM_FG_CLASSES).astype(jnp.float32)
    dist_p = pred['distance'].reshape(-1, 4).astype(jnp.float32)
    ctr_p = pred['centerness'].reshape(-1).astype(jnp.float32)
    cls_t = target['class'].reshape(-1)
    dist_t = target['distance'].reshape(-1, 4).astype(jnp.float32)
    ctr_t = target['centerness'].reshape(-1).astype(jnp.float32)
    pts = points.reshape(-1, 2).astype(jnp.float32)

    pos = jnp.nonzero(cls_t)[0]
    pdp, pdt = dist_p[pos], dist_t[pos]
    pcp, pct = ctr_p[pos], ctr_t[pos]
    pp = pts[pos]

    def decode(p, d):
        return jnp.stack([p[:, 0] - d[:, 0], p[:, 1] - d[:, 1],
                          p[:, 0] + d[:, 2], p[:, 1] + d[:, 3]], axis=-1)

    bp, bt = decode(pp, pdp), decode(pp, pdt)
    area_p = (bp[:, 2] - bp[:, 0]) * (bp[:, 3] - bp[:, 1])
    area_t = (bt[:, 2] - bt[:, 0]) * (bt[:, 3] - bt[:, 1])
    iw = jnp.maximum(jnp.minimum(bp[:, 2], bt[:, 2])
                     - jnp.maximum(bp[:, 0], bt[:, 0]), 0.0)
    ih = jnp.maximum(jnp.minimum(bp[:, 3], bt[:, 3])
                     - jnp.maximum(bp[:, 1], bt[:, 1]), 0.0)
    inter = iw * ih
    iou = inter / (area_p + area_t - inter)
    iou_loss = -jnp.log(jnp.maximum(iou, 1e-6))

    onehot = jax.nn.one_hot(cls_t, NUM_FG_CLASSES + 1, dtype=jnp.float32)
    bg, fg = onehot[:, 0], onehot[:, 1:]
    p = 1.0 / (1.0 + jnp.exp(-cls_p))
    ce = (jnp.maximum(cls_p, 0.0) - cls_p * fg
          + jnp.log(1.0 + jnp.exp(-jnp.abs(cls_p))))
    p_t = p * fg + (1.0 - p) * (1.0 - fg)
    fl = ce * (1.0 - p_t) ** gamma * (alpha * fg + (1.0 - alpha) * (1.0 - fg))
    loss_cls = fl.sum() / (1.0 - bg).sum()

    loss_bbox = (pct * iou_loss).sum() / pct.sum()
    bce = (jnp.maximum(pcp, 0.0) - pcp * pct
           + jnp.log(1.0 + jnp.exp(-jnp.abs(pcp))))
    loss_ctr = bce.mean()
    return loss_cls, loss_bbox, loss_ctr


if __name__ == "__main__":
    B, H, W = 2, 16, 16
    N = H * W
    alpha, gamma = 0.25, 2.0

    key = jax.random.PRNGKey(0)
    ks = jax.random.split(key, 8)

    cls_tgt = jnp.where(
        jax.random.uniform(ks[0], (B, N)) < 0.3,
        jax.random.randint(ks[1], (B, N), 1, NUM_FG_CLASSES + 1),
        0).astype(jnp.int32)
    dist_tgt = jax.random.uniform(ks[2], (B, N, 4), minval=1.0, maxval=8.0)
    ctr_tgt = jax.random.uniform(ks[3], (B, N), minval=0.05, maxval=1.0)
    points = jax.random.uniform(ks[4], (B, N, 2), minval=0.0, maxval=64.0)

    cls_pred = jax.random.normal(ks[5], (B, N, NUM_FG_CLASSES))
    dist_pred = jax.random.uniform(ks[6], (B, N, 4), minval=0.5, maxval=10.0)
    ctr_pred = jax.random.normal(ks[7], (B, N))

    pred = {'class': cls_pred, 'distance': dist_pred, 'centerness': ctr_pred}
    target = {'class': cls_tgt, 'distance': dist_tgt, 'centerness': ctr_tgt}

    losses = fcos_loss_pallas(pred, target, points, alpha, gamma)
    losses = jax.block_until_ready(losses)

    ref = fcos_loss_ref(pred, target, points, alpha, gamma)
    for got, want in zip(losses, ref):
        np.testing.assert_allclose(np.asarray(got), np.asarray(want),
                                   rtol=1e-4, atol=1e-5)

    print("KERNEL_OK")
</pallas_src>

<mosaic_0001>
module attributes {stable_mosaic.version = 11 : i64} {
  func.func @_fcos_loss_kernel(%arg0: i32, %arg1: i32, %arg2: memref<20x8x128xf32, #tpu.memory_space<vmem>>, %arg3: memref<13x8x128xf32, #tpu.memory_space<vmem>>, %arg4: memref<1x5x8x128xf32, #tpu.memory_space<vmem>>, %arg5: memref<8x128xf32, #tpu.memory_space<vmem>>, %arg6: memref<8x128xf32, #tpu.memory_space<vmem>>, %arg7: memref<8x128xf32, #tpu.memory_space<vmem>>, %arg8: memref<8x128xf32, #tpu.memory_space<vmem>>, %arg9: memref<8x128xf32, #tpu.memory_space<vmem>>) attributes {dimension_semantics = [#tpu.dimension_semantics<parallel>, #tpu.dimension_semantics<arbitrary>], iteration_bounds = array<i64: 2, 1>, scalar_prefetch = 0 : i64, scratch_operands = 5 : i64, tpu.core_type = #tpu.core_type<tc>, window_params = [{transform_indices = @transform_0, window_bounds = array<i64: 20, 8, 128>}, {transform_indices = @transform_1, window_bounds = array<i64: 13, 8, 128>}, {transform_indices = @transform_2, window_bounds = array<i64: 1, 5, 8, 128>}]} {
    %c0_i32 = arith.constant 0 : i32
    %0 = arith.cmpi eq, %arg1, %c0_i32 : i32
    %1 = arith.extui %0 : i1 to i32
    %c0_i32_0 = arith.constant 0 : i32
    %2 = arith.cmpi ne, %1, %c0_i32_0 : i32
    scf.if %2 {
      %cst_317 = arith.constant 0.000000e+00 : f32
      %941 = vector.broadcast %cst_317 : f32 to vector<8x128xf32>
      %c0_318 = arith.constant 0 : index
      %c0_319 = arith.constant 0 : index
      %942 = vector.load %arg5[%c0_318, %c0_319] : memref<8x128xf32, #tpu.memory_space<vmem>>, vector<8x128xf32>
      tpu.vector_store %arg5[%c0_318, %c0_319], %941 {strides = array<i32>} : memref<8x128xf32, #tpu.memory_space<vmem>>, vector<8x128xf32>,
      %c0_320 = arith.constant 0 : index
      %c0_321 = arith.constant 0 : index
      %943 = vector.load %arg6[%c0_320, %c0_321] : memref<8x128xf32, #tpu.memory_space<vmem>>, vector<8x128xf32>
      tpu.vector_store %arg6[%c0_320, %c0_321], %941 {strides = array<i32>} : memref<8x128xf32, #tpu.memory_space<vmem>>, vector<8x128xf32>,
      %c0_322 = arith.constant 0 : index
      %c0_323 = arith.constant 0 : index
      %944 = vector.load %arg7[%c0_322, %c0_323] : memref<8x128xf32, #tpu.memory_space<vmem>>, vector<8x128xf32>
      tpu.vector_store %arg7[%c0_322, %c0_323], %941 {strides = array<i32>} : memref<8x128xf32, #tpu.memory_space<vmem>>, vector<8x128xf32>,
      %c0_324 = arith.constant 0 : index
      %c0_325 = arith.constant 0 : index
      %945 = vector.load %arg8[%c0_324, %c0_325] : memref<8x128xf32, #tpu.memory_space<vmem>>, vector<8x128xf32>
      tpu.vector_store %arg8[%c0_324, %c0_325], %941 {strides = array<i32>} : memref<8x128xf32, #tpu.memory_space<vmem>>, vector<8x128xf32>,
      %c0_326 = arith.constant 0 : index
      %c0_327 = arith.constant 0 : index
      %946 = vector.load %arg9[%c0_326, %c0_327] : memref<8x128xf32, #tpu.memory_space<vmem>>, vector<8x128xf32>
      tpu.vector_store %arg9[%c0_326, %c0_327], %941 {strides = array<i32>} : memref<8x128xf32, #tpu.memory_space<vmem>>, vector<8x128xf32>,
    } else {
    }
    %c12 = arith.constant 12 : index
    %c0 = arith.constant 0 : index
    %c0_1 = arith.constant 0 : index
    %3 = vector.load %arg3[%c12, %c0, %c0_1] : memref<13x8x128xf32, #tpu.memory_space<vmem>>, vector<1x8x128xf32>
    %4 = vector.shape_cast %3 : vector<1x8x128xf32> to vector<8x128xf32>
    %cst = arith.constant 0.000000e+00 : f32
    %5 = vector.broadcast %cst : f32 to vector<8x128xf32>
    %c0_2 = arith.constant 0 : index
    %c0_3 = arith.constant 0 : index
    %c0_4 = arith.constant 0 : index
    %6 = vector.load %arg2[%c0_2, %c0_3, %c0_4] : memref<20x8x128xf32, #tpu.memory_space<vmem>>, vector<1x8x128xf32>
    %7 = vector.shape_cast %6 : vector<1x8x128xf32> to vector<8x128xf32>
    %cst_5 = arith.constant 1.000000e+00 : f32
    %8 = vector.broadcast %cst_5 : f32 to vector<8x128xf32>
    %9 = arith.cmpf oeq, %4, %8 : vector<8x128xf32>
    %10 = arith.extui %9 : vector<8x128xi1> to vector<8x128xi32>
    %11 = arith.sitofp %10 : vector<8x128xi32> to vector<8x128xf32>
    %12 = math.absf %7 : vector<8x128xf32>
    %cst_6 = arith.constant 0.000000e+00 : f32
    %13 = vector.broadcast %cst_6 : f32 to vector<8x128xf32>
    %14 = arith.subf %13, %12 : vector<8x128xf32>
    %15 = math.exp %14 : vector<8x128xf32>
    %cst_7 = arith.constant 1.000000e+00 : f32
    %16 = vector.broadcast %cst_7 : f32 to vector<8x128xf32>
    %17 = arith.addf %16, %15 : vector<8x128xf32>
    %18 = tpu.reciprocal %17 {approx = true} : vector<8x128xf32> -> vector<8x128xf32>
    %19 = arith.mulf %17, %18 : vector<8x128xf32>
    %cst_8 = arith.constant 2.000000e+00 : f32
    %20 = vector.broadcast %cst_8 : f32 to vector<8x128xf32>
    %21 = arith.subf %20, %19 : vector<8x128xf32>
    %22 = arith.mulf %18, %21 : vector<8x128xf32>
    %cst_9 = arith.constant 0.000000e+00 : f32
    %23 = vector.broadcast %cst_9 : f32 to vector<8x128xf32>
    %24 = arith.cmpf oge, %7, %23 : vector<8x128xf32>
    %25 = arith.mulf %15, %22 : vector<8x128xf32>
    %26 = arith.select %24, %22, %25 : vector<8x128xi1>, vector<8x128xf32>
    %cst_10 = arith.constant 0.000000e+00 : f32
    %27 = vector.broadcast %cst_10 : f32 to vector<8x128xf32>
    %28 = arith.maximumf %7, %27 : vector<8x128xf32>
    %29 = arith.mulf %7, %11 : vector<8x128xf32>
    %30 = arith.subf %28, %29 : vector<8x128xf32>
    %31 = math.log %17 : vector<8x128xf32>
    %32 = arith.addf %30, %31 : vector<8x128xf32>
    %cst_11 = arith.constant 2.000000e+00 : f32
    %33 = vector.broadcast %cst_11 : f32 to vector<8x128xf32>
    %34 = arith.mulf %33, %26 : vector<8x128xf32>
    %cst_12 = arith.constant 1.000000e+00 : f32
    %35 = vector.broadcast %cst_12 : f32 to vector<8x128xf32>
    %36 = arith.subf %35, %34 : vector<8x128xf32>
    %37 = arith.mulf %11, %36 : vector<8x128xf32>
    %38 = arith.addf %26, %37 : vector<8x128xf32>
    %39 = arith.mulf %38, %38 : vector<8x128xf32>
    %cst_13 = arith.constant -5.000000e-01 : f32
    %40 = vector.broadcast %cst_13 : f32 to vector<8x128xf32>
    %41 = arith.mulf %40, %11 : vector<8x128xf32>
    %cst_14 = arith.constant 7.500000e-01 : f32
    %42 = vector.broadcast %cst_14 : f32 to vector<8x128xf32>
    %43 = arith.addf %42, %41 : vector<8x128xf32>
    %44 = arith.mulf %32, %39 : vector<8x128xf32>
    %45 = arith.mulf %44, %43 : vector<8x128xf32>
    %46 = arith.addf %5, %45 : vector<8x128xf32>
    %c1 = arith.constant 1 : index
    %c0_15 = arith.constant 0 : index
    %c0_16 = arith.constant 0 : index
    %47 = vector.load %arg2[%c1, %c0_15, %c0_16] : memref<20x8x128xf32, #tpu.memory_space<vmem>>, vector<1x8x128xf32>
    %48 = vector.shape_cast %47 : vector<1x8x128xf32> to vector<8x128xf32>
    %cst_17 = arith.constant 2.000000e+00 : f32
    %49 = vector.broadcast %cst_17 : f32 to vector<8x128xf32>
    %50 = arith.cmpf oeq, %4, %49 : vector<8x128xf32>
    %51 = arith.extui %50 : vector<8x128xi1> to vector<8x128xi32>
    %52 = arith.sitofp %51 : vector<8x128xi32> to vector<8x128xf32>
    %53 = math.absf %48 : vector<8x128xf32>
    %cst_18 = arith.constant 0.000000e+00 : f32
    %54 = vector.broadcast %cst_18 : f32 to vector<8x128xf32>
    %55 = arith.subf %54, %53 : vector<8x128xf32>
    %56 = math.exp %55 : vector<8x128xf32>
    %cst_19 = arith.constant 1.000000e+00 : f32
    %57 = vector.broadcast %cst_19 : f32 to vector<8x128xf32>
    %58 = arith.addf %57, %56 : vector<8x128xf32>
    %59 = tpu.reciprocal %58 {approx = true} : vector<8x128xf32> -> vector<8x128xf32>
    %60 = arith.mulf %58, %59 : vector<8x128xf32>
    %cst_20 = arith.constant 2.000000e+00 : f32
    %61 = vector.broadcast %cst_20 : f32 to vector<8x128xf32>
    %62 = arith.subf %61, %60 : vector<8x128xf32>
    %63 = arith.mulf %59, %62 : vector<8x128xf32>
    %cst_21 = arith.constant 0.000000e+00 : f32
    %64 = vector.broadcast %cst_21 : f32 to vector<8x128xf32>
    %65 = arith.cmpf oge, %48, %64 : vector<8x128xf32>
    %66 = arith.mulf %56, %63 : vector<8x128xf32>
    %67 = arith.select %65, %63, %66 : vector<8x128xi1>, vector<8x128xf32>
    %cst_22 = arith.constant 0.000000e+00 : f32
    %68 = vector.broadcast %cst_22 : f32 to vector<8x128xf32>
    %69 = arith.maximumf %48, %68 : vector<8x128xf32>
    %70 = arith.mulf %48, %52 : vector<8x128xf32>
    %71 = arith.subf %69, %70 : vector<8x128xf32>
    %72 = math.log %58 : vector<8x128xf32>
    %73 = arith.addf %71, %72 : vector<8x128xf32>
    %cst_23 = arith.constant 2.000000e+00 : f32
    %74 = vector.broadcast %cst_23 : f32 to vector<8x128xf32>
    %75 = arith.mulf %74, %67 : vector<8x128xf32>
    %cst_24 = arith.constant 1.000000e+00 : f32
    %76 = vector.broadcast %cst_24 : f32 to vector<8x128xf32>
    %77 = arith.subf %76, %75 : vector<8x128xf32>
    %78 = arith.mulf %52, %77 : vector<8x128xf32>
    %79 = arith.addf %67, %78 : vector<8x128xf32>
    %80 = arith.mulf %79, %79 : vector<8x128xf32>
    %cst_25 = arith.constant -5.000000e-01 : f32
    %81 = vector.broadcast %cst_25 : f32 to vector<8x128xf32>
    %82 = arith.mulf %81, %52 : vector<8x128xf32>
    %cst_26 = arith.constant 7.500000e-01 : f32
    %83 = vector.broadcast %cst_26 : f32 to vector<8x128xf32>
    %84 = arith.addf %83, %82 : vector<8x128xf32>
    %85 = arith.mulf %73, %80 : vector<8x128xf32>
    %86 = arith.mulf %85, %84 : vector<8x128xf32>
    %87 = arith.addf %46, %86 : vector<8x128xf32>
    %c2 = arith.constant 2 : index
    %c0_27 = arith.constant 0 : index
    %c0_28 = arith.constant 0 : index
    %88 = vector.load %arg2[%c2, %c0_27, %c0_28] : memref<20x8x128xf32, #tpu.memory_space<vmem>>, vector<1x8x128xf32>
    %89 = vector.shape_cast %88 : vector<1x8x128xf32> to vector<8x128xf32>
    %cst_29 = arith.constant 3.000000e+00 : f32
    %90 = vector.broadcast %cst_29 : f32 to vector<8x128xf32>
    %91 = arith.cmpf oeq, %4, %90 : vector<8x128xf32>
    %92 = arith.extui %91 : vector<8x128xi1> to vector<8x128xi32>
    %93 = arith.sitofp %92 : vector<8x128xi32> to vector<8x128xf32>
    %94 = math.absf %89 : vector<8x128xf32>
    %cst_30 = arith.constant 0.000000e+00 : f32
    %95 = vector.broadcast %cst_30 : f32 to vector<8x128xf32>
    %96 = arith.subf %95, %94 : vector<8x128xf32>
    %97 = math.exp %96 : vector<8x128xf32>
    %cst_31 = arith.constant 1.000000e+00 : f32
    %98 = vector.broadcast %cst_31 : f32 to vector<8x128xf32>
    %99 = arith.addf %98, %97 : vector<8x128xf32>
    %100 = tpu.reciprocal %99 {approx = true} : vector<8x128xf32> -> vector<8x128xf32>
    %101 = arith.mulf %99, %100 : vector<8x128xf32>
    %cst_32 = arith.constant 2.000000e+00 : f32
    %102 = vector.broadcast %cst_32 : f32 to vector<8x128xf32>
    %103 = arith.subf %102, %101 : vector<8x128xf32>
    %104 = arith.mulf %100, %103 : vector<8x128xf32>
    %cst_33 = arith.constant 0.000000e+00 : f32
    %105 = vector.broadcast %cst_33 : f32 to vector<8x128xf32>
    %106 = arith.cmpf oge, %89, %105 : vector<8x128xf32>
    %107 = arith.mulf %97, %104 : vector<8x128xf32>
    %108 = arith.select %106, %104, %107 : vector<8x128xi1>, vector<8x128xf32>
    %cst_34 = arith.constant 0.000000e+00 : f32
    %109 = vector.broadcast %cst_34 : f32 to vector<8x128xf32>
    %110 = arith.maximumf %89, %109 : vector<8x128xf32>
    %111 = arith.mulf %89, %93 : vector<8x128xf32>
    %112 = arith.subf %110, %111 : vector<8x128xf32>
    %113 = math.log %99 : vector<8x128xf32>
    %114 = arith.addf %112, %113 : vector<8x128xf32>
    %cst_35 = arith.constant 2.000000e+00 : f32
    %115 = vector.broadcast %cst_35 : f32 to vector<8x128xf32>
    %116 = arith.mulf %115, %108 : vector<8x128xf32>
    %cst_36 = arith.constant 1.000000e+00 : f32
    %117 = vector.broadcast %cst_36 : f32 to vector<8x128xf32>
    %118 = arith.subf %117, %116 : vector<8x128xf32>
    %119 = arith.mulf %93, %118 : vector<8x128xf32>
    %120 = arith.addf %108, %119 : vector<8x128xf32>
    %121 = arith.mulf %120, %120 : vector<8x128xf32>
    %cst_37 = arith.constant -5.000000e-01 : f32
    %122 = vector.broadcast %cst_37 : f32 to vector<8x128xf32>
    %123 = arith.mulf %122, %93 : vector<8x128xf32>
    %cst_38 = arith.constant 7.500000e-01 : f32
    %124 = vector.broadcast %cst_38 : f32 to vector<8x128xf32>
    %125 = arith.addf %124, %123 : vector<8x128xf32>
    %126 = arith.mulf %114, %121 : vector<8x128xf32>
    %127 = arith.mulf %126, %125 : vector<8x128xf32>
    %128 = arith.addf %87, %127 : vector<8x128xf32>
    %c3 = arith.constant 3 : index
    %c0_39 = arith.constant 0 : index
    %c0_40 = arith.constant 0 : index
    %129 = vector.load %arg2[%c3, %c0_39, %c0_40] : memref<20x8x128xf32, #tpu.memory_space<vmem>>, vector<1x8x128xf32>
    %130 = vector.shape_cast %129 : vector<1x8x128xf32> to vector<8x128xf32>
    %cst_41 = arith.constant 4.000000e+00 : f32
    %131 = vector.broadcast %cst_41 : f32 to vector<8x128xf32>
    %132 = arith.cmpf oeq, %4, %131 : vector<8x128xf32>
    %133 = arith.extui %132 : vector<8x128xi1> to vector<8x128xi32>
    %134 = arith.sitofp %133 : vector<8x128xi32> to vector<8x128xf32>
    %135 = math.absf %130 : vector<8x128xf32>
    %cst_42 = arith.constant 0.000000e+00 : f32
    %136 = vector.broadcast %cst_42 : f32 to vector<8x128xf32>
    %137 = arith.subf %136, %135 : vector<8x128xf32>
    %138 = math.exp %137 : vector<8x128xf32>
    %cst_43 = arith.constant 1.000000e+00 : f32
    %139 = vector.broadcast %cst_43 : f32 to vector<8x128xf32>
    %140 = arith.addf %139, %138 : vector<8x128xf32>
    %141 = tpu.reciprocal %140 {approx = true} : vector<8x128xf32> -> vector<8x128xf32>
    %142 = arith.mulf %140, %141 : vector<8x128xf32>
    %cst_44 = arith.constant 2.000000e+00 : f32
    %143 = vector.broadcast %cst_44 : f32 to vector<8x128xf32>
    %144 = arith.subf %143, %142 : vector<8x128xf32>
    %145 = arith.mulf %141, %144 : vector<8x128xf32>
    %cst_45 = arith.constant 0.000000e+00 : f32
    %146 = vector.broadcast %cst_45 : f32 to vector<8x128xf32>
    %147 = arith.cmpf oge, %130, %146 : vector<8x128xf32>
    %148 = arith.mulf %138, %145 : vector<8x128xf32>
    %149 = arith.select %147, %145, %148 : vector<8x128xi1>, vector<8x128xf32>
    %cst_46 = arith.constant 0.000000e+00 : f32
    %150 = vector.broadcast %cst_46 : f32 to vector<8x128xf32>
    %151 = arith.maximumf %130, %150 : vector<8x128xf32>
    %152 = arith.mulf %130, %134 : vector<8x128xf32>
    %153 = arith.subf %151, %152 : vector<8x128xf32>
    %154 = math.log %140 : vector<8x128xf32>
    %155 = arith.addf %153, %154 : vector<8x128xf32>
    %cst_47 = arith.constant 2.000000e+00 : f32
    %156 = vector.broadcast %cst_47 : f32 to vector<8x128xf32>
    %157 = arith.mulf %156, %149 : vector<8x128xf32>
    %cst_48 = arith.constant 1.000000e+00 : f32
    %158 = vector.broadcast %cst_48 : f32 to vector<8x128xf32>
    %159 = arith.subf %158, %157 : vector<8x128xf32>
    %160 = arith.mulf %134, %159 : vector<8x128xf32>
    %161 = arith.addf %149, %160 : vector<8x128xf32>
    %162 = arith.mulf %161, %161 : vector<8x128xf32>
    %cst_49 = arith.constant -5.000000e-01 : f32
    %163 = vector.broadcast %cst_49 : f32 to vector<8x128xf32>
    %164 = arith.mulf %163, %134 : vector<8x128xf32>
    %cst_50 = arith.constant 7.500000e-01 : f32
    %165 = vector.broadcast %cst_50 : f32 to vector<8x128xf32>
    %166 = arith.addf %165, %164 : vector<8x128xf32>
    %167 = arith.mulf %155, %162 : vector<8x128xf32>
    %168 = arith.mulf %167, %166 : vector<8x128xf32>
    %169 = arith.addf %128, %168 : vector<8x128xf32>
    %c4 = arith.constant 4 : index
    %c0_51 = arith.constant 0 : index
    %c0_52 = arith.constant 0 : index
    %170 = vector.load %arg2[%c4, %c0_51, %c0_52] : memref<20x8x128xf32, #tpu.memory_space<vmem>>, vector<1x8x128xf32>
    %171 = vector.shape_cast %170 : vector<1x8x128xf32> to vector<8x128xf32>
    %cst_53 = arith.constant 5.000000e+00 : f32
    %172 = vector.broadcast %cst_53 : f32 to vector<8x128xf32>
    %173 = arith.cmpf oeq, %4, %172 : vector<8x128xf32>
    %174 = arith.extui %173 : vector<8x128xi1> to vector<8x128xi32>
    %175 = arith.sitofp %174 : vector<8x128xi32> to vector<8x128xf32>
    %176 = math.absf %171 : vector<8x128xf32>
    %cst_54 = arith.constant 0.000000e+00 : f32
    %177 = vector.broadcast %cst_54 : f32 to vector<8x128xf32>
    %178 = arith.subf %177, %176 : vector<8x128xf32>
    %179 = math.exp %178 : vector<8x128xf32>
    %cst_55 = arith.constant 1.000000e+00 : f32
    %180 = vector.broadcast %cst_55 : f32 to vector<8x128xf32>
    %181 = arith.addf %180, %179 : vector<8x128xf32>
    %182 = tpu.reciprocal %181 {approx = true} : vector<8x128xf32> -> vector<8x128xf32>
    %183 = arith.mulf %181, %182 : vector<8x128xf32>
    %cst_56 = arith.constant 2.000000e+00 : f32
    %184 = vector.broadcast %cst_56 : f32 to vector<8x128xf32>
    %185 = arith.subf %184, %183 : vector<8x128xf32>
    %186 = arith.mulf %182, %185 : vector<8x128xf32>
    %cst_57 = arith.constant 0.000000e+00 : f32
    %187 = vector.broadcast %cst_57 : f32 to vector<8x128xf32>
    %188 = arith.cmpf oge, %171, %187 : vector<8x128xf32>
    %189 = arith.mulf %179, %186 : vector<8x128xf32>
    %190 = arith.select %188, %186, %189 : vector<8x128xi1>, vector<8x128xf32>
    %cst_58 = arith.constant 0.000000e+00 : f32
    %191 = vector.broadcast %cst_58 : f32 to vector<8x128xf32>
    %192 = arith.maximumf %171, %191 : vector<8x128xf32>
    %193 = arith.mulf %171, %175 : vector<8x128xf32>
    %194 = arith.subf %192, %193 : vector<8x128xf32>
    %195 = math.log %181 : vector<8x128xf32>
    %196 = arith.addf %194, %195 : vector<8x128xf32>
    %cst_59 = arith.constant 2.000000e+00 : f32
    %197 = vector.broadcast %cst_59 : f32 to vector<8x128xf32>
    %198 = arith.mulf %197, %190 : vector<8x128xf32>
    %cst_60 = arith.constant 1.000000e+00 : f32
    %199 = vector.broadcast %cst_60 : f32 to vector<8x128xf32>
    %200 = arith.subf %199, %198 : vector<8x128xf32>
    %201 = arith.mulf %175, %200 : vector<8x128xf32>
    %202 = arith.addf %190, %201 : vector<8x128xf32>
    %203 = arith.mulf %202, %202 : vector<8x128xf32>
    %cst_61 = arith.constant -5.000000e-01 : f32
    %204 = vector.broadcast %cst_61 : f32 to vector<8x128xf32>
    %205 = arith.mulf %204, %175 : vector<8x128xf32>
    %cst_62 = arith.constant 7.500000e-01 : f32
    %206 = vector.broadcast %cst_62 : f32 to vector<8x128xf32>
    %207 = arith.addf %206, %205 : vector<8x128xf32>
    %208 = arith.mulf %196, %203 : vector<8x128xf32>
    %209 = arith.mulf %208, %207 : vector<8x128xf32>
    %210 = arith.addf %169, %209 : vector<8x128xf32>
    %c5 = arith.constant 5 : index
    %c0_63 = arith.constant 0 : index
    %c0_64 = arith.constant 0 : index
    %211 = vector.load %arg2[%c5, %c0_63, %c0_64] : memref<20x8x128xf32, #tpu.memory_space<vmem>>, vector<1x8x128xf32>
    %212 = vector.shape_cast %211 : vector<1x8x128xf32> to vector<8x128xf32>
    %cst_65 = arith.constant 6.000000e+00 : f32
    %213 = vector.broadcast %cst_65 : f32 to vector<8x128xf32>
    %214 = arith.cmpf oeq, %4, %213 : vector<8x128xf32>
    %215 = arith.extui %214 : vector<8x128xi1> to vector<8x128xi32>
    %216 = arith.sitofp %215 : vector<8x128xi32> to vector<8x128xf32>
    %217 = math.absf %212 : vector<8x128xf32>
    %cst_66 = arith.constant 0.000000e+00 : f32
    %218 = vector.broadcast %cst_66 : f32 to vector<8x128xf32>
    %219 = arith.subf %218, %217 : vector<8x128xf32>
    %220 = math.exp %219 : vector<8x128xf32>
    %cst_67 = arith.constant 1.000000e+00 : f32
    %221 = vector.broadcast %cst_67 : f32 to vector<8x128xf32>
    %222 = arith.addf %221, %220 : vector<8x128xf32>
    %223 = tpu.reciprocal %222 {approx = true} : vector<8x128xf32> -> vector<8x128xf32>
    %224 = arith.mulf %222, %223 : vector<8x128xf32>
    %cst_68 = arith.constant 2.000000e+00 : f32
    %225 = vector.broadcast %cst_68 : f32 to vector<8x128xf32>
    %226 = arith.subf %225, %224 : vector<8x128xf32>
    %227 = arith.mulf %223, %226 : vector<8x128xf32>
    %cst_69 = arith.constant 0.000000e+00 : f32
    %228 = vector.broadcast %cst_69 : f32 to vector<8x128xf32>
    %229 = arith.cmpf oge, %212, %228 : vector<8x128xf32>
    %230 = arith.mulf %220, %227 : vector<8x128xf32>
    %231 = arith.select %229, %227, %230 : vector<8x128xi1>, vector<8x128xf32>
    %cst_70 = arith.constant 0.000000e+00 : f32
    %232 = vector.broadcast %cst_70 : f32 to vector<8x128xf32>
    %233 = arith.maximumf %212, %232 : vector<8x128xf32>
    %234 = arith.mulf %212, %216 : vector<8x128xf32>
    %235 = arith.subf %233, %234 : vector<8x128xf32>
    %236 = math.log %222 : vector<8x128xf32>
    %237 = arith.addf %235, %236 : vector<8x128xf32>
    %cst_71 = arith.constant 2.000000e+00 : f32
    %238 = vector.broadcast %cst_71 : f32 to vector<8x128xf32>
    %239 = arith.mulf %238, %231 : vector<8x128xf32>
    %cst_72 = arith.constant 1.000000e+00 : f32
    %240 = vector.broadcast %cst_72 : f32 to vector<8x128xf32>
    %241 = arith.subf %240, %239 : vector<8x128xf32>
    %242 = arith.mulf %216, %241 : vector<8x128xf32>
    %243 = arith.addf %231, %242 : vector<8x128xf32>
    %244 = arith.mulf %243, %243 : vector<8x128xf32>
    %cst_73 = arith.constant -5.000000e-01 : f32
    %245 = vector.broadcast %cst_73 : f32 to vector<8x128xf32>
    %246 = arith.mulf %245, %216 : vector<8x128xf32>
    %cst_74 = arith.constant 7.500000e-01 : f32
    %247 = vector.broadcast %cst_74 : f32 to vector<8x128xf32>
    %248 = arith.addf %247, %246 : vector<8x128xf32>
    %249 = arith.mulf %237, %244 : vector<8x128xf32>
    %250 = arith.mulf %249, %248 : vector<8x128xf32>
    %251 = arith.addf %210, %250 : vector<8x128xf32>
    %c6 = arith.constant 6 : index
    %c0_75 = arith.constant 0 : index
    %c0_76 = arith.constant 0 : index
    %252 = vector.load %arg2[%c6, %c0_75, %c0_76] : memref<20x8x128xf32, #tpu.memory_space<vmem>>, vector<1x8x128xf32>
    %253 = vector.shape_cast %252 : vector<1x8x128xf32> to vector<8x128xf32>
    %cst_77 = arith.constant 7.000000e+00 : f32
    %254 = vector.broadcast %cst_77 : f32 to vector<8x128xf32>
    %255 = arith.cmpf oeq, %4, %254 : vector<8x128xf32>
    %256 = arith.extui %255 : vector<8x128xi1> to vector<8x128xi32>
    %257 = arith.sitofp %256 : vector<8x128xi32> to vector<8x128xf32>
    %258 = math.absf %253 : vector<8x128xf32>
    %cst_78 = arith.constant 0.000000e+00 : f32
    %259 = vector.broadcast %cst_78 : f32 to vector<8x128xf32>
    %260 = arith.subf %259, %258 : vector<8x128xf32>
    %261 = math.exp %260 : vector<8x128xf32>
    %cst_79 = arith.constant 1.000000e+00 : f32
    %262 = vector.broadcast %cst_79 : f32 to vector<8x128xf32>
    %263 = arith.addf %262, %261 : vector<8x128xf32>
    %264 = tpu.reciprocal %263 {approx = true} : vector<8x128xf32> -> vector<8x128xf32>
    %265 = arith.mulf %263, %264 : vector<8x128xf32>
    %cst_80 = arith.constant 2.000000e+00 : f32
    %266 = vector.broadcast %cst_80 : f32 to vector<8x128xf32>
    %267 = arith.subf %266, %265 : vector<8x128xf32>
    %268 = arith.mulf %264, %267 : vector<8x128xf32>
    %cst_81 = arith.constant 0.000000e+00 : f32
    %269 = vector.broadcast %cst_81 : f32 to vector<8x128xf32>
    %270 = arith.cmpf oge, %253, %269 : vector<8x128xf32>
    %271 = arith.mulf %261, %268 : vector<8x128xf32>
    %272 = arith.select %270, %268, %271 : vector<8x128xi1>, vector<8x128xf32>
    %cst_82 = arith.constant 0.000000e+00 : f32
    %273 = vector.broadcast %cst_82 : f32 to vector<8x128xf32>
    %274 = arith.maximumf %253, %273 : vector<8x128xf32>
    %275 = arith.mulf %253, %257 : vector<8x128xf32>
    %276 = arith.subf %274, %275 : vector<8x128xf32>
    %277 = math.log %263 : vector<8x128xf32>
    %278 = arith.addf %276, %277 : vector<8x128xf32>
    %cst_83 = arith.constant 2.000000e+00 : f32
    %279 = vector.broadcast %cst_83 : f32 to vector<8x128xf32>
    %280 = arith.mulf %279, %272 : vector<8x128xf32>
    %cst_84 = arith.constant 1.000000e+00 : f32
    %281 = vector.broadcast %cst_84 : f32 to vector<8x128xf32>
    %282 = arith.subf %281, %280 : vector<8x128xf32>
    %283 = arith.mulf %257, %282 : vector<8x128xf32>
    %284 = arith.addf %272, %283 : vector<8x128xf32>
    %285 = arith.mulf %284, %284 : vector<8x128xf32>
    %cst_85 = arith.constant -5.000000e-01 : f32
    %286 = vector.broadcast %cst_85 : f32 to vector<8x128xf32>
    %287 = arith.mulf %286, %257 : vector<8x128xf32>
    %cst_86 = arith.constant 7.500000e-01 : f32
    %288 = vector.broadcast %cst_86 : f32 to vector<8x128xf32>
    %289 = arith.addf %288, %287 : vector<8x128xf32>
    %290 = arith.mulf %278, %285 : vector<8x128xf32>
    %291 = arith.mulf %290, %289 : vector<8x128xf32>
    %292 = arith.addf %251, %291 : vector<8x128xf32>
    %c7 = arith.constant 7 : index
    %c0_87 = arith.constant 0 : index
    %c0_88 = arith.constant 0 : index
    %293 = vector.load %arg2[%c7, %c0_87, %c0_88] : memref<20x8x128xf32, #tpu.memory_space<vmem>>, vector<1x8x128xf32>
    %294 = vector.shape_cast %293 : vector<1x8x128xf32> to vector<8x128xf32>
    %cst_89 = arith.constant 8.000000e+00 : f32
    %295 = vector.broadcast %cst_89 : f32 to vector<8x128xf32>
    %296 = arith.cmpf oeq, %4, %295 : vector<8x128xf32>
    %297 = arith.extui %296 : vector<8x128xi1> to vector<8x128xi32>
    %298 = arith.sitofp %297 : vector<8x128xi32> to vector<8x128xf32>
    %299 = math.absf %294 : vector<8x128xf32>
    %cst_90 = arith.constant 0.000000e+00 : f32
    %300 = vector.broadcast %cst_90 : f32 to vector<8x128xf32>
    %301 = arith.subf %300, %299 : vector<8x128xf32>
    %302 = math.exp %301 : vector<8x128xf32>
    %cst_91 = arith.constant 1.000000e+00 : f32
    %303 = vector.broadcast %cst_91 : f32 to vector<8x128xf32>
    %304 = arith.addf %303, %302 : vector<8x128xf32>
    %305 = tpu.reciprocal %304 {approx = true} : vector<8x128xf32> -> vector<8x128xf32>
    %306 = arith.mulf %304, %305 : vector<8x128xf32>
    %cst_92 = arith.constant 2.000000e+00 : f32
    %307 = vector.broadcast %cst_92 : f32 to vector<8x128xf32>
    %308 = arith.subf %307, %306 : vector<8x128xf32>
    %309 = arith.mulf %305, %308 : vector<8x128xf32>
    %cst_93 = arith.constant 0.000000e+00 : f32
    %310 = vector.broadcast %cst_93 : f32 to vector<8x128xf32>
    %311 = arith.cmpf oge, %294, %310 : vector<8x128xf32>
    %312 = arith.mulf %302, %309 : vector<8x128xf32>
    %313 = arith.select %311, %309, %312 : vector<8x128xi1>, vector<8x128xf32>
    %cst_94 = arith.constant 0.000000e+00 : f32
    %314 = vector.broadcast %cst_94 : f32 to vector<8x128xf32>
    %315 = arith.maximumf %294, %314 : vector<8x128xf32>
    %316 = arith.mulf %294, %298 : vector<8x128xf32>
    %317 = arith.subf %315, %316 : vector<8x128xf32>
    %318 = math.log %304 : vector<8x128xf32>
    %319 = arith.addf %317, %318 : vector<8x128xf32>
    %cst_95 = arith.constant 2.000000e+00 : f32
    %320 = vector.broadcast %cst_95 : f32 to vector<8x128xf32>
    %321 = arith.mulf %320, %313 : vector<8x128xf32>
    %cst_96 = arith.constant 1.000000e+00 : f32
    %322 = vector.broadcast %cst_96 : f32 to vector<8x128xf32>
    %323 = arith.subf %322, %321 : vector<8x128xf32>
    %324 = arith.mulf %298, %323 : vector<8x128xf32>
    %325 = arith.addf %313, %324 : vector<8x128xf32>
    %326 = arith.mulf %325, %325 : vector<8x128xf32>
    %cst_97 = arith.constant -5.000000e-01 : f32
    %327 = vector.broadcast %cst_97 : f32 to vector<8x128xf32>
    %328 = arith.mulf %327, %298 : vector<8x128xf32>
    %cst_98 = arith.constant 7.500000e-01 : f32
    %329 = vector.broadcast %cst_98 : f32 to vector<8x128xf32>
    %330 = arith.addf %329, %328 : vector<8x128xf32>
    %331 = arith.mulf %319, %326 : vector<8x128xf32>
    %332 = arith.mulf %331, %330 : vector<8x128xf32>
    %333 = arith.addf %292, %332 : vector<8x128xf32>
    %c8 = arith.constant 8 : index
    %c0_99 = arith.constant 0 : index
    %c0_100 = arith.constant 0 : index
    %334 = vector.load %arg2[%c8, %c0_99, %c0_100] : memref<20x8x128xf32, #tpu.memory_space<vmem>>, vector<1x8x128xf32>
    %335 = vector.shape_cast %334 : vector<1x8x128xf32> to vector<8x128xf32>
    %cst_101 = arith.constant 9.000000e+00 : f32
    %336 = vector.broadcast %cst_101 : f32 to vector<8x128xf32>
    %337 = arith.cmpf oeq, %4, %336 : vector<8x128xf32>
    %338 = arith.extui %337 : vector<8x128xi1> to vector<8x128xi32>
    %339 = arith.sitofp %338 : vector<8x128xi32> to vector<8x128xf32>
    %340 = math.absf %335 : vector<8x128xf32>
    %cst_102 = arith.constant 0.000000e+00 : f32
    %341 = vector.broadcast %cst_102 : f32 to vector<8x128xf32>
    %342 = arith.subf %341, %340 : vector<8x128xf32>
    %343 = math.exp %342 : vector<8x128xf32>
    %cst_103 = arith.constant 1.000000e+00 : f32
    %344 = vector.broadcast %cst_103 : f32 to vector<8x128xf32>
    %345 = arith.addf %344, %343 : vector<8x128xf32>
    %346 = tpu.reciprocal %345 {approx = true} : vector<8x128xf32> -> vector<8x128xf32>
    %347 = arith.mulf %345, %346 : vector<8x128xf32>
    %cst_104 = arith.constant 2.000000e+00 : f32
    %348 = vector.broadcast %cst_104 : f32 to vector<8x128xf32>
    %349 = arith.subf %348, %347 : vector<8x128xf32>
    %350 = arith.mulf %346, %349 : vector<8x128xf32>
    %cst_105 = arith.constant 0.000000e+00 : f32
    %351 = vector.broadcast %cst_105 : f32 to vector<8x128xf32>
    %352 = arith.cmpf oge, %335, %351 : vector<8x128xf32>
    %353 = arith.mulf %343, %350 : vector<8x128xf32>
    %354 = arith.select %352, %350, %353 : vector<8x128xi1>, vector<8x128xf32>
    %cst_106 = arith.constant 0.000000e+00 : f32
    %355 = vector.broadcast %cst_106 : f32 to vector<8x128xf32>
    %356 = arith.maximumf %335, %355 : vector<8x128xf32>
    %357 = arith.mulf %335, %339 : vector<8x128xf32>
    %358 = arith.subf %356, %357 : vector<8x128xf32>
    %359 = math.log %345 : vector<8x128xf32>
    %360 = arith.addf %358, %359 : vector<8x128xf32>
    %cst_107 = arith.constant 2.000000e+00 : f32
    %361 = vector.broadcast %cst_107 : f32 to vector<8x128xf32>
    %362 = arith.mulf %361, %354 : vector<8x128xf32>
    %cst_108 = arith.constant 1.000000e+00 : f32
    %363 = vector.broadcast %cst_108 : f32 to vector<8x128xf32>
    %364 = arith.subf %363, %362 : vector<8x128xf32>
    %365 = arith.mulf %339, %364 : vector<8x128xf32>
    %366 = arith.addf %354, %365 : vector<8x128xf32>
    %367 = arith.mulf %366, %366 : vector<8x128xf32>
    %cst_109 = arith.constant -5.000000e-01 : f32
    %368 = vector.broadcast %cst_109 : f32 to vector<8x128xf32>
    %369 = arith.mulf %368, %339 : vector<8x128xf32>
    %cst_110 = arith.constant 7.500000e-01 : f32
    %370 = vector.broadcast %cst_110 : f32 to vector<8x128xf32>
    %371 = arith.addf %370, %369 : vector<8x128xf32>
    %372 = arith.mulf %360, %367 : vector<8x128xf32>
    %373 = arith.mulf %372, %371 : vector<8x128xf32>
    %374 = arith.addf %333, %373 : vector<8x128xf32>
    %c9 = arith.constant 9 : index
    %c0_111 = arith.constant 0 : index
    %c0_112 = arith.constant 0 : index
    %375 = vector.load %arg2[%c9, %c0_111, %c0_112] : memref<20x8x128xf32, #tpu.memory_space<vmem>>, vector<1x8x128xf32>
    %376 = vector.shape_cast %375 : vector<1x8x128xf32> to vector<8x128xf32>
    %cst_113 = arith.constant 1.000000e+01 : f32
    %377 = vector.broadcast %cst_113 : f32 to vector<8x128xf32>
    %378 = arith.cmpf oeq, %4, %377 : vector<8x128xf32>
    %379 = arith.extui %378 : vector<8x128xi1> to vector<8x128xi32>
    %380 = arith.sitofp %379 : vector<8x128xi32> to vector<8x128xf32>
    %381 = math.absf %376 : vector<8x128xf32>
    %cst_114 = arith.constant 0.000000e+00 : f32
    %382 = vector.broadcast %cst_114 : f32 to vector<8x128xf32>
    %383 = arith.subf %382, %381 : vector<8x128xf32>
    %384 = math.exp %383 : vector<8x128xf32>
    %cst_115 = arith.constant 1.000000e+00 : f32
    %385 = vector.broadcast %cst_115 : f32 to vector<8x128xf32>
    %386 = arith.addf %385, %384 : vector<8x128xf32>
    %387 = tpu.reciprocal %386 {approx = true} : vector<8x128xf32> -> vector<8x128xf32>
    %388 = arith.mulf %386, %387 : vector<8x128xf32>
    %cst_116 = arith.constant 2.000000e+00 : f32
    %389 = vector.broadcast %cst_116 : f32 to vector<8x128xf32>
    %390 = arith.subf %389, %388 : vector<8x128xf32>
    %391 = arith.mulf %387, %390 : vector<8x128xf32>
    %cst_117 = arith.constant 0.000000e+00 : f32
    %392 = vector.broadcast %cst_117 : f32 to vector<8x128xf32>
    %393 = arith.cmpf oge, %376, %392 : vector<8x128xf32>
    %394 = arith.mulf %384, %391 : vector<8x128xf32>
    %395 = arith.select %393, %391, %394 : vector<8x128xi1>, vector<8x128xf32>
    %cst_118 = arith.constant 0.000000e+00 : f32
    %396 = vector.broadcast %cst_118 : f32 to vector<8x128xf32>
    %397 = arith.maximumf %376, %396 : vector<8x128xf32>
    %398 = arith.mulf %376, %380 : vector<8x128xf32>
    %399 = arith.subf %397, %398 : vector<8x128xf32>
    %400 = math.log %386 : vector<8x128xf32>
    %401 = arith.addf %399, %400 : vector<8x128xf32>
    %cst_119 = arith.constant 2.000000e+00 : f32
    %402 = vector.broadcast %cst_119 : f32 to vector<8x128xf32>
    %403 = arith.mulf %402, %395 : vector<8x128xf32>
    %cst_120 = arith.constant 1.000000e+00 : f32
    %404 = vector.broadcast %cst_120 : f32 to vector<8x128xf32>
    %405 = arith.subf %404, %403 : vector<8x128xf32>
    %406 = arith.mulf %380, %405 : vector<8x128xf32>
    %407 = arith.addf %395, %406 : vector<8x128xf32>
    %408 = arith.mulf %407, %407 : vector<8x128xf32>
    %cst_121 = arith.constant -5.000000e-01 : f32
    %409 = vector.broadcast %cst_121 : f32 to vector<8x128xf32>
    %410 = arith.mulf %409, %380 : vector<8x128xf32>
    %cst_122 = arith.constant 7.500000e-01 : f32
    %411 = vector.broadcast %cst_122 : f32 to vector<8x128xf32>
    %412 = arith.addf %411, %410 : vector<8x128xf32>
    %413 = arith.mulf %401, %408 : vector<8x128xf32>
    %414 = arith.mulf %413, %412 : vector<8x128xf32>
    %415 = arith.addf %374, %414 : vector<8x128xf32>
    %c10 = arith.constant 10 : index
    %c0_123 = arith.constant 0 : index
    %c0_124 = arith.constant 0 : index
    %416 = vector.load %arg2[%c10, %c0_123, %c0_124] : memref<20x8x128xf32, #tpu.memory_space<vmem>>, vector<1x8x128xf32>
    %417 = vector.shape_cast %416 : vector<1x8x128xf32> to vector<8x128xf32>
    %cst_125 = arith.constant 1.100000e+01 : f32
    %418 = vector.broadcast %cst_125 : f32 to vector<8x128xf32>
    %419 = arith.cmpf oeq, %4, %418 : vector<8x128xf32>
    %420 = arith.extui %419 : vector<8x128xi1> to vector<8x128xi32>
    %421 = arith.sitofp %420 : vector<8x128xi32> to vector<8x128xf32>
    %422 = math.absf %417 : vector<8x128xf32>
    %cst_126 = arith.constant 0.000000e+00 : f32
    %423 = vector.broadcast %cst_126 : f32 to vector<8x128xf32>
    %424 = arith.subf %423, %422 : vector<8x128xf32>
    %425 = math.exp %424 : vector<8x128xf32>
    %cst_127 = arith.constant 1.000000e+00 : f32
    %426 = vector.broadcast %cst_127 : f32 to vector<8x128xf32>
    %427 = arith.addf %426, %425 : vector<8x128xf32>
    %428 = tpu.reciprocal %427 {approx = true} : vector<8x128xf32> -> vector<8x128xf32>
    %429 = arith.mulf %427, %428 : vector<8x128xf32>
    %cst_128 = arith.constant 2.000000e+00 : f32
    %430 = vector.broadcast %cst_128 : f32 to vector<8x128xf32>
    %431 = arith.subf %430, %429 : vector<8x128xf32>
    %432 = arith.mulf %428, %431 : vector<8x128xf32>
    %cst_129 = arith.constant 0.000000e+00 : f32
    %433 = vector.broadcast %cst_129 : f32 to vector<8x128xf32>
    %434 = arith.cmpf oge, %417, %433 : vector<8x128xf32>
    %435 = arith.mulf %425, %432 : vector<8x128xf32>
    %436 = arith.select %434, %432, %435 : vector<8x128xi1>, vector<8x128xf32>
    %cst_130 = arith.constant 0.000000e+00 : f32
    %437 = vector.broadcast %cst_130 : f32 to vector<8x128xf32>
    %438 = arith.maximumf %417, %437 : vector<8x128xf32>
    %439 = arith.mulf %417, %421 : vector<8x128xf32>
    %440 = arith.subf %438, %439 : vector<8x128xf32>
    %441 = math.log %427 : vector<8x128xf32>
    %442 = arith.addf %440, %441 : vector<8x128xf32>
    %cst_131 = arith.constant 2.000000e+00 : f32
    %443 = vector.broadcast %cst_131 : f32 to vector<8x128xf32>
    %444 = arith.mulf %443, %436 : vector<8x128xf32>
    %cst_132 = arith.constant 1.000000e+00 : f32
    %445 = vector.broadcast %cst_132 : f32 to vector<8x128xf32>
    %446 = arith.subf %445, %444 : vector<8x128xf32>
    %447 = arith.mulf %421, %446 : vector<8x128xf32>
    %448 = arith.addf %436, %447 : vector<8x128xf32>
    %449 = arith.mulf %448, %448 : vector<8x128xf32>
    %cst_133 = arith.constant -5.000000e-01 : f32
    %450 = vector.broadcast %cst_133 : f32 to vector<8x128xf32>
    %451 = arith.mulf %450, %421 : vector<8x128xf32>
    %cst_134 = arith.constant 7.500000e-01 : f32
    %452 = vector.broadcast %cst_134 : f32 to vector<8x128xf32>
    %453 = arith.addf %452, %451 : vector<8x128xf32>
    %454 = arith.mulf %442, %449 : vector<8x128xf32>
    %455 = arith.mulf %454, %453 : vector<8x128xf32>
    %456 = arith.addf %415, %455 : vector<8x128xf32>
    %c11 = arith.constant 11 : index
    %c0_135 = arith.constant 0 : index
    %c0_136 = arith.constant 0 : index
    %457 = vector.load %arg2[%c11, %c0_135, %c0_136] : memref<20x8x128xf32, #tpu.memory_space<vmem>>, vector<1x8x128xf32>
    %458 = vector.shape_cast %457 : vector<1x8x128xf32> to vector<8x128xf32>
    %cst_137 = arith.constant 1.200000e+01 : f32
    %459 = vector.broadcast %cst_137 : f32 to vector<8x128xf32>
    %460 = arith.cmpf oeq, %4, %459 : vector<8x128xf32>
    %461 = arith.extui %460 : vector<8x128xi1> to vector<8x128xi32>
    %462 = arith.sitofp %461 : vector<8x128xi32> to vector<8x128xf32>
    %463 = math.absf %458 : vector<8x128xf32>
    %cst_138 = arith.constant 0.000000e+00 : f32
    %464 = vector.broadcast %cst_138 : f32 to vector<8x128xf32>
    %465 = arith.subf %464, %463 : vector<8x128xf32>
    %466 = math.exp %465 : vector<8x128xf32>
    %cst_139 = arith.constant 1.000000e+00 : f32
    %467 = vector.broadcast %cst_139 : f32 to vector<8x128xf32>
    %468 = arith.addf %467, %466 : vector<8x128xf32>
    %469 = tpu.reciprocal %468 {approx = true} : vector<8x128xf32> -> vector<8x128xf32>
    %470 = arith.mulf %468, %469 : vector<8x128xf32>
    %cst_140 = arith.constant 2.000000e+00 : f32
    %471 = vector.broadcast %cst_140 : f32 to vector<8x128xf32>
    %472 = arith.subf %471, %470 : vector<8x128xf32>
    %473 = arith.mulf %469, %472 : vector<8x128xf32>
    %cst_141 = arith.constant 0.000000e+00 : f32
    %474 = vector.broadcast %cst_141 : f32 to vector<8x128xf32>
    %475 = arith.cmpf oge, %458, %474 : vector<8x128xf32>
    %476 = arith.mulf %466, %473 : vector<8x128xf32>
    %477 = arith.select %475, %473, %476 : vector<8x128xi1>, vector<8x128xf32>
    %cst_142 = arith.constant 0.000000e+00 : f32
    %478 = vector.broadcast %cst_142 : f32 to vector<8x128xf32>
    %479 = arith.maximumf %458, %478 : vector<8x128xf32>
    %480 = arith.mulf %458, %462 : vector<8x128xf32>
    %481 = arith.subf %479, %480 : vector<8x128xf32>
    %482 = math.log %468 : vector<8x128xf32>
    %483 = arith.addf %481, %482 : vector<8x128xf32>
    %cst_143 = arith.constant 2.000000e+00 : f32
    %484 = vector.broadcast %cst_143 : f32 to vector<8x128xf32>
    %485 = arith.mulf %484, %477 : vector<8x128xf32>
    %cst_144 = arith.constant 1.000000e+00 : f32
    %486 = vector.broadcast %cst_144 : f32 to vector<8x128xf32>
    %487 = arith.subf %486, %485 : vector<8x128xf32>
    %488 = arith.mulf %462, %487 : vector<8x128xf32>
    %489 = arith.addf %477, %488 : vector<8x128xf32>
    %490 = arith.mulf %489, %489 : vector<8x128xf32>
    %cst_145 = arith.constant -5.000000e-01 : f32
    %491 = vector.broadcast %cst_145 : f32 to vector<8x128xf32>
    %492 = arith.mulf %491, %462 : vector<8x128xf32>
    %cst_146 = arith.constant 7.500000e-01 : f32
    %493 = vector.broadcast %cst_146 : f32 to vector<8x128xf32>
    %494 = arith.addf %493, %492 : vector<8x128xf32>
    %495 = arith.mulf %483, %490 : vector<8x128xf32>
    %496 = arith.mulf %495, %494 : vector<8x128xf32>
    %497 = arith.addf %456, %496 : vector<8x128xf32>
    %c12_147 = arith.constant 12 : index
    %c0_148 = arith.constant 0 : index
    %c0_149 = arith.constant 0 : index
    %498 = vector.load %arg2[%c12_147, %c0_148, %c0_149] : memref<20x8x128xf32, #tpu.memory_space<vmem>>, vector<1x8x128xf32>
    %499 = vector.shape_cast %498 : vector<1x8x128xf32> to vector<8x128xf32>
    %cst_150 = arith.constant 1.300000e+01 : f32
    %500 = vector.broadcast %cst_150 : f32 to vector<8x128xf32>
    %501 = arith.cmpf oeq, %4, %500 : vector<8x128xf32>
    %502 = arith.extui %501 : vector<8x128xi1> to vector<8x128xi32>
    %503 = arith.sitofp %502 : vector<8x128xi32> to vector<8x128xf32>
    %504 = math.absf %499 : vector<8x128xf32>
    %cst_151 = arith.constant 0.000000e+00 : f32
    %505 = vector.broadcast %cst_151 : f32 to vector<8x128xf32>
    %506 = arith.subf %505, %504 : vector<8x128xf32>
    %507 = math.exp %506 : vector<8x128xf32>
    %cst_152 = arith.constant 1.000000e+00 : f32
    %508 = vector.broadcast %cst_152 : f32 to vector<8x128xf32>
    %509 = arith.addf %508, %507 : vector<8x128xf32>
    %510 = tpu.reciprocal %509 {approx = true} : vector<8x128xf32> -> vector<8x128xf32>
    %511 = arith.mulf %509, %510 : vector<8x128xf32>
    %cst_153 = arith.constant 2.000000e+00 : f32
    %512 = vector.broadcast %cst_153 : f32 to vector<8x128xf32>
    %513 = arith.subf %512, %511 : vector<8x128xf32>
    %514 = arith.mulf %510, %513 : vector<8x128xf32>
    %cst_154 = arith.constant 0.000000e+00 : f32
    %515 = vector.broadcast %cst_154 : f32 to vector<8x128xf32>
    %516 = arith.cmpf oge, %499, %515 : vector<8x128xf32>
    %517 = arith.mulf %507, %514 : vector<8x128xf32>
    %518 = arith.select %516, %514, %517 : vector<8x128xi1>, vector<8x128xf32>
    %cst_155 = arith.constant 0.000000e+00 : f32
    %519 = vector.broadcast %cst_155 : f32 to vector<8x128xf32>
    %520 = arith.maximumf %499, %519 : vector<8x128xf32>
    %521 = arith.mulf %499, %503 : vector<8x128xf32>
    %522 = arith.subf %520, %521 : vector<8x128xf32>
    %523 = math.log %509 : vector<8x128xf32>
    %524 = arith.addf %522, %523 : vector<8x128xf32>
    %cst_156 = arith.constant 2.000000e+00 : f32
    %525 = vector.broadcast %cst_156 : f32 to vector<8x128xf32>
    %526 = arith.mulf %525, %518 : vector<8x128xf32>
    %cst_157 = arith.constant 1.000000e+00 : f32
    %527 = vector.broadcast %cst_157 : f32 to vector<8x128xf32>
    %528 = arith.subf %527, %526 : vector<8x128xf32>
    %529 = arith.mulf %503, %528 : vector<8x128xf32>
    %530 = arith.addf %518, %529 : vector<8x128xf32>
    %531 = arith.mulf %530, %530 : vector<8x128xf32>
    %cst_158 = arith.constant -5.000000e-01 : f32
    %532 = vector.broadcast %cst_158 : f32 to vector<8x128xf32>
    %533 = arith.mulf %532, %503 : vector<8x128xf32>
    %cst_159 = arith.constant 7.500000e-01 : f32
    %534 = vector.broadcast %cst_159 : f32 to vector<8x128xf32>
    %535 = arith.addf %534, %533 : vector<8x128xf32>
    %536 = arith.mulf %524, %531 : vector<8x128xf32>
    %537 = arith.mulf %536, %535 : vector<8x128xf32>
    %538 = arith.addf %497, %537 : vector<8x128xf32>
    %c13 = arith.constant 13 : index
    %c0_160 = arith.constant 0 : index
    %c0_161 = arith.constant 0 : index
    %539 = vector.load %arg2[%c13, %c0_160, %c0_161] : memref<20x8x128xf32, #tpu.memory_space<vmem>>, vector<1x8x128xf32>
    %540 = vector.shape_cast %539 : vector<1x8x128xf32> to vector<8x128xf32>
    %cst_162 = arith.constant 1.400000e+01 : f32
    %541 = vector.broadcast %cst_162 : f32 to vector<8x128xf32>
    %542 = arith.cmpf oeq, %4, %541 : vector<8x128xf32>
    %543 = arith.extui %542 : vector<8x128xi1> to vector<8x128xi32>
    %544 = arith.sitofp %543 : vector<8x128xi32> to vector<8x128xf32>
    %545 = math.absf %540 : vector<8x128xf32>
    %cst_163 = arith.constant 0.000000e+00 : f32
    %546 = vector.broadcast %cst_163 : f32 to vector<8x128xf32>
    %547 = arith.subf %546, %545 : vector<8x128xf32>
    %548 = math.exp %547 : vector<8x128xf32>
    %cst_164 = arith.constant 1.000000e+00 : f32
    %549 = vector.broadcast %cst_164 : f32 to vector<8x128xf32>
    %550 = arith.addf %549, %548 : vector<8x128xf32>
    %551 = tpu.reciprocal %550 {approx = true} : vector<8x128xf32> -> vector<8x128xf32>
    %552 = arith.mulf %550, %551 : vector<8x128xf32>
    %cst_165 = arith.constant 2.000000e+00 : f32
    %553 = vector.broadcast %cst_165 : f32 to vector<8x128xf32>
    %554 = arith.subf %553, %552 : vector<8x128xf32>
    %555 = arith.mulf %551, %554 : vector<8x128xf32>
    %cst_166 = arith.constant 0.000000e+00 : f32
    %556 = vector.broadcast %cst_166 : f32 to vector<8x128xf32>
    %557 = arith.cmpf oge, %540, %556 : vector<8x128xf32>
    %558 = arith.mulf %548, %555 : vector<8x128xf32>
    %559 = arith.select %557, %555, %558 : vector<8x128xi1>, vector<8x128xf32>
    %cst_167 = arith.constant 0.000000e+00 : f32
    %560 = vector.broadcast %cst_167 : f32 to vector<8x128xf32>
    %561 = arith.maximumf %540, %560 : vector<8x128xf32>
    %562 = arith.mulf %540, %544 : vector<8x128xf32>
    %563 = arith.subf %561, %562 : vector<8x128xf32>
    %564 = math.log %550 : vector<8x128xf32>
    %565 = arith.addf %563, %564 : vector<8x128xf32>
    %cst_168 = arith.constant 2.000000e+00 : f32
    %566 = vector.broadcast %cst_168 : f32 to vector<8x128xf32>
    %567 = arith.mulf %566, %559 : vector<8x128xf32>
    %cst_169 = arith.constant 1.000000e+00 : f32
    %568 = vector.broadcast %cst_169 : f32 to vector<8x128xf32>
    %569 = arith.subf %568, %567 : vector<8x128xf32>
    %570 = arith.mulf %544, %569 : vector<8x128xf32>
    %571 = arith.addf %559, %570 : vector<8x128xf32>
    %572 = arith.mulf %571, %571 : vector<8x128xf32>
    %cst_170 = arith.constant -5.000000e-01 : f32
    %573 = vector.broadcast %cst_170 : f32 to vector<8x128xf32>
    %574 = arith.mulf %573, %544 : vector<8x128xf32>
    %cst_171 = arith.constant 7.500000e-01 : f32
    %575 = vector.broadcast %cst_171 : f32 to vector<8x128xf32>
    %576 = arith.addf %575, %574 : vector<8x128xf32>
    %577 = arith.mulf %565, %572 : vector<8x128xf32>
    %578 = arith.mulf %577, %576 : vector<8x128xf32>
    %579 = arith.addf %538, %578 : vector<8x128xf32>
    %c14 = arith.constant 14 : index
    %c0_172 = arith.constant 0 : index
    %c0_173 = arith.constant 0 : index
    %580 = vector.load %arg2[%c14, %c0_172, %c0_173] : memref<20x8x128xf32, #tpu.memory_space<vmem>>, vector<1x8x128xf32>
    %581 = vector.shape_cast %580 : vector<1x8x128xf32> to vector<8x128xf32>
    %cst_174 = arith.constant 1.500000e+01 : f32
    %582 = vector.broadcast %cst_174 : f32 to vector<8x128xf32>
    %583 = arith.cmpf oeq, %4, %582 : vector<8x128xf32>
    %584 = arith.extui %583 : vector<8x128xi1> to vector<8x128xi32>
    %585 = arith.sitofp %584 : vector<8x128xi32> to vector<8x128xf32>
    %586 = math.absf %581 : vector<8x128xf32>
    %cst_175 = arith.constant 0.000000e+00 : f32
    %587 = vector.broadcast %cst_175 : f32 to vector<8x128xf32>
    %588 = arith.subf %587, %586 : vector<8x128xf32>
    %589 = math.exp %588 : vector<8x128xf32>
    %cst_176 = arith.constant 1.000000e+00 : f32
    %590 = vector.broadcast %cst_176 : f32 to vector<8x128xf32>
    %591 = arith.addf %590, %589 : vector<8x128xf32>
    %592 = tpu.reciprocal %591 {approx = true} : vector<8x128xf32> -> vector<8x128xf32>
    %593 = arith.mulf %591, %592 : vector<8x128xf32>
    %cst_177 = arith.constant 2.000000e+00 : f32
    %594 = vector.broadcast %cst_177 : f32 to vector<8x128xf32>
    %595 = arith.subf %594, %593 : vector<8x128xf32>
    %596 = arith.mulf %592, %595 : vector<8x128xf32>
    %cst_178 = arith.constant 0.000000e+00 : f32
    %597 = vector.broadcast %cst_178 : f32 to vector<8x128xf32>
    %598 = arith.cmpf oge, %581, %597 : vector<8x128xf32>
    %599 = arith.mulf %589, %596 : vector<8x128xf32>
    %600 = arith.select %598, %596, %599 : vector<8x128xi1>, vector<8x128xf32>
    %cst_179 = arith.constant 0.000000e+00 : f32
    %601 = vector.broadcast %cst_179 : f32 to vector<8x128xf32>
    %602 = arith.maximumf %581, %601 : vector<8x128xf32>
    %603 = arith.mulf %581, %585 : vector<8x128xf32>
    %604 = arith.subf %602, %603 : vector<8x128xf32>
    %605 = math.log %591 : vector<8x128xf32>
    %606 = arith.addf %604, %605 : vector<8x128xf32>
    %cst_180 = arith.constant 2.000000e+00 : f32
    %607 = vector.broadcast %cst_180 : f32 to vector<8x128xf32>
    %608 = arith.mulf %607, %600 : vector<8x128xf32>
    %cst_181 = arith.constant 1.000000e+00 : f32
    %609 = vector.broadcast %cst_181 : f32 to vector<8x128xf32>
    %610 = arith.subf %609, %608 : vector<8x128xf32>
    %611 = arith.mulf %585, %610 : vector<8x128xf32>
    %612 = arith.addf %600, %611 : vector<8x128xf32>
    %613 = arith.mulf %612, %612 : vector<8x128xf32>
    %cst_182 = arith.constant -5.000000e-01 : f32
    %614 = vector.broadcast %cst_182 : f32 to vector<8x128xf32>
    %615 = arith.mulf %614, %585 : vector<8x128xf32>
    %cst_183 = arith.constant 7.500000e-01 : f32
    %616 = vector.broadcast %cst_183 : f32 to vector<8x128xf32>
    %617 = arith.addf %616, %615 : vector<8x128xf32>
    %618 = arith.mulf %606, %613 : vector<8x128xf32>
    %619 = arith.mulf %618, %617 : vector<8x128xf32>
    %620 = arith.addf %579, %619 : vector<8x128xf32>
    %c15 = arith.constant 15 : index
    %c0_184 = arith.constant 0 : index
    %c0_185 = arith.constant 0 : index
    %621 = vector.load %arg2[%c15, %c0_184, %c0_185] : memref<20x8x128xf32, #tpu.memory_space<vmem>>, vector<1x8x128xf32>
    %622 = vector.shape_cast %621 : vector<1x8x128xf32> to vector<8x128xf32>
    %cst_186 = arith.constant 1.600000e+01 : f32
    %623 = vector.broadcast %cst_186 : f32 to vector<8x128xf32>
    %624 = arith.cmpf oeq, %4, %623 : vector<8x128xf32>
    %625 = arith.extui %624 : vector<8x128xi1> to vector<8x128xi32>
    %626 = arith.sitofp %625 : vector<8x128xi32> to vector<8x128xf32>
    %627 = math.absf %622 : vector<8x128xf32>
    %cst_187 = arith.constant 0.000000e+00 : f32
    %628 = vector.broadcast %cst_187 : f32 to vector<8x128xf32>
    %629 = arith.subf %628, %627 : vector<8x128xf32>
    %630 = math.exp %629 : vector<8x128xf32>
    %cst_188 = arith.constant 1.000000e+00 : f32
    %631 = vector.broadcast %cst_188 : f32 to vector<8x128xf32>
    %632 = arith.addf %631, %630 : vector<8x128xf32>
    %633 = tpu.reciprocal %632 {approx = true} : vector<8x128xf32> -> vector<8x128xf32>
    %634 = arith.mulf %632, %633 : vector<8x128xf32>
    %cst_189 = arith.constant 2.000000e+00 : f32
    %635 = vector.broadcast %cst_189 : f32 to vector<8x128xf32>
    %636 = arith.subf %635, %634 : vector<8x128xf32>
    %637 = arith.mulf %633, %636 : vector<8x128xf32>
    %cst_190 = arith.constant 0.000000e+00 : f32
    %638 = vector.broadcast %cst_190 : f32 to vector<8x128xf32>
    %639 = arith.cmpf oge, %622, %638 : vector<8x128xf32>
    %640 = arith.mulf %630, %637 : vector<8x128xf32>
    %641 = arith.select %639, %637, %640 : vector<8x128xi1>, vector<8x128xf32>
    %cst_191 = arith.constant 0.000000e+00 : f32
    %642 = vector.broadcast %cst_191 : f32 to vector<8x128xf32>
    %643 = arith.maximumf %622, %642 : vector<8x128xf32>
    %644 = arith.mulf %622, %626 : vector<8x128xf32>
    %645 = arith.subf %643, %644 : vector<8x128xf32>
    %646 = math.log %632 : vector<8x128xf32>
    %647 = arith.addf %645, %646 : vector<8x128xf32>
    %cst_192 = arith.constant 2.000000e+00 : f32
    %648 = vector.broadcast %cst_192 : f32 to vector<8x128xf32>
    %649 = arith.mulf %648, %641 : vector<8x128xf32>
    %cst_193 = arith.constant 1.000000e+00 : f32
    %650 = vector.broadcast %cst_193 : f32 to vector<8x128xf32>
    %651 = arith.subf %650, %649 : vector<8x128xf32>
    %652 = arith.mulf %626, %651 : vector<8x128xf32>
    %653 = arith.addf %641, %652 : vector<8x128xf32>
    %654 = arith.mulf %653, %653 : vector<8x128xf32>
    %cst_194 = arith.constant -5.000000e-01 : f32
    %655 = vector.broadcast %cst_194 : f32 to vector<8x128xf32>
    %656 = arith.mulf %655, %626 : vector<8x128xf32>
    %cst_195 = arith.constant 7.500000e-01 : f32
    %657 = vector.broadcast %cst_195 : f32 to vector<8x128xf32>
    %658 = arith.addf %657, %656 : vector<8x128xf32>
    %659 = arith.mulf %647, %654 : vector<8x128xf32>
    %660 = arith.mulf %659, %658 : vector<8x128xf32>
    %661 = arith.addf %620, %660 : vector<8x128xf32>
    %c16 = arith.constant 16 : index
    %c0_196 = arith.constant 0 : index
    %c0_197 = arith.constant 0 : index
    %662 = vector.load %arg2[%c16, %c0_196, %c0_197] : memref<20x8x128xf32, #tpu.memory_space<vmem>>, vector<1x8x128xf32>
    %663 = vector.shape_cast %662 : vector<1x8x128xf32> to vector<8x128xf32>
    %cst_198 = arith.constant 1.700000e+01 : f32
    %664 = vector.broadcast %cst_198 : f32 to vector<8x128xf32>
    %665 = arith.cmpf oeq, %4, %664 : vector<8x128xf32>
    %666 = arith.extui %665 : vector<8x128xi1> to vector<8x128xi32>
    %667 = arith.sitofp %666 : vector<8x128xi32> to vector<8x128xf32>
    %668 = math.absf %663 : vector<8x128xf32>
    %cst_199 = arith.constant 0.000000e+00 : f32
    %669 = vector.broadcast %cst_199 : f32 to vector<8x128xf32>
    %670 = arith.subf %669, %668 : vector<8x128xf32>
    %671 = math.exp %670 : vector<8x128xf32>
    %cst_200 = arith.constant 1.000000e+00 : f32
    %672 = vector.broadcast %cst_200 : f32 to vector<8x128xf32>
    %673 = arith.addf %672, %671 : vector<8x128xf32>
    %674 = tpu.reciprocal %673 {approx = true} : vector<8x128xf32> -> vector<8x128xf32>
    %675 = arith.mulf %673, %674 : vector<8x128xf32>
    %cst_201 = arith.constant 2.000000e+00 : f32
    %676 = vector.broadcast %cst_201 : f32 to vector<8x128xf32>
    %677 = arith.subf %676, %675 : vector<8x128xf32>
    %678 = arith.mulf %674, %677 : vector<8x128xf32>
    %cst_202 = arith.constant 0.000000e+00 : f32
    %679 = vector.broadcast %cst_202 : f32 to vector<8x128xf32>
    %680 = arith.cmpf oge, %663, %679 : vector<8x128xf32>
    %681 = arith.mulf %671, %678 : vector<8x128xf32>
    %682 = arith.select %680, %678, %681 : vector<8x128xi1>, vector<8x128xf32>
    %cst_203 = arith.constant 0.000000e+00 : f32
    %683 = vector.broadcast %cst_203 : f32 to vector<8x128xf32>
    %684 = arith.maximumf %663, %683 : vector<8x128xf32>
    %685 = arith.mulf %663, %667 : vector<8x128xf32>
    %686 = arith.subf %684, %685 : vector<8x128xf32>
    %687 = math.log %673 : vector<8x128xf32>
    %688 = arith.addf %686, %687 : vector<8x128xf32>
    %cst_204 = arith.constant 2.000000e+00 : f32
    %689 = vector.broadcast %cst_204 : f32 to vector<8x128xf32>
    %690 = arith.mulf %689, %682 : vector<8x128xf32>
    %cst_205 = arith.constant 1.000000e+00 : f32
    %691 = vector.broadcast %cst_205 : f32 to vector<8x128xf32>
    %692 = arith.subf %691, %690 : vector<8x128xf32>
    %693 = arith.mulf %667, %692 : vector<8x128xf32>
    %694 = arith.addf %682, %693 : vector<8x128xf32>
    %695 = arith.mulf %694, %694 : vector<8x128xf32>
    %cst_206 = arith.constant -5.000000e-01 : f32
    %696 = vector.broadcast %cst_206 : f32 to vector<8x128xf32>
    %697 = arith.mulf %696, %667 : vector<8x128xf32>
    %cst_207 = arith.constant 7.500000e-01 : f32
    %698 = vector.broadcast %cst_207 : f32 to vector<8x128xf32>
    %699 = arith.addf %698, %697 : vector<8x128xf32>
    %700 = arith.mulf %688, %695 : vector<8x128xf32>
    %701 = arith.mulf %700, %699 : vector<8x128xf32>
    %702 = arith.addf %661, %701 : vector<8x128xf32>
    %c17 = arith.constant 17 : index
    %c0_208 = arith.constant 0 : index
    %c0_209 = arith.constant 0 : index
    %703 = vector.load %arg2[%c17, %c0_208, %c0_209] : memref<20x8x128xf32, #tpu.memory_space<vmem>>, vector<1x8x128xf32>
    %704 = vector.shape_cast %703 : vector<1x8x128xf32> to vector<8x128xf32>
    %cst_210 = arith.constant 1.800000e+01 : f32
    %705 = vector.broadcast %cst_210 : f32 to vector<8x128xf32>
    %706 = arith.cmpf oeq, %4, %705 : vector<8x128xf32>
    %707 = arith.extui %706 : vector<8x128xi1> to vector<8x128xi32>
    %708 = arith.sitofp %707 : vector<8x128xi32> to vector<8x128xf32>
    %709 = math.absf %704 : vector<8x128xf32>
    %cst_211 = arith.constant 0.000000e+00 : f32
    %710 = vector.broadcast %cst_211 : f32 to vector<8x128xf32>
    %711 = arith.subf %710, %709 : vector<8x128xf32>
    %712 = math.exp %711 : vector<8x128xf32>
    %cst_212 = arith.constant 1.000000e+00 : f32
    %713 = vector.broadcast %cst_212 : f32 to vector<8x128xf32>
    %714 = arith.addf %713, %712 : vector<8x128xf32>
    %715 = tpu.reciprocal %714 {approx = true} : vector<8x128xf32> -> vector<8x128xf32>
    %716 = arith.mulf %714, %715 : vector<8x128xf32>
    %cst_213 = arith.constant 2.000000e+00 : f32
    %717 = vector.broadcast %cst_213 : f32 to vector<8x128xf32>
    %718 = arith.subf %717, %716 : vector<8x128xf32>
    %719 = arith.mulf %715, %718 : vector<8x128xf32>
    %cst_214 = arith.constant 0.000000e+00 : f32
    %720 = vector.broadcast %cst_214 : f32 to vector<8x128xf32>
    %721 = arith.cmpf oge, %704, %720 : vector<8x128xf32>
    %722 = arith.mulf %712, %719 : vector<8x128xf32>
    %723 = arith.select %721, %719, %722 : vector<8x128xi1>, vector<8x128xf32>
    %cst_215 = arith.constant 0.000000e+00 : f32
    %724 = vector.broadcast %cst_215 : f32 to vector<8x128xf32>
    %725 = arith.maximumf %704, %724 : vector<8x128xf32>
    %726 = arith.mulf %704, %708 : vector<8x128xf32>
    %727 = arith.subf %725, %726 : vector<8x128xf32>
    %728 = math.log %714 : vector<8x128xf32>
    %729 = arith.addf %727, %728 : vector<8x128xf32>
    %cst_216 = arith.constant 2.000000e+00 : f32
    %730 = vector.broadcast %cst_216 : f32 to vector<8x128xf32>
    %731 = arith.mulf %730, %723 : vector<8x128xf32>
    %cst_217 = arith.constant 1.000000e+00 : f32
    %732 = vector.broadcast %cst_217 : f32 to vector<8x128xf32>
    %733 = arith.subf %732, %731 : vector<8x128xf32>
    %734 = arith.mulf %708, %733 : vector<8x128xf32>
    %735 = arith.addf %723, %734 : vector<8x128xf32>
    %736 = arith.mulf %735, %735 : vector<8x128xf32>
    %cst_218 = arith.constant -5.000000e-01 : f32
    %737 = vector.broadcast %cst_218 : f32 to vector<8x128xf32>
    %738 = arith.mulf %737, %708 : vector<8x128xf32>
    %cst_219 = arith.constant 7.500000e-01 : f32
    %739 = vector.broadcast %cst_219 : f32 to vector<8x128xf32>
    %740 = arith.addf %739, %738 : vector<8x128xf32>
    %741 = arith.mulf %729, %736 : vector<8x128xf32>
    %742 = arith.mulf %741, %740 : vector<8x128xf32>
    %743 = arith.addf %702, %742 : vector<8x128xf32>
    %c18 = arith.constant 18 : index
    %c0_220 = arith.constant 0 : index
    %c0_221 = arith.constant 0 : index
    %744 = vector.load %arg2[%c18, %c0_220, %c0_221] : memref<20x8x128xf32, #tpu.memory_space<vmem>>, vector<1x8x128xf32>
    %745 = vector.shape_cast %744 : vector<1x8x128xf32> to vector<8x128xf32>
    %cst_222 = arith.constant 1.900000e+01 : f32
    %746 = vector.broadcast %cst_222 : f32 to vector<8x128xf32>
    %747 = arith.cmpf oeq, %4, %746 : vector<8x128xf32>
    %748 = arith.extui %747 : vector<8x128xi1> to vector<8x128xi32>
    %749 = arith.sitofp %748 : vector<8x128xi32> to vector<8x128xf32>
    %750 = math.absf %745 : vector<8x128xf32>
    %cst_223 = arith.constant 0.000000e+00 : f32
    %751 = vector.broadcast %cst_223 : f32 to vector<8x128xf32>
    %752 = arith.subf %751, %750 : vector<8x128xf32>
    %753 = math.exp %752 : vector<8x128xf32>
    %cst_224 = arith.constant 1.000000e+00 : f32
    %754 = vector.broadcast %cst_224 : f32 to vector<8x128xf32>
    %755 = arith.addf %754, %753 : vector<8x128xf32>
    %756 = tpu.reciprocal %755 {approx = true} : vector<8x128xf32> -> vector<8x128xf32>
    %757 = arith.mulf %755, %756 : vector<8x128xf32>
    %cst_225 = arith.constant 2.000000e+00 : f32
    %758 = vector.broadcast %cst_225 : f32 to vector<8x128xf32>
    %759 = arith.subf %758, %757 : vector<8x128xf32>
    %760 = arith.mulf %756, %759 : vector<8x128xf32>
    %cst_226 = arith.constant 0.000000e+00 : f32
    %761 = vector.broadcast %cst_226 : f32 to vector<8x128xf32>
    %762 = arith.cmpf oge, %745, %761 : vector<8x128xf32>
    %763 = arith.mulf %753, %760 : vector<8x128xf32>
    %764 = arith.select %762, %760, %763 : vector<8x128xi1>, vector<8x128xf32>
    %cst_227 = arith.constant 0.000000e+00 : f32
    %765 = vector.broadcast %cst_227 : f32 to vector<8x128xf32>
    %766 = arith.maximumf %745, %765 : vector<8x128xf32>
    %767 = arith.mulf %745, %749 : vector<8x128xf32>
    %768 = arith.subf %766, %767 : vector<8x128xf32>
    %769 = math.log %755 : vector<8x128xf32>
    %770 = arith.addf %768, %769 : vector<8x128xf32>
    %cst_228 = arith.constant 2.000000e+00 : f32
    %771 = vector.broadcast %cst_228 : f32 to vector<8x128xf32>
    %772 = arith.mulf %771, %764 : vector<8x128xf32>
    %cst_229 = arith.constant 1.000000e+00 : f32
    %773 = vector.broadcast %cst_229 : f32 to vector<8x128xf32>
    %774 = arith.subf %773, %772 : vector<8x128xf32>
    %775 = arith.mulf %749, %774 : vector<8x128xf32>
    %776 = arith.addf %764, %775 : vector<8x128xf32>
    %777 = arith.mulf %776, %776 : vector<8x128xf32>
    %cst_230 = arith.constant -5.000000e-01 : f32
    %778 = vector.broadcast %cst_230 : f32 to vector<8x128xf32>
    %779 = arith.mulf %778, %749 : vector<8x128xf32>
    %cst_231 = arith.constant 7.500000e-01 : f32
    %780 = vector.broadcast %cst_231 : f32 to vector<8x128xf32>
    %781 = arith.addf %780, %779 : vector<8x128xf32>
    %782 = arith.mulf %770, %777 : vector<8x128xf32>
    %783 = arith.mulf %782, %781 : vector<8x128xf32>
    %784 = arith.addf %743, %783 : vector<8x128xf32>
    %c19 = arith.constant 19 : index
    %c0_232 = arith.constant 0 : index
    %c0_233 = arith.constant 0 : index
    %785 = vector.load %arg2[%c19, %c0_232, %c0_233] : memref<20x8x128xf32, #tpu.memory_space<vmem>>, vector<1x8x128xf32>
    %786 = vector.shape_cast %785 : vector<1x8x128xf32> to vector<8x128xf32>
    %cst_234 = arith.constant 2.000000e+01 : f32
    %787 = vector.broadcast %cst_234 : f32 to vector<8x128xf32>
    %788 = arith.cmpf oeq, %4, %787 : vector<8x128xf32>
    %789 = arith.extui %788 : vector<8x128xi1> to vector<8x128xi32>
    %790 = arith.sitofp %789 : vector<8x128xi32> to vector<8x128xf32>
    %791 = math.absf %786 : vector<8x128xf32>
    %cst_235 = arith.constant 0.000000e+00 : f32
    %792 = vector.broadcast %cst_235 : f32 to vector<8x128xf32>
    %793 = arith.subf %792, %791 : vector<8x128xf32>
    %794 = math.exp %793 : vector<8x128xf32>
    %cst_236 = arith.constant 1.000000e+00 : f32
    %795 = vector.broadcast %cst_236 : f32 to vector<8x128xf32>
    %796 = arith.addf %795, %794 : vector<8x128xf32>
    %797 = tpu.reciprocal %796 {approx = true} : vector<8x128xf32> -> vector<8x128xf32>
    %798 = arith.mulf %796, %797 : vector<8x128xf32>
    %cst_237 = arith.constant 2.000000e+00 : f32
    %799 = vector.broadcast %cst_237 : f32 to vector<8x128xf32>
    %800 = arith.subf %799, %798 : vector<8x128xf32>
    %801 = arith.mulf %797, %800 : vector<8x128xf32>
    %cst_238 = arith.constant 0.000000e+00 : f32
    %802 = vector.broadcast %cst_238 : f32 to vector<8x128xf32>
    %803 = arith.cmpf oge, %786, %802 : vector<8x128xf32>
    %804 = arith.mulf %794, %801 : vector<8x128xf32>
    %805 = arith.select %803, %801, %804 : vector<8x128xi1>, vector<8x128xf32>
    %cst_239 = arith.constant 0.000000e+00 : f32
    %806 = vector.broadcast %cst_239 : f32 to vector<8x128xf32>
    %807 = arith.maximumf %786, %806 : vector<8x128xf32>
    %808 = arith.mulf %786, %790 : vector<8x128xf32>
    %809 = arith.subf %807, %808 : vector<8x128xf32>
    %810 = math.log %796 : vector<8x128xf32>
    %811 = arith.addf %809, %810 : vector<8x128xf32>
    %cst_240 = arith.constant 2.000000e+00 : f32
    %812 = vector.broadcast %cst_240 : f32 to vector<8x128xf32>
    %813 = arith.mulf %812, %805 : vector<8x128xf32>
    %cst_241 = arith.constant 1.000000e+00 : f32
    %814 = vector.broadcast %cst_241 : f32 to vector<8x128xf32>
    %815 = arith.subf %814, %813 : vector<8x128xf32>
    %816 = arith.mulf %790, %815 : vector<8x128xf32>
    %817 = arith.addf %805, %816 : vector<8x128xf32>
    %818 = arith.mulf %817, %817 : vector<8x128xf32>
    %cst_242 = arith.constant -5.000000e-01 : f32
    %819 = vector.broadcast %cst_242 : f32 to vector<8x128xf32>
    %820 = arith.mulf %819, %790 : vector<8x128xf32>
    %cst_243 = arith.constant 7.500000e-01 : f32
    %821 = vector.broadcast %cst_243 : f32 to vector<8x128xf32>
    %822 = arith.addf %821, %820 : vector<8x128xf32>
    %823 = arith.mulf %811, %818 : vector<8x128xf32>
    %824 = arith.mulf %823, %822 : vector<8x128xf32>
    %825 = arith.addf %784, %824 : vector<8x128xf32>
    %c1_i32 = arith.constant 1 : i32
    %826 = arith.muli %arg0, %c1_i32 : i32
    %827 = arith.addi %826, %arg1 : i32
    %c1_i32_244 = arith.constant 1 : i32
    %828 = arith.addi %827, %c1_i32_244 : i32
    %c1024_i32 = arith.constant 1024 : i32
    %829 = arith.muli %828, %c1024_i32 : i32
    %c512_i32 = arith.constant 512 : i32
    %830 = arith.cmpi sgt, %829, %c512_i32 : i32
    %831 = arith.extui %830 : i1 to i32
    %c0_i32_245 = arith.constant 0 : i32
    %832 = arith.cmpi ne, %831, %c0_i32_245 : i32
    scf.if %832 {
      %941 = tpu.iota {dimensions = array<i32: 0>} : vector<8x128xi32>
      %942 = tpu.iota {dimensions = array<i32: 1>} : vector<8x128xi32>
      %c8_i32 = arith.constant 8 : i32
      %943 = arith.muli %827, %c8_i32 : i32
      %944 = vector.broadcast %943 : i32 to vector<8x128xi32>
      %945 = arith.addi %944, %941 : vector<8x128xi32>
      %c128_i32 = arith.constant 128 : i32
      %946 = vector.broadcast %c128_i32 : i32 to vector<8x128xi32>
      %947 = arith.muli %945, %946 : vector<8x128xi32>
      %948 = arith.addi %947, %942 : vector<8x128xi32>
      %c0_317 = arith.constant 0 : index
      %c0_318 = arith.constant 0 : index
      %949 = vector.load %arg5[%c0_317, %c0_318] : memref<8x128xf32, #tpu.memory_space<vmem>>, vector<8x128xf32>
      %c512_i32_319 = arith.constant 512 : i32
      %950 = vector.broadcast %c512_i32_319 : i32 to vector<8x128xi32>
      %951 = arith.cmpi slt, %948, %950 : vector<8x128xi32>
      %cst_320 = arith.constant 0.000000e+00 : f32
      %952 = vector.broadcast %cst_320 : f32 to vector<8x128xf32>
      %953 = arith.select %951, %825, %952 : vector<8x128xi1>, vector<8x128xf32>
      %954 = vector.shape_cast %953 : vector<8x128xf32> to vector<1x8x128xf32>
      %cst_321 = arith.constant dense<0.000000e+00> : vector<8x128xf32>
      %955 = vector.multi_reduction <add>, %954, %cst_321 [0] : vector<1x8x128xf32> to vector<8x128xf32>
      %956 = arith.addf %949, %955 : vector<8x128xf32>
      %c0_322 = arith.constant 0 : index
      %c0_323 = arith.constant 0 : index
      %957 = vector.load %arg5[%c0_322, %c0_323] : memref<8x128xf32, #tpu.memory_space<vmem>>, vector<8x128xf32>
      tpu.vector_store %arg5[%c0_322, %c0_323], %956 {strides = array<i32>} : memref<8x128xf32, #tpu.memory_space<vmem>>, vector<8x128xf32>,
    } else {
    }
    %true = arith.constant true
    %833 = arith.xori %830, %true : i1
    %834 = arith.extui %833 : i1 to i32
    %c0_i32_246 = arith.constant 0 : i32
    %835 = arith.cmpi ne, %834, %c0_i32_246 : i32
    scf.if %835 {
      %c0_317 = arith.constant 0 : index
      %c0_318 = arith.constant 0 : index
      %941 = vector.load %arg5[%c0_317, %c0_318] : memref<8x128xf32, #tpu.memory_space<vmem>>, vector<8x128xf32>
      %942 = vector.shape_cast %825 : vector<8x128xf32> to vector<1x8x128xf32>
      %cst_319 = arith.constant dense<0.000000e+00> : vector<8x128xf32>
      %943 = vector.multi_reduction <add>, %942, %cst_319 [0] : vector<1x8x128xf32> to vector<8x128xf32>
      %944 = arith.addf %941, %943 : vector<8x128xf32>
      %c0_320 = arith.constant 0 : index
      %c0_321 = arith.constant 0 : index
      %945 = vector.load %arg5[%c0_320, %c0_321] : memref<8x128xf32, #tpu.memory_space<vmem>>, vector<8x128xf32>
      tpu.vector_store %arg5[%c0_320, %c0_321], %944 {strides = array<i32>} : memref<8x128xf32, #tpu.memory_space<vmem>>, vector<8x128xf32>,
    } else {
    }
    %cst_247 = arith.constant 5.000000e-01 : f32
    %836 = vector.broadcast %cst_247 : f32 to vector<8x128xf32>
    %837 = arith.cmpf ogt, %4, %836 : vector<8x128xf32>
    %c0_248 = arith.constant 0 : index
    %c0_249 = arith.constant 0 : index
    %c0_250 = arith.constant 0 : index
    %838 = vector.load %arg3[%c0_248, %c0_249, %c0_250] : memref<13x8x128xf32, #tpu.memory_space<vmem>>, vector<1x8x128xf32>
    %839 = vector.shape_cast %838 : vector<1x8x128xf32> to vector<8x128xf32>
    %c1_251 = arith.constant 1 : index
    %c0_252 = arith.constant 0 : index
    %c0_253 = arith.constant 0 : index
    %840 = vector.load %arg3[%c1_251, %c0_252, %c0_253] : memref<13x8x128xf32, #tpu.memory_space<vmem>>, vector<1x8x128xf32>
    %841 = vector.shape_cast %840 : vector<1x8x128xf32> to vector<8x128xf32>
    %c2_254 = arith.constant 2 : index
    %c0_255 = arith.constant 0 : index
    %c0_256 = arith.constant 0 : index
    %842 = vector.load %arg3[%c2_254, %c0_255, %c0_256] : memref<13x8x128xf32, #tpu.memory_space<vmem>>, vector<1x8x128xf32>
    %843 = vector.shape_cast %842 : vector<1x8x128xf32> to vector<8x128xf32>
    %c3_257 = arith.constant 3 : index
    %c0_258 = arith.constant 0 : index
    %c0_259 = arith.constant 0 : index
    %844 = vector.load %arg3[%c3_257, %c0_258, %c0_259] : memref<13x8x128xf32, #tpu.memory_space<vmem>>, vector<1x8x128xf32>
    %845 = vector.shape_cast %844 : vector<1x8x128xf32> to vector<8x128xf32>
    %c4_260 = arith.constant 4 : index
    %c0_261 = arith.constant 0 : index
    %c0_262 = arith.constant 0 : index
    %846 = vector.load %arg3[%c4_260, %c0_261, %c0_262] : memref<13x8x128xf32, #tpu.memory_space<vmem>>, vector<1x8x128xf32>
    %847 = vector.shape_cast %846 : vector<1x8x128xf32> to vector<8x128xf32>
    %c5_263 = arith.constant 5 : index
    %c0_264 = arith.constant 0 : index
    %c0_265 = arith.constant 0 : index
    %848 = vector.load %arg3[%c5_263, %c0_264, %c0_265] : memref<13x8x128xf32, #tpu.memory_space<vmem>>, vector<1x8x128xf32>
    %849 = vector.shape_cast %848 : vector<1x8x128xf32> to vector<8x128xf32>
    %c6_266 = arith.constant 6 : index
    %c0_267 = arith.constant 0 : index
    %c0_268 = arith.constant 0 : index
    %850 = vector.load %arg3[%c6_266, %c0_267, %c0_268] : memref<13x8x128xf32, #tpu.memory_space<vmem>>, vector<1x8x128xf32>
    %851 = vector.shape_cast %850 : vector<1x8x128xf32> to vector<8x128xf32>
    %c7_269 = arith.constant 7 : index
    %c0_270 = arith.constant 0 : index
    %c0_271 = arith.constant 0 : index
    %852 = vector.load %arg3[%c7_269, %c0_270, %c0_271] : memref<13x8x128xf32, #tpu.memory_space<vmem>>, vector<1x8x128xf32>
    %853 = vector.shape_cast %852 : vector<1x8x128xf32> to vector<8x128xf32>
    %c8_272 = arith.constant 8 : index
    %c0_273 = arith.constant 0 : index
    %c0_274 = arith.constant 0 : index
    %854 = vector.load %arg3[%c8_272, %c0_273, %c0_274] : memref<13x8x128xf32, #tpu.memory_space<vmem>>, vector<1x8x128xf32>
    %855 = vector.shape_cast %854 : vector<1x8x128xf32> to vector<8x128xf32>
    %c9_275 = arith.constant 9 : index
    %c0_276 = arith.constant 0 : index
    %c0_277 = arith.constant 0 : index
    %856 = vector.load %arg3[%c9_275, %c0_276, %c0_277] : memref<13x8x128xf32, #tpu.memory_space<vmem>>, vector<1x8x128xf32>
    %857 = vector.shape_cast %856 : vector<1x8x128xf32> to vector<8x128xf32>
    %c10_278 = arith.constant 10 : index
    %c0_279 = arith.constant 0 : index
    %c0_280 = arith.constant 0 : index
    %858 = vector.load %arg3[%c10_278, %c0_279, %c0_280] : memref<13x8x128xf32, #tpu.memory_space<vmem>>, vector<1x8x128xf32>
    %859 = vector.shape_cast %858 : vector<1x8x128xf32> to vector<8x128xf32>
    %c11_281 = arith.constant 11 : index
    %c0_282 = arith.constant 0 : index
    %c0_283 = arith.constant 0 : index
    %860 = vector.load %arg3[%c11_281, %c0_282, %c0_283] : memref<13x8x128xf32, #tpu.memory_space<vmem>>, vector<1x8x128xf32>
    %861 = vector.shape_cast %860 : vector<1x8x128xf32> to vector<8x128xf32>
    %862 = arith.subf %839, %843 : vector<8x128xf32>
    %863 = arith.subf %841, %845 : vector<8x128xf32>
    %864 = arith.addf %839, %847 : vector<8x128xf32>
    %865 = arith.addf %841, %849 : vector<8x128xf32>
    %866 = arith.subf %839, %851 : vector<8x128xf32>
    %867 = arith.subf %841, %853 : vector<8x128xf32>
    %868 = arith.addf %839, %855 : vector<8x128xf32>
    %869 = arith.addf %841, %857 : vector<8x128xf32>
    %870 = arith.subf %864, %862 : vector<8x128xf32>
    %871 = arith.subf %865, %863 : vector<8x128xf32>
    %872 = arith.mulf %870, %871 : vector<8x128xf32>
    %873 = arith.subf %868, %866 : vector<8x128xf32>
    %874 = arith.subf %869, %867 : vector<8x128xf32>
    %875 = arith.mulf %873, %874 : vector<8x128xf32>
    %876 = arith.minimumf %864, %868 : vector<8x128xf32>
    %877 = arith.maximumf %862, %866 : vector<8x128xf32>
    %878 = arith.subf %876, %877 : vector<8x128xf32>
    %cst_284 = arith.constant 0.000000e+00 : f32
    %879 = vector.broadcast %cst_284 : f32 to vector<8x128xf32>
    %880 = arith.maximumf %878, %879 : vector<8x128xf32>
    %881 = arith.minimumf %865, %869 : vector<8x128xf32>
    %882 = arith.maximumf %863, %867 : vector<8x128xf32>
    %883 = arith.subf %881, %882 : vector<8x128xf32>
    %cst_285 = arith.constant 0.000000e+00 : f32
    %884 = vector.broadcast %cst_285 : f32 to vector<8x128xf32>
    %885 = arith.maximumf %883, %884 : vector<8x128xf32>
    %886 = arith.mulf %880, %885 : vector<8x128xf32>
    %887 = arith.addf %872, %875 : vector<8x128xf32>
    %888 = arith.subf %887, %886 : vector<8x128xf32>
    %cst_286 = arith.constant 1.000000e+00 : f32
    %889 = vector.broadcast %cst_286 : f32 to vector<8x128xf32>
    %890 = arith.select %837, %888, %889 : vector<8x128xi1>, vector<8x128xf32>
    %891 = arith.divf %886, %890 : vector<8x128xf32>
    %cst_287 = arith.constant 9.99999997E-7 : f32
    %892 = vector.broadcast %cst_287 : f32 to vector<8x128xf32>
    %893 = arith.maximumf %891, %892 : vector<8x128xf32>
    %894 = math.log %893 : vector<8x128xf32>
    %cst_288 = arith.constant 0.000000e+00 : f32
    %895 = vector.broadcast %cst_288 : f32 to vector<8x128xf32>
    %896 = arith.subf %895, %894 : vector<8x128xf32>
    %897 = math.absf %859 : vector<8x128xf32>
    %cst_289 = arith.constant 0.000000e+00 : f32
    %898 = vector.broadcast %cst_289 : f32 to vector<8x128xf32>
    %899 = arith.subf %898, %897 : vector<8x128xf32>
    %900 = math.exp %899 : vector<8x128xf32>
    %cst_290 = arith.constant 0.000000e+00 : f32
    %901 = vector.broadcast %cst_290 : f32 to vector<8x128xf32>
    %902 = arith.maximumf %859, %901 : vector<8x128xf32>
    %903 = arith.mulf %859, %861 : vector<8x128xf32>
    %904 = arith.subf %902, %903 : vector<8x128xf32>
    %cst_291 = arith.constant 1.000000e+00 : f32
    %905 = vector.broadcast %cst_291 : f32 to vector<8x128xf32>
    %906 = arith.addf %905, %900 : vector<8x128xf32>
    %907 = math.log %906 : vector<8x128xf32>
    %908 = arith.addf %904, %907 : vector<8x128xf32>
    %c0_292 = arith.constant 0 : index
    %c0_293 = arith.constant 0 : index
    %909 = vector.load %arg6[%c0_292, %c0_293] : memref<8x128xf32, #tpu.memory_space<vmem>>, vector<8x128xf32>
    %910 = arith.extui %837 : vector<8x128xi1> to vector<8x128xi32>
    %911 = arith.sitofp %910 : vector<8x128xi32> to vector<8x128xf32>
    %912 = vector.shape_cast %911 : vector<8x128xf32> to vector<1x8x128xf32>
    %cst_294 = arith.constant dense<0.000000e+00> : vector<8x128xf32>
    %913 = vector.multi_reduction <add>, %912, %cst_294 [0] : vector<1x8x128xf32> to vector<8x128xf32>
    %914 = arith.addf %909, %913 : vector<8x128xf32>
    %c0_295 = arith.constant 0 : index
    %c0_296 = arith.constant 0 : index
    %915 = vector.load %arg6[%c0_295, %c0_296] : memref<8x128xf32, #tpu.memory_space<vmem>>, vector<8x128xf32>
    tpu.vector_store %arg6[%c0_295, %c0_296], %914 {strides = array<i32>} : memref<8x128xf32, #tpu.memory_space<vmem>>, vector<8x128xf32>,
    %c0_297 = arith.constant 0 : index
    %c0_298 = arith.constant 0 : index
    %916 = vector.load %arg7[%c0_297, %c0_298] : memref<8x128xf32, #tpu.memory_space<vmem>>, vector<8x128xf32>
    %917 = arith.mulf %861, %896 : vector<8x128xf32>
    %cst_299 = arith.constant 0.000000e+00 : f32
    %918 = vector.broadcast %cst_299 : f32 to vector<8x128xf32>
    %919 = arith.select %837, %917, %918 : vector<8x128xi1>, vector<8x128xf32>
    %920 = vector.shape_cast %919 : vector<8x128xf32> to vector<1x8x128xf32>
    %cst_300 = arith.constant dense<0.000000e+00> : vector<8x128xf32>
    %921 = vector.multi_reduction <add>, %920, %cst_300 [0] : vector<1x8x128xf32> to vector<8x128xf32>
    %922 = arith.addf %916, %921 : vector<8x128xf32>
    %c0_301 = arith.constant 0 : index
    %c0_302 = arith.constant 0 : index
    %923 = vector.load %arg7[%c0_301, %c0_302] : memref<8x128xf32, #tpu.memory_space<vmem>>, vector<8x128xf32>
    tpu.vector_store %arg7[%c0_301, %c0_302], %922 {strides = array<i32>} : memref<8x128xf32, #tpu.memory_space<vmem>>, vector<8x128xf32>,
    %c0_303 = arith.constant 0 : index
    %c0_304 = arith.constant 0 : index
    %924 = vector.load %arg8[%c0_303, %c0_304] : memref<8x128xf32, #tpu.memory_space<vmem>>, vector<8x128xf32>
    %cst_305 = arith.constant 0.000000e+00 : f32
    %925 = vector.broadcast %cst_305 : f32 to vector<8x128xf32>
    %926 = arith.select %837, %861, %925 : vector<8x128xi1>, vector<8x128xf32>
    %927 = vector.shape_cast %926 : vector<8x128xf32> to vector<1x8x128xf32>
    %cst_306 = arith.constant dense<0.000000e+00> : vector<8x128xf32>
    %928 = vector.multi_reduction <add>, %927, %cst_306 [0] : vector<1x8x128xf32> to vector<8x128xf32>
    %929 = arith.addf %924, %928 : vector<8x128xf32>
    %c0_307 = arith.constant 0 : index
    %c0_308 = arith.constant 0 : index
    %930 = vector.load %arg8[%c0_307, %c0_308] : memref<8x128xf32, #tpu.memory_space<vmem>>, vector<8x128xf32>
    tpu.vector_store %arg8[%c0_307, %c0_308], %929 {strides = array<i32>} : memref<8x128xf32, #tpu.memory_space<vmem>>, vector<8x128xf32>,
    %c0_309 = arith.constant 0 : index
    %c0_310 = arith.constant 0 : index
    %931 = vector.load %arg9[%c0_309, %c0_310] : memref<8x128xf32, #tpu.memory_space<vmem>>, vector<8x128xf32>
    %cst_311 = arith.constant 0.000000e+00 : f32
    %932 = vector.broadcast %cst_311 : f32 to vector<8x128xf32>
    %933 = arith.select %837, %908, %932 : vector<8x128xi1>, vector<8x128xf32>
    %934 = vector.shape_cast %933 : vector<8x128xf32> to vector<1x8x128xf32>
    %cst_312 = arith.constant dense<0.000000e+00> : vector<8x128xf32>
    %935 = vector.multi_reduction <add>, %934, %cst_312 [0] : vector<1x8x128xf32> to vector<8x128xf32>
    %936 = arith.addf %931, %935 : vector<8x128xf32>
    %c0_313 = arith.constant 0 : index
    %c0_314 = arith.constant 0 : index
    %937 = vector.load %arg9[%c0_313, %c0_314] : memref<8x128xf32, #tpu.memory_space<vmem>>, vector<8x128xf32>
    tpu.vector_store %arg9[%c0_313, %c0_314], %936 {strides = array<i32>} : memref<8x128xf32, #tpu.memory_space<vmem>>, vector<8x128xf32>,
    %c0_i32_315 = arith.constant 0 : i32
    %938 = arith.cmpi eq, %arg1, %c0_i32_315 : i32
    %939 = arith.extui %938 : i1 to i32
    %c0_i32_316 = arith.constant 0 : i32
    %940 = arith.cmpi ne, %939, %c0_i32_316 : i32
    scf.if %940 {
      %c0_317 = arith.constant 0 : index
      %c0_318 = arith.constant 0 : index
      %941 = vector.load %arg5[%c0_317, %c0_318] : memref<8x128xf32, #tpu.memory_space<vmem>>, vector<8x128xf32>
      %c0_319 = arith.constant 0 : index
      %c0_320 = arith.constant 0 : index
      %c0_321 = arith.constant 0 : index
      %c0_322 = arith.constant 0 : index
      %942 = vector.load %arg4[%c0_319, %c0_320, %c0_321, %c0_322] : memref<1x5x8x128xf32, #tpu.memory_space<vmem>>, vector<1x1x8x128xf32>
      %943 = vector.shape_cast %942 : vector<1x1x8x128xf32> to vector<8x128xf32>
      %944 = vector.shape_cast %941 : vector<8x128xf32> to vector<1x1x8x128xf32>
      tpu.vector_store %arg4[%c0_319, %c0_320, %c0_321, %c0_322], %944 {strides = array<i32>} : memref<1x5x8x128xf32, #tpu.memory_space<vmem>>, vector<1x1x8x128xf32>,
      %c0_323 = arith.constant 0 : index
      %c0_324 = arith.constant 0 : index
      %945 = vector.load %arg6[%c0_323, %c0_324] : memref<8x128xf32, #tpu.memory_space<vmem>>, vector<8x128xf32>
      %c0_325 = arith.constant 0 : index
      %c1_326 = arith.constant 1 : index
      %c0_327 = arith.constant 0 : index
      %c0_328 = arith.constant 0 : index
      %946 = vector.load %arg4[%c0_325, %c1_326, %c0_327, %c0_328] : memref<1x5x8x128xf32, #tpu.memory_space<vmem>>, vector<1x1x8x128xf32>
      %947 = vector.shape_cast %946 : vector<1x1x8x128xf32> to vector<8x128xf32>
      %948 = vector.shape_cast %945 : vector<8x128xf32> to vector<1x1x8x128xf32>
      tpu.vector_store %arg4[%c0_325, %c1_326, %c0_327, %c0_328], %948 {strides = array<i32>} : memref<1x5x8x128xf32, #tpu.memory_space<vmem>>, vector<1x1x8x128xf32>,
      %c0_329 = arith.constant 0 : index
      %c0_330 = arith.constant 0 : index
      %949 = vector.load %arg7[%c0_329, %c0_330] : memref<8x128xf32, #tpu.memory_space<vmem>>, vector<8x128xf32>
      %c0_331 = arith.constant 0 : index
      %c2_332 = arith.constant 2 : index
      %c0_333 = arith.constant 0 : index
      %c0_334 = arith.constant 0 : index
      %950 = vector.load %arg4[%c0_331, %c2_332, %c0_333, %c0_334] : memref<1x5x8x128xf32, #tpu.memory_space<vmem>>, vector<1x1x8x128xf32>
      %951 = vector.shape_cast %950 : vector<1x1x8x128xf32> to vector<8x128xf32>
      %952 = vector.shape_cast %949 : vector<8x128xf32> to vector<1x1x8x128xf32>
      tpu.vector_store %arg4[%c0_331, %c2_332, %c0_333, %c0_334], %952 {strides = array<i32>} : memref<1x5x8x128xf32, #tpu.memory_space<vmem>>, vector<1x1x8x128xf32>,
      %c0_335 = arith.constant 0 : index
      %c0_336 = arith.constant 0 : index
      %953 = vector.load %arg8[%c0_335, %c0_336] : memref<8x128xf32, #tpu.memory_space<vmem>>, vector<8x128xf32>
      %c0_337 = arith.constant 0 : index
      %c3_338 = arith.constant 3 : index
      %c0_339 = arith.constant 0 : index
      %c0_340 = arith.constant 0 : index
      %954 = vector.load %arg4[%c0_337, %c3_338, %c0_339, %c0_340] : memref<1x5x8x128xf32, #tpu.memory_space<vmem>>, vector<1x1x8x128xf32>
      %955 = vector.shape_cast %954 : vector<1x1x8x128xf32> to vector<8x128xf32>
      %956 = vector.shape_cast %953 : vector<8x128xf32> to vector<1x1x8x128xf32>
      tpu.vector_store %arg4[%c0_337, %c3_338, %c0_339, %c0_340], %956 {strides = array<i32>} : memref<1x5x8x128xf32, #tpu.memory_space<vmem>>, vector<1x1x8x128xf32>,
      %c0_341 = arith.constant 0 : index
      %c0_342 = arith.constant 0 : index
      %957 = vector.load %arg9[%c0_341, %c0_342] : memref<8x128xf32, #tpu.memory_space<vmem>>, vector<8x128xf32>
      %c0_343 = arith.constant 0 : index
      %c4_344 = arith.constant 4 : index
      %c0_345 = arith.constant 0 : index
      %c0_346 = arith.constant 0 : index
      %958 = vector.load %arg4[%c0_343, %c4_344, %c0_345, %c0_346] : memref<1x5x8x128xf32, #tpu.memory_space<vmem>>, vector<1x1x8x128xf32>
      %959 = vector.shape_cast %958 : vector<1x1x8x128xf32> to vector<8x128xf32>
      %960 = vector.shape_cast %957 : vector<8x128xf32> to vector<1x1x8x128xf32>
      tpu.vector_store %arg4[%c0_343, %c4_344, %c0_345, %c0_346], %960 {strides = array<i32>} : memref<1x5x8x128xf32, #tpu.memory_space<vmem>>, vector<1x1x8x128xf32>,
    } else {
    }
    return
  }
  func.func @transform_0(%arg0: i32, %arg1: i32) -> (i32, i32, i32) {
    %c1_i32 = arith.constant 1 : i32
    %0 = arith.muli %arg0, %c1_i32 : i32
    %1 = arith.addi %0, %arg1 : i32
    %c0_i32 = arith.constant 0 : i32
    %c0_i32_0 = arith.constant 0 : i32
    %c0_i32_1 = arith.constant 0 : i32
    return %c0_i32, %1, %c0_i32_0 : i32, i32, i32
  }
  func.func @transform_1(%arg0: i32, %arg1: i32) -> (i32, i32, i32) {
    %c1_i32 = arith.constant 1 : i32
    %0 = arith.muli %arg0, %c1_i32 : i32
    %1 = arith.addi %0, %arg1 : i32
    %c0_i32 = arith.constant 0 : i32
    %c0_i32_0 = arith.constant 0 : i32
    %c0_i32_1 = arith.constant 0 : i32
    return %c0_i32, %1, %c0_i32_0 : i32, i32, i32
  }
  func.func @transform_2(%arg0: i32, %arg1: i32) -> (i32, i32, i32, i32) {
    %c0_i32 = arith.constant 0 : i32
    %c0_i32_0 = arith.constant 0 : i32
    %c0_i32_1 = arith.constant 0 : i32
    %c0_i32_2 = arith.constant 0 : i32
    return %arg0, %c0_i32, %c0_i32_0, %c0_i32_1 : i32, i32, i32, i32
  }
}

</mosaic_0001>

<bundles_post_ra>
// kernel: tpu_custom_call.1
= control target key start
LH: loop header
LB: loop body
LE: loop exit
PB: predicated region body
PF: predicated region fallthrough
CT: control target
= control target key end

     0   :  { %7 = vsyncpa [#allocation8], 0  ;;  %s2499_s0 = inlined_call_operand.hbm [shape: f32[20,16,128], index: 0, kind: input, shape index: {}]   ;;  %s2500_s1 = inlined_call_operand.hbm [shape: f32[13,16,128], index: 1, kind: input, shape index: {}]   ;;  %s2501_s2 = inlined_call_operand.hbm [shape: f32[2,5,8,128], index: 2, kind: output, shape index: {}]  }
   0x1   :  { %9 = vsyncpa [#allocation8 + $0x1], 0 }
   0x2   :  { %10 = vsyncpa [#allocation11], 0 }
   0x3   :  { %12 = vsyncpa [#allocation11 + $0x1], 0 }
   0x4   :  { %13 = vsyncpa [#allocation9], 0 }
   0x5   :  { %15 = vsyncpa [#allocation9 + $0x1], 0  ;;  %s1599_s9 = smov 0   ;;  %s1601_s10 = smov 0  }
   0x6   :  { %s1603_s11 = smov 0   ;;  %s1605_s12 = smov 0  }
   0x7   :  { %s1607_s13 = smov 0   ;;  %s1609_s14 = smov 0  }
   0x8 LB: > { %s1146_s15 = sadd.s32 4294967295, %s1573_s14   ;;  %s1147_s16 = sadd.s32 4294967294, %s1573_s14   ;;  %s1573_s14 = sphi %s1609_s14, %s21_s14   ;;  %s1569_s13 = sphi %s1607_s13, %s2518_s13   ;;  %s1565_s12 = sphi %s1605_s12, %s2517_s12   ;;  %s1561_s11 = sphi %s1603_s11, %s2516_s11   ;;  %s1557_s10 = sphi %s1601_s10, %s2515_s10   ;;  %s1553_s9 = sphi %s1599_s9, %s2514_s9  }
   0x9   : > { %s33_s17 = sadd.s32 1, %s1569_s13  ;;  %s42_s18 = sadd.s32 1, %s1561_s11 }
   0xa   : > { %p35_p0 = scmp.ge.s32.totalorder %s33_s17, 2  ;;  %p49_p1 = scmp.ne.s32.totalorder %s1561_s11, %s1557_s10 }
   0xb   : > { %p50_p2 = scmp.eq.s32.totalorder %s1573_s14, 0  ;;  %p55_p3 = scmp.ne.s32.totalorder %s1557_s10, %s1553_s9 }
   0xc   : > { %s2520_s17 = smov (%p35_p0, %s33_s17), 0  ;;  %p56_p5 = scmp.eq.s32.totalorder %s1146_s15, 0 }
   0xd   : > { %p1640_p4 = por %p50_p2, %p49_p1  ;;  %s39_s20 = ssub.s32 %s1569_s13, %s2520_s17 }
   0xe   : > { %p107_p6 = scmp.eq.s32.totalorder %s1146_s15, 1  ;;  %p40_p7 = scmp.eq.s32.totalorder %s39_s20, 0 }
   0xf   : > { %p1646_p8 = por %p56_p5, %p55_p3  ;;  %p113_p10 = scmp.eq.s32.totalorder %s1147_s16, 1 }
  0x10   : > { %p1650_p9 = por %p107_p6, %p49_p1  ;;  %p1241_p13 = scmp.lt.s32.totalorder %s1573_s14, 2 }
  0x11   : > { %s2505_s21 = scalar_select %p1646_p8, 1, 0 }
  0x12   : > { %s2506_s22 = scalar_select %p1650_p9, 1, 0 }
  0x13   : > { %s1655_s23 = scalar_select %p40_p7, %s1561_s11, %s42_s18  }
  0x14   : > { %p1657_p11 = por %p113_p10, %p55_p3  ;;  %s1664_s25 = sand.u32 1, %s1561_s11  }
  0x15   : > { %s1218_s26 = smul.u32 160, %s1664_s25  ;;  %s1150_s27 = sshll.u32 %s1569_s13, 7 }
  0x16   : > { %s2507_s24 = scalar_select %p1657_p11, 1, 0 }
  0x17   : > { %p1670_p0 = pnand %p1241_p13, %p1640_p4  ;;  %s1679_s3 = scalar_lea.hbm %s2499_s0, %s1150_s27 }
  0x18   : > { %s137_s4 = scalar_lea.vmem [#allocation7], %s1218_s26  ;;  %s134_s6 = scalar_lea.sflag [#allocation8], %s1664_s25 }
  0x19   : > { %s144_s5 = sshll.u32 %s137_s4, 4  ;;  %s1427_s7 = scalar_lea.hbm %s1679_s3, 2560  ;;  %s1681_s5 = int_to_ptr.vmem [resolvable:$true] %s144_s5 }
  0x1a   : > { %p1428_p1 = scmp.ne.s32.totalorder %s1679_s3, %s1427_s7  ;;  %p1429_p2 = pneg %p1670_p0 }
  0x1b   : > { %s1432_s16 = scalar_lea.hbm %s2499_s0, 5120  ;;  %p1433_p5 = scmp.lt.u32.totalorder %s1679_s3, %s2499_s0 }
  0x1c   : > { %p1430_p3 = pnand %p1429_p2, %p1428_p1  ;;  %p1434_p6 = scmp.lt.u32.totalorder %s1432_s16, %s1427_s7 }
  0x1d   : > { %p1436_p10 = scmp.lt.u32.totalorder %s1427_s7, %s1679_s3 }
  0x1e   : > { %p1431_p4 = pneg %p1430_p3  ;;  %p1435_p7 = por %p1434_p6, %p1433_p5 }
  0x20   : > { %p1437_p13 = por %p1436_p10, %p1435_p7 }
  0x22   : > { %p1438_p12 = pnand %p1437_p13, %p1431_p4 }
  0x24   : > { %1441 = shalt.err (!%p1438_p12)
}
  0x25   : > { %s1442_s20 = scalar_lea.vmem %s1681_s5, 2560  ;;  %s1575_s26 = smov [#allocation7]  }
  0x26   : > { %p1443_p1 = scmp.ne.s32.totalorder %s1681_s5, %s1442_s20  ;;  %s1447_s29 = sshll.u32 %s1575_s26, 4  ;;  %s1448_s29 = int_to_ptr.vmem [resolvable:$false] %s1447_s29 }
  0x27   : > { %s1449_s30 = scalar_lea.vmem %s1448_s29, 5120  ;;  %p1450_p9 = scmp.lt.s32.totalorder %s1681_s5, %s1448_s29 }
  0x28   : > { %p1445_p3 = pnand %p1443_p1, %p1429_p2  ;;  %p1451_p5 = scmp.lt.s32.totalorder %s1449_s30, %s1442_s20 }
  0x2a   : > { %p1446_p11 = pneg %p1445_p3  ;;  %p1452_p6 = por %p1451_p5, %p1450_p9 }
  0x2c   : > { %p1453_p7 = pnand %p1452_p6, %p1446_p11 }
  0x2e   : > { %1456 = shalt.err (!%p1453_p7)
}
  0x2f   : > { %s1576_s4 = smov 256   ;;  %s1577_s7 = smov 128  }
  0x30   : > { %s1578_s8 = smov 8   ;;  %p1152_p9 = scmp.ge.s32.totalorder %s1573_s14, 1 }
  0x31   : > { %1233 = dma.hbm_to_vmem [thread:$0]  (!%p1670_p0), %s1679_s3, 2560, %s1681_s5, %s134_s6, %s1576_s4, %s1577_s7, %s1578_s8  }
  0x32   : > { %p173_p11 = scmp.lt.s32.totalorder %s1573_s14, 3  ;;  %s1219_s15 = smul.u32 104, %s1664_s25 }
  0x33   : > { %s1726_s20 = scalar_lea.hbm %s2500_s1, %s1150_s27  ;;  %s155_s3 = scalar_lea.sflag [#allocation11], %s1664_s25 }
  0x34   : > { %p1717_p12 = pnand %p1152_p9, %p173_p11  ;;  %s158_s26 = scalar_lea.vmem [#allocation10], %s1219_s15 }
  0x35   : > { %s165_s29 = sshll.u32 %s158_s26, 4  ;;  %s1457_s5 = scalar_lea.hbm %s1726_s20, 1664  ;;  %s1728_s29 = int_to_ptr.vmem [resolvable:$true] %s165_s29 }
  0x36   : > { %p1458_p4 = scmp.ne.s32.totalorder %s1726_s20, %s1457_s5  ;;  %s1462_s27 = scalar_lea.hbm %s2500_s1, 3328 }
  0x37   : > { %p1463_p1 = scmp.lt.u32.totalorder %s1726_s20, %s2500_s1  ;;  %p1464_p3 = scmp.lt.u32.totalorder %s1462_s27, %s1457_s5 }
  0x38   : > { %p1460_p10 = pnand %p1458_p4, %p1429_p2  ;;  %p1466_p6 = scmp.lt.u32.totalorder %s1457_s5, %s1726_s20 }
  0x39   : > { %p1465_p5 = por %p1464_p3, %p1463_p1 }
  0x3a   : > { %p1461_p13 = pneg %p1460_p10 }
  0x3b   : > { %p1467_p7 = por %p1466_p6, %p1465_p5 }
  0x3d   : > { %p1468_p9 = pnand %p1467_p7, %p1461_p13 }
  0x3f   : > { %1471 = shalt.err (!%p1468_p9)
}
  0x40   : > { %s1472_s15 = scalar_lea.vmem %s1728_s29, 1664  ;;  %s1579_s26 = smov [#allocation10]  }
  0x41   : > { %p1473_p11 = scmp.ne.s32.totalorder %s1728_s29, %s1472_s15  ;;  %s1477_s6 = sshll.u32 %s1579_s26, 4  ;;  %s1478_s6 = int_to_ptr.vmem [resolvable:$false] %s1477_s6 }
  0x42   : > { %s1479_s30 = scalar_lea.vmem %s1478_s6, 3328  ;;  %p1480_p8 = scmp.lt.s32.totalorder %s1728_s29, %s1478_s6 }
  0x43   : > { %p1475_p4 = pnand %p1473_p11, %p1429_p2  ;;  %p1481_p1 = scmp.lt.s32.totalorder %s1479_s30, %s1472_s15 }
  0x45   : > { %p1476_p10 = pneg %p1475_p4  ;;  %p1482_p3 = por %p1481_p1, %p1480_p8 }
  0x47   : > { %p1483_p5 = pnand %p1482_p3, %p1476_p10 }
  0x49   : > { %1486 = shalt.err (!%p1483_p5)
}
  0x4a   : > { %1236 = dma.hbm_to_vmem [thread:$0]  (!%p1670_p0), %s1726_s20, 1664, %s1728_s29, %s155_s3, %s1576_s4, %s1577_s7, %s1578_s8  }
  0x4b   : > { %177 = sbr.rel (%p1717_p12) target bundleno = 337 (0x151), region = 28  ;;  %s1762_s5 = sand.u32 (!%p1717_p12), 1, %s1557_s10  }
  0x4c   : > { %s1220_s27 = smul.u32 (!%p1717_p12), 160, %s1762_s5  ;;  %s180_s18 = scalar_lea.sflag (!%p1717_p12), [#allocation8], %s1762_s5 }
  0x4d   : > { %p2510_p8 = scmp.ne.s32.totalorder (!%p1717_p12), %s2505_s21, 0 }
  0x4e   : > { %s1766_s28 = scalar_lea.vmem (!%p1717_p12), [#allocation7], %s1220_s27 }
  0x52   : > { %1540 = dma.done.wait (%p2510_p8), %s180_s18, 2560  }
  0x53   : > { %1542 = vsyncadd (%p2510_p8), %s180_s18, 4294964736  ;;  %s1221_s25 = smul.u32 104, %s1762_s5  ;;  %s189_s4 = scalar_lea.sflag [#allocation11], %s1762_s5 }
  0x55   : > { %s1774_s7 = scalar_lea.vmem [#allocation10], %s1221_s25 }
  0x56   : > { %1544 = dma.done.wait (%p2510_p8), %s189_s4, 1664  }
  0x57   : > { %1546 = vsyncadd (%p2510_p8), %s189_s4, 4294965632  ;;  %s1222_s8 = smul.u32 40, %s1762_s5  ;;  %v1580_v0 = vmov 0.0   ;;  %v1787_v1 = vld [vmem:[%s1766_s28] sm:$0xff]  ;;  %v1790_v2 = vld [vmem:[%s1766_s28 + $0x8] sm:$0xff]  ;;  %s1216_s21 = sshll.u32 %s1565_s12, 10 }
  0x58   : > { %224 = vst [vmem:[#allocation2] sm:$0xff] %v1580_v0  ;;  %225 = vst [vmem:[#allocation3] sm:$0xff] %v1580_v0  ;;  %v235_v3 = vand.u32 2147483647, %v1787_v1  ;;  %v268_v4 = vand.u32 2147483647, %v1790_v2 }
  0x59   : > { %226 = vst [vmem:[#allocation4] sm:$0xff] %v1580_v0  ;;  %227 = vst [vmem:[#allocation5] sm:$0xff] %v1580_v0  ;;  %v1795_v7 = vld [vmem:[%s1766_s28 + $0x10] sm:$0xff]  ;;  %v1798_v10 = vld [vmem:[%s1766_s28 + $0x18] sm:$0xff]  ;;  %v247_v36 = vmax.f32 %v1787_v1, 0.0  ;;  %v280_v43 = vmax.f32 %v1790_v2, 0.0 }
  0x5a   : > { %228 = vst [vmem:[#allocation6] sm:$0xff] %v1580_v0  ;;  %v236_v5 = vsub.f32 0.0, %v235_v3  ;;  %v269_v6 = vsub.f32 0.0, %v268_v4  ;;  %v301_v11 = vand.u32 2147483647, %v1795_v7  ;;  %v1803_v14 = vld [vmem:[%s1766_s28 + $0x20] sm:$0xff] }
  0x5b   : > { %v334_v13 = vand.u32 2147483647, %v1798_v10  ;;  %v367_v17 = vand.u32 2147483647, %v1803_v14  ;;  %v1807_v18 = vld [vmem:[%s1766_s28 + $0x28] sm:$0xff]  ;;  %v1814_v23 = vld [vmem:[%s1766_s28 + $0x30] sm:$0xff] }
  0x5c   : > { %v237_v8 = vmul.f32 1.442695, %v236_v5  ;;  %v270_v9 = vmul.f32 1.442695, %v269_v6  ;;  %v302_v12 = vsub.f32 0.0, %v301_v11  ;;  %v1810_v19 = vld [vmem:[%s1774_s7 + $0x60] sm:$0xff] }
  0x5d   : > { %v335_v16 = vsub.f32 0.0, %v334_v13  ;;  %v368_v21 = vsub.f32 0.0, %v367_v17  ;;  %v400_v22 = vand.u32 2147483647, %v1807_v18  ;;  %vm232_vm0 = vcmp.eq.f32.partialorder %v1810_v19, 1.0  ;;  %v1834_v32 = vld [vmem:[%s1766_s28 + $0x38] sm:$0xff] }
  0x5e   : > { %1297 = vpow2.f32 %v237_v8  ;;  %v303_v15 = vmul.f32 1.442695, %v302_v12  ;;  %vm265_vm1 = vcmp.eq.f32.partialorder %v1810_v19, 2.0  ;;  %v433_v29 = vand.u32 2147483647, %v1814_v23  ;;  %v1859_v48 = vld [vmem:[%s1766_s28 + $0x40] sm:$0xff] }
  0x5f   : > { %1299 = vpow2.f32 %v270_v9  ;;  %v336_v20 = vmul.f32 1.442695, %v335_v16  ;;  %v369_v24 = vmul.f32 1.442695, %v368_v21  ;;  %v401_v26 = vsub.f32 0.0, %v400_v22  ;;  %v1876_v57 = vld [vmem:[%s1766_s28 + $0x48] sm:$0xff] }
  0x60   : > { %1301 = vpow2.f32 %v303_v15  ;;  %v1827_v30 = vsel %vm232_vm0, 1.0, %v1580_v0  ;;  %vm298_vm2 = vcmp.eq.f32.partialorder %v1810_v19, 3.0  ;;  %v1838_v33 = vsel %vm265_vm1, 1.0, %v1580_v0  ;;  %s1967_s16 = sadd.s32 1024, %s1216_s21  ;;  %s2409_s20 = scalar_lea.vmem [#allocation12], %s1222_s8 }
  0x61   : > { %1303 = vpow2.f32 %v336_v20  ;;  %v402_v34 = vmul.f32 1.442695, %v401_v26  ;;  %v434_v35 = vsub.f32 0.0, %v433_v29  ;;  %v1843_v37 = vsel %vm298_vm2, 1.0, %v1580_v0  ;;  %p1194_p0 = scmp.le.s32.totalorder %s1967_s16, 512 }
  0x62   : > { %1305 = vpow2.f32 %v369_v24  ;;  %v466_v39 = vand.u32 2147483647, %v1834_v32  ;;  %v248_v41 = vmul.f32 %v1827_v30, %v1787_v1  ;;  %v258_v42 = vmul.f32 -0.5, %v1827_v30  ;;  %s1195_s29 = sshll.u32 (!%p1194_p0), %s1565_s12, 3 }
  0x63   : > { %v435_v38 = vmul.f32 1.442695, %v434_v35  ;;  %v281_v44 = vmul.f32 %v1838_v33, %v1790_v2  ;;  %v291_v45 = vmul.f32 -0.5, %v1838_v33  ;;  %v313_v50 = vmax.f32 %v1795_v7, 0.0 }
  0x64   : > { %v467_v47 = vsub.f32 0.0, %v466_v39  ;;  %v314_v51 = vmul.f32 %v1843_v37, %v1795_v7  ;;  %v324_v52 = vmul.f32 -0.5, %v1843_v37  ;;  %vm331_vm3 = vcmp.eq.f32.partialorder %v1810_v19, 4.0 }
  0x65   : > { %v1872_v55 = vsub.f32 %v247_v36, %v248_v41  ;;  %v499_v56 = vand.u32 2147483647, %v1859_v48  ;;  %vm244_vm4 = vcmp.ge.f32.partialorder %v1787_v1, 0.0  ;;  %v1881_v59 = vadd.f32 0.75, %v258_v42 }
  0x66   : > { %v468_v54 = vmul.f32 1.442695, %v467_v47  ;;  %v1883_v60 = vsub.f32 %v280_v43, %v281_v44  ;;  %vm364_vm5 = vcmp.eq.f32.partialorder %v1810_v19, 5.0  ;;  %v1887_v61 = vadd.f32 0.75, %v291_v45 }
  0x67   : > { %v1890_v62 = vsel %vm331_vm3, 1.0, %v1580_v0  ;;  %v500_v3 = vsub.f32 0.0, %v499_v56  ;;  %vm277_vm6 = vcmp.ge.f32.partialorder %v1790_v2, 0.0  ;;  %v1896_v5 = vsub.f32 %v313_v50, %v314_v51 }
  0x68   : > { %v1817_v25 = vpop.eup %1297  ;;  %v1898_v6 = vadd.f32 0.75, %v324_v52  ;;  %v532_v8 = vand.u32 2147483647, %v1876_v57  ;;  %v1903_v11 = vsel %vm364_vm5, 1.0, %v1580_v0  ;;  %v346_v15 = vmax.f32 %v1798_v10, 0.0 }
  0x69   : > { %v1820_v27 = vpop.eup %1299  ;;  %v1823_v28 = vadd.f32 1.0, %v1817_v25  ;;  %v501_v12 = vmul.f32 1.442695, %v500_v3  ;;  %v347_v16 = vmul.f32 %v1890_v62, %v1798_v10  ;;  %v357_v17 = vmul.f32 -0.5, %v1890_v62 }
  0x6a   : > { %v1830_v31 = vadd.f32 1.0, %v1820_v27  ;;  %v1846_v40 = vpop.eup %1301  ;;  %v533_v20 = vsub.f32 0.0, %v532_v8  ;;  %v379_v24 = vmax.f32 %v1803_v14, 0.0  ;;  %vm310_vm7 = vcmp.ge.f32.partialorder %v1795_v7, 0.0 }
  0x6b   : > { %1307 = vrcp.f32 %v1823_v28  ;;  %v1856_v46 = vadd.f32 1.0, %v1846_v40  ;;  %v1861_v49 = vpop.eup %1303  ;;  %v380_v29 = vmul.f32 %v1903_v11, %v1803_v14  ;;  %vm397_vm8 = vcmp.eq.f32.partialorder %v1810_v19, 6.0 }
  0x6c   : > { %1309 = vrcp.f32 %v1830_v31  ;;  %v1870_v53 = vadd.f32 1.0, %v1861_v49  ;;  %v1878_v58 = vpop.eup %1305  ;;  %v534_v35 = vmul.f32 1.442695, %v533_v20  ;;  %vm343_vm9 = vcmp.ge.f32.partialorder %v1798_v10, 0.0 }
  0x6d   : > { %1311 = vpow2.f32 %v402_v34  ;;  %v1893_v63 = vadd.f32 1.0, %v1878_v58  ;;  %v390_v34 = vmul.f32 -0.5, %v1903_v11  ;;  %v1927_v43 = vsub.f32 %v346_v15, %v347_v16 }
  0x6e   : > { %1313 = vpow2.f32 %v435_v38  ;;  %v1929_v44 = vadd.f32 0.75, %v357_v17  ;;  %v1937_v52 = vsub.f32 %v379_v24, %v380_v29  ;;  %vm376_vm10 = vcmp.ge.f32.partialorder %v1803_v14, 0.0 }
  0x6f   : > { %1315 = vrcp.f32 %v1856_v46  ;;  %vm430_vm11 = vcmp.eq.f32.partialorder %v1810_v19, 7.0  ;;  %vm409_vm12 = vcmp.ge.f32.partialorder %v1807_v18, 0.0  ;;  %vm463_vm13 = vcmp.eq.f32.partialorder %v1810_v19, 8.0 }
  0x70   : > { %1317 = vrcp.f32 %v1870_v53  ;;  %v1975_v29 = vsel %vm430_vm11, 1.0, %v1580_v0  ;;  %vm442_vm14 = vcmp.ge.f32.partialorder %v1814_v23, 0.0  ;;  %vm475_vm15 = vcmp.ge.f32.partialorder %v1834_v32, 0.0 }
  0x71   : > { %1319 = vpow2.f32 %v468_v54  ;;  %v1944_v54 = vsel %vm397_vm8, 1.0, %v1580_v0  ;;  %vm496_vm0 = vcmp.eq.f32.partialorder %v1810_v19, 9.0  ;;  %vm508_vm1 = vcmp.ge.f32.partialorder %v1859_v48, 0.0 }
  0x72   : > { %1321 = vrcp.f32 %v1893_v63  ;;  %v413_v16 = vmul.f32 %v1944_v54, %v1807_v18  ;;  %vm529_vm2 = vcmp.eq.f32.partialorder %v1810_v19, 10.0  ;;  %vm541_vm3 = vcmp.ge.f32.partialorder %v1876_v57, 0.0 }
  0x73   : > { %1323 = vpow2.f32 %v501_v12  ;;  %v412_v12 = vmax.f32 %v1807_v18, 0.0  ;;  %vm595_vm5 = vcmp.eq.f32.partialorder %v1810_v19, 12.0  ;;  %vm661_vm8 = vcmp.eq.f32.partialorder %v1810_v19, 14.0 }
  0x74   : > { %1325 = vlog2.f32 %v1823_v28 }
  0x75   : > { %v1308_v4 = vpop.eup %1307  ;;  %1327 = vlog2.f32 %v1830_v31 }
  0x76   : > { %v241_v9 = vmul.f32 %v1308_v4, %v1823_v28  ;;  %v1310_v13 = vpop.eup %1309 }
  0x77   : > { %v274_v22 = vmul.f32 %v1310_v13, %v1830_v31  ;;  %v1912_v26 = vpop.eup %1311  ;;  %v1939_v31 = vadd.f32 0.75, %v390_v34 }
  0x78   : > { %v242_v21 = vsub.f32 2.0, %v241_v9  ;;  %v1919_v36 = vpop.eup %1313  ;;  %v1923_v41 = vadd.f32 1.0, %v1912_v26 }
  0x79   : > { %v275_v39 = vsub.f32 2.0, %v274_v22  ;;  %v1316_v42 = vpop.eup %1315  ;;  %v1932_v45 = vadd.f32 1.0, %v1919_v36 }
  0x7a   : > { %v243_v38 = vmul.f32 %v1308_v4, %v242_v21  ;;  %v307_v28 = vmul.f32 %v1316_v42, %v1856_v46  ;;  %1329 = vrcp.f32 %v1923_v41  ;;  %v1318_v51 = vpop.eup %1317  ;;  %v423_v21 = vmul.f32 -0.5, %v1944_v54 }
  0x7b   : > { %v276_v50 = vmul.f32 %v1310_v13, %v275_v39  ;;  %1331 = vpow2.f32 %v534_v35  ;;  %v340_v4 = vmul.f32 %v1318_v51, %v1870_v53  ;;  %v1952_v8 = vpop.eup %1319  ;;  %v445_v39 = vmax.f32 %v1814_v23, 0.0 }
  0x7c   : > { %v245_v47 = vmul.f32 %v1817_v25, %v243_v38  ;;  %v308_v3 = vsub.f32 2.0, %v307_v28  ;;  %1333 = vrcp.f32 %v1932_v45  ;;  %v1322_v1 = vpop.eup %1321  ;;  %v1978_v34 = vadd.f32 1.0, %v1952_v8 }
  0x7d   : > { %v278_v56 = vmul.f32 %v1820_v27, %v276_v50  ;;  %v341_v15 = vsub.f32 2.0, %v340_v4  ;;  %1335 = vlog2.f32 %v1856_v46  ;;  %v373_v20 = vmul.f32 %v1322_v1, %v1893_v63  ;;  %v1969_v22 = vpop.eup %1323 }
  0x7e   : > { %v1948_v25 = vsel %vm244_vm4, %v243_v38, %v245_v47  ;;  %v309_v27 = vmul.f32 %v1316_v42, %v308_v3  ;;  %v1326_v42 = vpop.eup %1325  ;;  %1337 = vrcp.f32 %v1978_v34  ;;  %v446_v3 = vmul.f32 %v1975_v29, %v1814_v23 }
  0x7f   : > { %v253_v9 = vmul.f32 2.0, %v1948_v25  ;;  %v279_v13 = vsel %vm277_vm6, %v276_v50, %v278_v56  ;;  %v342_v24 = vmul.f32 %v1318_v51, %v341_v15  ;;  %v374_v38 = vsub.f32 2.0, %v373_v20  ;;  %v1328_v28 = vpop.eup %1327 }
  0x80   : > { %v286_v17 = vmul.f32 2.0, %v279_v13  ;;  %v311_v2 = vmul.f32 %v1846_v40, %v309_v27  ;;  %v1986_v50 = vadd.f32 1.0, %v1969_v22  ;;  %1339 = vlog2.f32 %v1870_v53 }
  0x81   : > { %v254_v46 = vsub.f32 1.0, %v253_v9  ;;  %v344_v40 = vmul.f32 %v1861_v49, %v342_v24  ;;  %v375_v56 = vmul.f32 %v1322_v1, %v374_v38  ;;  %v1996_v49 = vsub.f32 %v412_v12, %v413_v16 }
  0x82   : > { %v287_v35 = vsub.f32 1.0, %v286_v17  ;;  %v312_v47 = vsel %vm310_vm7, %v309_v27, %v311_v2  ;;  %v1998_v9 = vadd.f32 0.75, %v423_v21  ;;  %v456_v17 = vmul.f32 -0.5, %v1975_v29 }
  0x83   : > { %v319_v51 = vmul.f32 2.0, %v312_v47  ;;  %v1994_v7 = vsel %vm343_vm9, %v342_v24, %v344_v40  ;;  %v255_v53 = vmul.f32 %v1827_v30, %v254_v46  ;;  %v377_v10 = vmul.f32 %v1878_v58, %v375_v56 }
  0x84   : > { %v1330_v4 = vpop.eup %1329  ;;  %v288_v1 = vmul.f32 %v1838_v33, %v287_v35  ;;  %v352_v20 = vmul.f32 2.0, %v1994_v7  ;;  %1341 = vrcp.f32 %v1986_v50  ;;  %v251_v21 = vmul.f32 0.6931472, %v1326_v42 }
  0x85   : > { %v2001_v27 = vpop.eup %1331  ;;  %v320_v15 = vsub.f32 1.0, %v319_v51  ;;  %v406_v12 = vmul.f32 %v1330_v4, %v1923_v41  ;;  %v284_v2 = vmul.f32 0.6931472, %v1328_v28  ;;  %v2011_v24 = vsub.f32 %v445_v39, %v446_v3 }
  0x86   : > { %v1334_v16 = vpop.eup %1333  ;;  %v2014_v30 = vsel %vm463_vm13, 1.0, %v1580_v0  ;;  %v2018_v33 = vsel %vm376_vm10, %v375_v56, %v377_v10  ;;  %1343 = vlog2.f32 %v1893_v63  ;;  %v256_v38 = vadd.f32 %v255_v53, %v1948_v25 }
  0x87   : > { %v407_v58 = vsub.f32 2.0, %v406_v12  ;;  %v439_v46 = vmul.f32 %v1334_v16, %v1932_v45  ;;  %v1336_v35 = vpop.eup %1335  ;;  %v289_v40 = vadd.f32 %v288_v1, %v279_v13  ;;  %v321_v42 = vmul.f32 %v1843_v37, %v320_v15 }
  0x88   : > { %v2024_v39 = vadd.f32 0.75, %v456_v17  ;;  %v353_v28 = vsub.f32 1.0, %v352_v20  ;;  %v2027_v14 = vadd.f32 1.0, %v2001_v27  ;;  %v252_v56 = vadd.f32 %v251_v21, %v1872_v55  ;;  %v1338_v25 = vpop.eup %1337 }
  0x89   : > { %v408_v51 = vmul.f32 %v1330_v4, %v407_v58  ;;  %v440_v3 = vsub.f32 2.0, %v439_v46  ;;  %v285_v63 = vadd.f32 %v284_v2, %v1883_v60  ;;  %v385_v10 = vmul.f32 2.0, %v2018_v33 }
  0x8a   : > { %v478_v12 = vmax.f32 %v1834_v32, 0.0  ;;  %v317_v13 = vmul.f32 0.6931472, %v1336_v35  ;;  %1345 = vlog2.f32 %v1923_v41  ;;  %v1340_v4 = vpop.eup %1339  ;;  %v257_v1 = vmul.f32 %v256_v38, %v256_v38  ;;  %v2053_v38 = vld [vmem:[%s1766_s28 + $0x50] sm:$0xff] }
  0x8b   : > { %v410_v37 = vmul.f32 %v1912_v26, %v408_v51  ;;  %v441_v53 = vmul.f32 %v1334_v16, %v440_v3  ;;  %v290_v15 = vmul.f32 %v289_v40, %v289_v40  ;;  %v322_v17 = vadd.f32 %v321_v42, %v312_v47 }
  0x8c   : > { %v472_v55 = vmul.f32 %v1338_v25, %v1978_v34  ;;  %v354_v60 = vmul.f32 %v1890_v62, %v353_v28  ;;  %1347 = vrcp.f32 %v2027_v14  ;;  %v386_v26 = vsub.f32 1.0, %v385_v10 }
  0x8d   : > { %v411_v20 = vsel %vm409_vm12, %v408_v51, %v410_v37  ;;  %v443_v21 = vmul.f32 %v1919_v36, %v441_v53  ;;  %v479_v2 = vmul.f32 %v2014_v30, %v1834_v32  ;;  %v318_v47 = vadd.f32 %v317_v13, %v1896_v5 }
  0x8e   : > { %v418_v41 = vmul.f32 2.0, %v411_v20  ;;  %v473_v16 = vsub.f32 2.0, %v472_v55  ;;  %v1342_v58 = vpop.eup %1341  ;;  %v350_v46 = vmul.f32 0.6931472, %v1340_v4  ;;  %v489_v62 = vmul.f32 -0.5, %v2014_v30 }
  0x8f   : > { %v260_v18 = vmul.f32 %v257_v1, %v252_v56  ;;  %v293_v35 = vmul.f32 %v290_v15, %v285_v63  ;;  %v2049_v36 = vsel %vm442_vm14, %v441_v53, %v443_v21  ;;  %1349 = vlog2.f32 %v1932_v45 }
  0x90   : > { %v1344_v40 = vpop.eup %1343  ;;  %v323_v42 = vmul.f32 %v322_v17, %v322_v17  ;;  %v355_v28 = vadd.f32 %v354_v60, %v1994_v7  ;;  %v474_v5 = vmul.f32 %v1338_v25, %v473_v16  ;;  %v505_v51 = vmul.f32 %v1342_v58, %v1986_v50 }
  0x91   : > { %v387_v3 = vmul.f32 %v1903_v11, %v386_v26  ;;  %v419_v10 = vsub.f32 1.0, %v418_v41  ;;  %v2058_v56 = vsub.f32 %v478_v12, %v479_v2  ;;  %v2061_v23 = vsel %vm496_vm0, 1.0, %v1580_v0 }
  0x92   : > { %v451_v63 = vmul.f32 2.0, %v2049_v36  ;;  %v476_v45 = vmul.f32 %v1952_v8, %v474_v5  ;;  %v506_v13 = vsub.f32 2.0, %v505_v51  ;;  %v565_v37 = vand.u32 2147483647, %v2053_v38 }
  0x93   : > { %v261_v7 = vmul.f32 %v260_v18, %v1881_v59  ;;  %v351_v25 = vadd.f32 %v350_v46, %v1927_v43  ;;  %v383_v53 = vmul.f32 0.6931472, %v1344_v40  ;;  %v294_v12 = vmul.f32 %v293_v35, %v1887_v61  ;;  %v2087_v18 = vld [vmem:[%s1766_s28 + $0x58] sm:$0xff] }
  0x94   : > { %v1346_v11 = vpop.eup %1345  ;;  %v326_v4 = vmul.f32 %v323_v42, %v318_v47  ;;  %v356_v1 = vmul.f32 %v355_v28, %v355_v28  ;;  %v507_v15 = vmul.f32 %v1342_v58, %v506_v13  ;;  %v388_v17 = vadd.f32 %v387_v3, %v2018_v33 }
  0x95   : > { %v420_v8 = vmul.f32 %v1944_v54, %v419_v10  ;;  %v2074_v55 = vsel %vm475_vm15, %v474_v5, %v476_v45  ;;  %v566_v59 = vsub.f32 0.0, %v565_v37  ;;  %v452_v43 = vsub.f32 1.0, %v451_v63  ;;  %v2104_v63 = vld [vmem:[%s1766_s28 + $0x60] sm:$0xff] }
  0x96   : > { %v1348_v60 = vpop.eup %1347  ;;  %1351 = vlog2.f32 %v1978_v34  ;;  %v509_v21 = vmul.f32 %v1969_v22, %v507_v15  ;;  %v511_v61 = vmax.f32 %v1859_v48, 0.0  ;;  %v384_v26 = vadd.f32 %v383_v53, %v1937_v52 }
  0x97   : > { %v416_v41 = vmul.f32 0.6931472, %v1346_v11  ;;  %v512_v54 = vmul.f32 %v2061_v23, %v1859_v48  ;;  %v538_v32 = vmul.f32 %v1348_v60, %v2027_v14  ;;  %v295_v33 = vadd.f32 %v294_v12, %v261_v7 }
  0x98   : > { %v484_v16 = vmul.f32 2.0, %v2074_v55  ;;  %1353 = vlog2.f32 %v1986_v50  ;;  %v567_v2 = vmul.f32 1.442695, %v566_v59  ;;  %v327_v58 = vmul.f32 %v326_v4, %v1898_v6 }
  0x99   : > { %v1350_v34 = vpop.eup %1349  ;;  %v359_v22 = vmul.f32 %v356_v1, %v351_v25  ;;  %v389_v47 = vmul.f32 %v388_v17, %v388_v17  ;;  %v421_v46 = vadd.f32 %v420_v8, %v411_v20  ;;  %v453_v52 = vmul.f32 %v1975_v29, %v452_v43 }
  0x9a   : > { %v2092_v35 = vsel %vm508_vm1, %v507_v15, %v509_v21  ;;  %v539_v40 = vsub.f32 2.0, %v538_v32  ;;  %1355 = vpow2.f32 %v567_v2  ;;  %v2094_v42 = vadd.f32 0.75, %v489_v62 }
  0x9b   : > { %v2096_v50 = vsub.f32 %v511_v61, %v512_v54  ;;  %v522_v6 = vmul.f32 -0.5, %v2061_v23  ;;  %v449_v20 = vmul.f32 0.6931472, %v1350_v34  ;;  %v485_v28 = vsub.f32 1.0, %v484_v16 }
  0x9c   : > { %v540_v5 = vmul.f32 %v1348_v60, %v539_v40  ;;  %v598_v29 = vand.u32 2147483647, %v2087_v18  ;;  %v328_v51 = vadd.f32 %v327_v58, %v295_v33  ;;  %v360_v48 = vmul.f32 %v359_v22, %v1929_v44 }
  0x9d   : > { %v392_v3 = vmul.f32 %v389_v47, %v384_v26  ;;  %v517_v10 = vmul.f32 2.0, %v2092_v35  ;;  %v417_v62 = vadd.f32 %v416_v41, %v1996_v49  ;;  %v422_v45 = vmul.f32 %v421_v46, %v421_v46  ;;  %v2136_v26 = vld [vmem:[%s1766_s28 + $0x68] sm:$0xff] }
  0x9e   : > { %v454_v13 = vadd.f32 %v453_v52, %v2049_v36  ;;  %v599_v37 = vsub.f32 0.0, %v598_v29  ;;  %v2109_v7 = vsel %vm529_vm2, 1.0, %v1580_v0  ;;  %1357 = vlog2.f32 %v2027_v14 }
  0x9f   : > { %vm562_vm4 = vcmp.eq.f32.partialorder %v1810_v19, 11.0  ;;  %v486_v25 = vmul.f32 %v2014_v30, %v485_v28  ;;  %v542_v53 = vmul.f32 %v2001_v27, %v540_v5  ;;  %v631_v49 = vand.u32 2147483647, %v2104_v63 }
  0xa0   : > { %v1352_v44 = vpop.eup %1351  ;;  %v600_v11 = vmul.f32 1.442695, %v599_v37  ;;  %v361_v12 = vadd.f32 %v360_v48, %v328_v51  ;;  %v393_v36 = vmul.f32 %v392_v3, %v1939_v31  ;;  %v450_v4 = vadd.f32 %v449_v20, %v2011_v24 }
  0xa1   : > { %v518_v1 = vsub.f32 1.0, %v517_v10  ;;  %v425_v17 = vmul.f32 %v422_v45, %v417_v62  ;;  %v455_v14 = vmul.f32 %v454_v13, %v454_v13  ;;  %v632_v8 = vsub.f32 0.0, %v631_v49 }
  0xa2   : > { %v1354_v15 = vpop.eup %1353  ;;  %1359 = vpow2.f32 %v600_v11  ;;  %v482_v59 = vmul.f32 0.6931472, %v1352_v44  ;;  %v544_v30 = vmax.f32 %v1876_v57, 0.0  ;;  %v545_v27 = vmul.f32 %v2109_v7, %v1876_v57 }
  0xa3   : > { %v555_v60 = vmul.f32 -0.5, %v2109_v7  ;;  %v487_v31 = vadd.f32 %v486_v25, %v2074_v55  ;;  %v2128_v24 = vsel %vm541_vm3, %v540_v5, %v542_v53  ;;  %v2133_v21 = vsel %vm562_vm4, 1.0, %v1580_v0 }
  0xa4   : > { %v2123_v43 = vpop.eup %1355  ;;  %v633_v61 = vmul.f32 1.442695, %v632_v8  ;;  %v515_v41 = vmul.f32 0.6931472, %v1354_v15  ;;  %v519_v54 = vmul.f32 %v2061_v23, %v518_v1  ;;  %v577_v55 = vmax.f32 %v2053_v38, 0.0  ;;  %v2150_v23 = vld [vmem:[%s1766_s28 + $0x70] sm:$0xff] }
  0xa5   : > { %v2140_v32 = vadd.f32 1.0, %v2123_v43  ;;  %v394_v57 = vadd.f32 %v393_v36, %v361_v12  ;;  %v426_v33 = vmul.f32 %v425_v17, %v1998_v9  ;;  %v458_v16 = vmul.f32 %v455_v14, %v450_v4  ;;  %v2179_v12 = vld [vmem:[%s1766_s28 + $0x80] sm:$0xff] }
  0xa6   : > { %1361 = vpow2.f32 %v633_v61  ;;  %v550_v2 = vmul.f32 2.0, %v2128_v24  ;;  %v578_v34 = vmul.f32 %v2133_v21, %v2053_v38  ;;  %v664_v58 = vand.u32 2147483647, %v2136_v26 }
  0xa7   : > { %1363 = vrcp.f32 %v2140_v32  ;;  %v483_v22 = vadd.f32 %v482_v59, %v2058_v56  ;;  %v488_v47 = vmul.f32 %v487_v31, %v487_v31  ;;  %v523_v46 = vadd.f32 0.75, %v522_v6 }
  0xa8   : > { %v546_v52 = vsub.f32 %v544_v30, %v545_v27  ;;  %v1358_v9 = vpop.eup %1357  ;;  %v520_v40 = vadd.f32 %v519_v54, %v2092_v35  ;;  %v2154_v20 = vadd.f32 0.75, %v555_v60  ;;  %v588_v28 = vmul.f32 -0.5, %v2133_v21  ;;  %v2164_v35 = vld [vmem:[%s1766_s28 + $0x78] sm:$0xff] }
  0xa9   : > { %v665_v5 = vsub.f32 0.0, %v664_v58  ;;  %v427_v29 = vadd.f32 %v426_v33, %v394_v57  ;;  %v459_v51 = vmul.f32 %v458_v16, %v2024_v39  ;;  %v697_v48 = vand.u32 2147483647, %v2150_v23  ;;  %v2206_v57 = vld [vmem:[%s1766_s28 + $0x88] sm:$0xff] }
  0xaa   : > { %v516_v56 = vadd.f32 %v515_v41, %v2096_v50  ;;  %v551_v3 = vsub.f32 1.0, %v550_v2  ;;  %v2161_v6 = vsub.f32 %v577_v55, %v578_v34  ;;  %v491_v45 = vmul.f32 %v488_v47, %v483_v22 }
  0xab   : > { %v666_v10 = vmul.f32 1.442695, %v665_v5  ;;  %v548_v13 = vmul.f32 0.6931472, %v1358_v9  ;;  %vm628_vm6 = vcmp.eq.f32.partialorder %v1810_v19, 13.0  ;;  %v698_v39 = vsub.f32 0.0, %v697_v48 }
  0xac   : > { %v2166_v62 = vpop.eup %1359  ;;  %v521_v37 = vmul.f32 %v520_v40, %v520_v40  ;;  %v2170_v44 = vsel %vm595_vm5, 1.0, %v1580_v0  ;;  %v460_v25 = vadd.f32 %v459_v51, %v427_v29  ;;  %v2175_v53 = vadd.f32 0.75, %v588_v28 }
  0xad   : > { %v2173_v50 = vadd.f32 1.0, %v2166_v62  ;;  %1365 = vpow2.f32 %v666_v10  ;;  %v699_v11 = vmul.f32 1.442695, %v698_v39  ;;  %v730_v49 = vand.u32 2147483647, %v2164_v35 }
  0xae   : > { %v552_v36 = vmul.f32 %v2109_v7, %v551_v3  ;;  %vm574_vm7 = vcmp.ge.f32.partialorder %v2053_v38, 0.0  ;;  %v610_v4 = vmax.f32 %v2087_v18, 0.0  ;;  %v2186_v1 = vsel %vm628_vm6, 1.0, %v1580_v0 }
  0xaf   : > { %1367 = vrcp.f32 %v2173_v50  ;;  %v492_v17 = vmul.f32 %v491_v45, %v2094_v42  ;;  %v611_v14 = vmul.f32 %v2170_v44, %v2087_v18  ;;  %v621_v8 = vmul.f32 -0.5, %v2170_v44 }
  0xb0   : > { %v2188_v15 = vpop.eup %1361  ;;  %v731_v7 = vsub.f32 0.0, %v730_v49  ;;  %v524_v30 = vmul.f32 %v521_v37, %v516_v56  ;;  %1369 = vpow2.f32 %v699_v11  ;;  %v763_v60 = vand.u32 2147483647, %v2179_v12  ;;  %v2238_v37 = vld [vmem:[%s1766_s28 + $0x90] sm:$0xff] }
  0xb1   : > { %v1364_v59 = vpop.eup %1363  ;;  %v2195_v27 = vadd.f32 1.0, %v2188_v15  ;;  %v643_v61 = vmax.f32 %v2104_v63, 0.0  ;;  %v644_v42 = vmul.f32 %v2186_v1, %v2104_v63  ;;  %v553_v54 = vadd.f32 %v552_v36, %v2128_v24 }
  0xb2   : > { %v571_v31 = vmul.f32 %v1364_v59, %v2140_v32  ;;  %v732_v41 = vmul.f32 1.442695, %v731_v7  ;;  %v764_v55 = vsub.f32 0.0, %v763_v60  ;;  %v493_v33 = vadd.f32 %v492_v17, %v460_v25 }
  0xb3   : > { %1371 = vrcp.f32 %v2195_v27  ;;  %v549_v16 = vadd.f32 %v548_v13, %v546_v52  ;;  %v2208_v34 = vsub.f32 %v610_v4, %v611_v14  ;;  %v525_v58 = vmul.f32 %v524_v30, %v523_v46 }
  0xb4   : > { %v572_v2 = vsub.f32 2.0, %v571_v31  ;;  %v654_v22 = vmul.f32 -0.5, %v2186_v1  ;;  %1373 = vpow2.f32 %v732_v41  ;;  %v765_v47 = vmul.f32 1.442695, %v764_v55 }
  0xb5   : > { %1375 = vlog2.f32 %v2140_v32  ;;  %v2213_v24 = vsel %vm661_vm8, 1.0, %v1580_v0  ;;  %v796_v40 = vand.u32 2147483647, %v2206_v57  ;;  %v554_v5 = vmul.f32 %v553_v54, %v553_v54 }
  0xb6   : > { %v573_v9 = vmul.f32 %v1364_v59, %v572_v2  ;;  %vm607_vm9 = vcmp.ge.f32.partialorder %v2087_v18, 0.0  ;;  %v2219_v52 = vadd.f32 0.75, %v621_v8  ;;  %v2221_v46 = vsub.f32 %v643_v61, %v644_v42 }
  0xb7   : > { %v2216_v28 = vpop.eup %1365  ;;  %1377 = vpow2.f32 %v765_v47  ;;  %vm694_vm10 = vcmp.eq.f32.partialorder %v1810_v19, 15.0  ;;  %v797_v51 = vsub.f32 0.0, %v796_v40  ;;  %v526_v56 = vadd.f32 %v525_v58, %v493_v33 }
  0xb8   : > { %v575_v29 = vmul.f32 %v2123_v43, %v573_v9  ;;  %v2225_v32 = vadd.f32 1.0, %v2216_v28  ;;  %v2228_v3 = vadd.f32 0.75, %v654_v22  ;;  %v676_v10 = vmax.f32 %v2136_v26, 0.0 }
  0xb9   : > { %v1368_v48 = vpop.eup %1367  ;;  %v677_v45 = vmul.f32 %v2213_v24, %v2136_v26  ;;  %v798_v39 = vmul.f32 1.442695, %v797_v51  ;;  %vm640_vm11 = vcmp.ge.f32.partialorder %v2104_v63, 0.0  ;;  %v687_v49 = vmul.f32 -0.5, %v2213_v24 }
  0xba   : > { %v576_v13 = vsel %vm574_vm7, %v573_v9, %v575_v29  ;;  %v604_v43 = vmul.f32 %v1368_v48, %v2173_v50  ;;  %1379 = vrcp.f32 %v2225_v32  ;;  %v2240_v25 = vpop.eup %1369  ;;  %v2248_v38 = vsel %vm694_vm10, 1.0, %v1580_v0 }
  0xbb   : > { %v583_v11 = vmul.f32 2.0, %v576_v13  ;;  %1381 = vlog2.f32 %v2173_v50  ;;  %v557_v36 = vmul.f32 %v554_v5, %v549_v16  ;;  %v2251_v17 = vadd.f32 1.0, %v2240_v25 }
  0xbc   : > { %v605_v4 = vsub.f32 2.0, %v604_v43  ;;  %1383 = vpow2.f32 %v798_v39  ;;  %v2253_v7 = vsub.f32 %v676_v10, %v677_v45  ;;  %v709_v50 = vmax.f32 %v2150_v23, 0.0 }
  0xbd   : > { %v1372_v14 = vpop.eup %1371  ;;  %v584_v8 = vsub.f32 1.0, %v583_v11  ;;  %v829_v59 = vand.u32 2147483647, %v2238_v37  ;;  %1385 = vrcp.f32 %v2251_v17  ;;  %vm727_vm12 = vcmp.eq.f32.partialorder %v1810_v19, 16.0 }
  0xbe   : > { %v606_v30 = vmul.f32 %v1368_v48, %v605_v4  ;;  %v637_v60 = vmul.f32 %v1372_v14, %v2195_v27  ;;  %v2260_v31 = vpop.eup %1373  ;;  %1387 = vlog2.f32 %v2195_v27  ;;  %v710_v61 = vmul.f32 %v2248_v38, %v2150_v23 }
  0xbf   : > { %v720_v42 = vmul.f32 -0.5, %v2248_v38  ;;  %v830_v41 = vsub.f32 0.0, %v829_v59  ;;  %v1376_v54 = vpop.eup %1375  ;;  %v558_v55 = vmul.f32 %v557_v36, %v2154_v20  ;;  %v2269_v2 = vadd.f32 1.0, %v2260_v31  ;;  %v2298_v36 = vld [vmem:[%s1766_s28 + $0x98] sm:$0xff] }
  0xc0   : > { %v608_v33 = vmul.f32 %v2166_v62, %v606_v30  ;;  %v638_v16 = vsub.f32 2.0, %v637_v60  ;;  %v585_v22 = vmul.f32 %v2133_v21, %v584_v8  ;;  %v2274_v27 = vadd.f32 0.75, %v687_v49 }
  0xc1   : > { %v2271_v58 = vpop.eup %1377  ;;  %v2277_v47 = vsel %vm727_vm12, 1.0, %v1580_v0  ;;  %v831_v9 = vmul.f32 1.442695, %v830_v41  ;;  %vm673_vm13 = vcmp.ge.f32.partialorder %v2136_v26, 0.0  ;;  %1389 = vrcp.f32 %v2269_v2 }
  0xc2   : > { %v609_v40 = vsel %vm607_vm9, %v606_v30, %v608_v33  ;;  %v639_v20 = vmul.f32 %v1372_v14, %v638_v16  ;;  %v2284_v62 = vadd.f32 1.0, %v2271_v58  ;;  %1391 = vlog2.f32 %v2225_v32 }
  0xc3   : > { %v616_v5 = vmul.f32 2.0, %v609_v40  ;;  %v2287_v21 = vsub.f32 %v709_v50, %v710_v61  ;;  %v2289_v29 = vadd.f32 0.75, %v720_v42  ;;  %v2291_v48 = vadd.f32 %v558_v55, %v526_v56 }
  0xc4   : > { %v1380_v51 = vpop.eup %1379  ;;  %v581_v18 = vmul.f32 0.6931472, %v1376_v54  ;;  %v641_v10 = vmul.f32 %v2188_v15, %v639_v20  ;;  %1393 = vrcp.f32 %v2284_v62  ;;  %v586_v43 = vadd.f32 %v585_v22, %v576_v13 }
  0xc5   : > { %v1382_v45 = vpop.eup %1381  ;;  %v617_v39 = vsub.f32 1.0, %v616_v5  ;;  %v670_v11 = vmul.f32 %v1380_v51, %v2225_v32  ;;  %v742_v49 = vmax.f32 %v2164_v35, 0.0  ;;  %v743_v14 = vmul.f32 %v2277_v47, %v2164_v35 }
  0xc6   : > { %v2300_v4 = vpop.eup %1383  ;;  %v642_v56 = vsel %vm640_vm11, %v639_v20, %v641_v10  ;;  %v2307_v15 = vmul.f32 -0.5, %v2277_v47  ;;  %1395 = vpow2.f32 %v831_v9  ;;  %vm706_vm14 = vcmp.ge.f32.partialorder %v2150_v23, 0.0  ;;  %v2325_v9 = vld [vmem:[#allocation2] sm:$0xff] }
  0xc7   : > { %v618_v13 = vmul.f32 %v2170_v44, %v617_v39  ;;  %v649_v8 = vmul.f32 2.0, %v642_v56  ;;  %v671_v32 = vsub.f32 2.0, %v670_v11  ;;  %vm760_vm15 = vcmp.eq.f32.partialorder %v1810_v19, 17.0  ;;  %v1386_v50 = vpop.eup %1385 }
  0xc8   : > { %v582_v59 = vadd.f32 %v581_v18, %v2161_v6  ;;  %v614_v63 = vmul.f32 0.6931472, %v1382_v45  ;;  %v2314_v30 = vadd.f32 1.0, %v2300_v4  ;;  %v862_v60 = vand.u32 2147483647, %v2298_v36  ;;  %v1388_v61 = vpop.eup %1387 }
  0xc9   : > { %v587_v42 = vmul.f32 %v586_v43, %v586_v43  ;;  %v650_v41 = vsub.f32 1.0, %v649_v8  ;;  %v672_v54 = vmul.f32 %v1380_v51, %v671_v32  ;;  %1397 = vlog2.f32 %v2251_v17 }
  0xca   : > { %v619_v44 = vadd.f32 %v618_v13, %v609_v40  ;;  %v703_v55 = vmul.f32 %v1386_v50, %v2251_v17  ;;  %vm739_vm0 = vcmp.ge.f32.partialorder %v2164_v35, 0.0  ;;  %1399 = vrcp.f32 %v2314_v30 }
  0xcb   : > { %v863_v6 = vsub.f32 0.0, %v862_v60  ;;  %v651_v33 = vmul.f32 %v2186_v1, %v650_v41  ;;  %v674_v16 = vmul.f32 %v2216_v28, %v672_v54  ;;  %v2323_v22 = vsub.f32 %v742_v49, %v743_v14  ;;  %v1390_v40 = vpop.eup %1389 }
  0xcc   : > { %v2330_v20 = vsel %vm760_vm15, 1.0, %v2325_v9  ;;  %v615_v17 = vadd.f32 %v614_v63, %v2208_v34  ;;  %v647_v5 = vmul.f32 0.6931472, %v1388_v61  ;;  %v704_v51 = vsub.f32 2.0, %v703_v55  ;;  %v1392_v1 = vpop.eup %1391 }
  0xcd   : > { %vm772_vm1 = vcmp.ge.f32.partialorder %v2179_v12, 0.0  ;;  %v864_v18 = vmul.f32 1.442695, %v863_v6  ;;  %v590_v10 = vmul.f32 %v587_v42, %v582_v59  ;;  %v675_v28 = vsel %vm673_vm13, %v672_v54, %v674_v16 }
  0xce   : > { %v736_v45 = vmul.f32 %v1390_v40, %v2269_v2  ;;  %1401 = vlog2.f32 %v2269_v2  ;;  %v1394_v43 = vpop.eup %1393  ;;  %v620_v39 = vmul.f32 %v619_v44, %v619_v44  ;;  %v682_v11 = vmul.f32 2.0, %v675_v28 }
  0xcf   : > { %v705_v49 = vmul.f32 %v1386_v50, %v704_v51  ;;  %1403 = vpow2.f32 %v864_v18  ;;  %v652_v34 = vadd.f32 %v651_v33, %v642_v56  ;;  %v769_v13 = vmul.f32 %v1394_v43, %v2284_v62 }
  0xd0   : > { %v737_v14 = vsub.f32 2.0, %v736_v45  ;;  %v775_v8 = vmax.f32 %v2179_v12, 0.0  ;;  %v2340_v32 = vpop.eup %1395  ;;  %v648_v26 = vadd.f32 %v647_v5, %v2221_v46  ;;  %v680_v59 = vmul.f32 0.6931472, %v1392_v1 }
  0xd1   : > { %v683_v63 = vsub.f32 1.0, %v682_v11  ;;  %v707_v60 = vmul.f32 %v2240_v25, %v705_v49  ;;  %v591_v2 = vmul.f32 %v590_v10, %v2175_v53  ;;  %v770_v50 = vsub.f32 2.0, %v769_v13 }
  0xd2   : > { %v738_v61 = vmul.f32 %v1390_v40, %v737_v14  ;;  %1405 = vlog2.f32 %v2284_v62  ;;  %v623_v56 = vmul.f32 %v620_v39, %v615_v17  ;;  %v833_v54 = vadd.f32 1.0, %v2340_v32  ;;  %v2353_v40 = vld [vmem:[%s1774_s7 + $0x60] sm:$0xff] }
  0xd3   : > { %v684_v42 = vmul.f32 %v2213_v24, %v683_v63  ;;  %v708_v41 = vsel %vm706_vm14, %v705_v49, %v707_v60  ;;  %v1398_v46 = vpop.eup %1397  ;;  %v653_v44 = vmul.f32 %v652_v34, %v652_v34  ;;  %v771_v6 = vmul.f32 %v1394_v43, %v770_v50 }
  0xd4   : > { %v715_v55 = vmul.f32 2.0, %v708_v41  ;;  %v740_v25 = vmul.f32 %v2260_v31, %v738_v61  ;;  %v1400_v53 = vpop.eup %1399  ;;  %v681_v33 = vadd.f32 %v680_v59, %v2253_v7  ;;  %vm793_vm2 = vcmp.eq.f32.partialorder %v2353_v40, 18.0 }
  0xd5   : > { %v685_v16 = vadd.f32 %v684_v42, %v675_v28  ;;  %1407 = vrcp.f32 %v833_v54  ;;  %v592_v23 = vadd.f32 %v591_v2, %v2291_v48  ;;  %v773_v17 = vmul.f32 %v2271_v58, %v771_v6 }
  0xd6   : > { %v716_v24 = vsub.f32 1.0, %v715_v55  ;;  %v741_v62 = vsel %vm739_vm0, %v738_v61, %v740_v25  ;;  %v713_v5 = vmul.f32 0.6931472, %v1398_v46  ;;  %v802_v51 = vmul.f32 %v1400_v53, %v2314_v30 }
  0xd7   : > { %v748_v31 = vmul.f32 2.0, %v741_v62  ;;  %1409 = vlog2.f32 %v2314_v30  ;;  %v624_v18 = vmul.f32 %v623_v56, %v2219_v52  ;;  %v656_v1 = vmul.f32 %v653_v44, %v648_v26 }
  0xd8   : > { %v1402_v7 = vpop.eup %1401  ;;  %v717_v10 = vmul.f32 %v2248_v38, %v716_v24  ;;  %v774_v48 = vsel %vm772_vm1, %v771_v6, %v773_v17  ;;  %v686_v35 = vmul.f32 %v685_v16, %v685_v16  ;;  %v803_v43 = vsub.f32 2.0, %v802_v51 }
  0xd9   : > { %v2366_v28 = vpop.eup %1403  ;;  %v749_v45 = vsub.f32 1.0, %v748_v31  ;;  %v781_v58 = vmul.f32 2.0, %v774_v48  ;;  %v776_v11 = vmul.f32 %v2330_v20, %v2179_v12  ;;  %v1188_v52 = vsel %vm793_vm2, 1.0, %v2325_v9 }
  0xda   : > { %v718_v39 = vadd.f32 %v717_v10, %v708_v41  ;;  %v866_v30 = vadd.f32 1.0, %v2366_v28  ;;  %v804_v34 = vmul.f32 %v1400_v53, %v803_v43  ;;  %vm805_vm3 = vcmp.ge.f32.partialorder %v2206_v57, 0.0 }
  0xdb   : > { %v750_v38 = vmul.f32 %v2277_v47, %v749_v45  ;;  %v782_v49 = vsub.f32 1.0, %v781_v58  ;;  %v625_v13 = vadd.f32 %v624_v18, %v592_v23  ;;  %v714_v26 = vadd.f32 %v713_v5, %v2287_v21 }
  0xdc   : > { %v1406_v14 = vpop.eup %1405  ;;  %v746_v59 = vmul.f32 0.6931472, %v1402_v7  ;;  %1411 = vrcp.f32 %v866_v30  ;;  %v657_v63 = vmul.f32 %v656_v1, %v2228_v3  ;;  %v689_v60 = vmul.f32 %v686_v35, %v681_v33 }
  0xdd   : > { %v719_v2 = vmul.f32 %v718_v39, %v718_v39  ;;  %v806_v61 = vmul.f32 %v2300_v4, %v804_v34  ;;  %v751_v50 = vadd.f32 %v750_v38, %v741_v62  ;;  %v754_v56 = vadd.f32 0.75, %v2307_v15 }
  0xde   : > { %v783_v47 = vmul.f32 %v2330_v20, %v782_v49  ;;  %1413 = vlog2.f32 %v833_v54  ;;  %v777_v41 = vsub.f32 %v775_v8, %v776_v11  ;;  %v808_v46 = vmax.f32 %v2206_v57, 0.0 }
  0xdf   : > { %v1408_v42 = vpop.eup %1407  ;;  %v807_v21 = vsel %vm805_vm3, %v804_v34, %v806_v61  ;;  %v809_v3 = vmul.f32 %v1188_v52, %v2206_v57  ;;  %v779_v44 = vmul.f32 0.6931472, %v1406_v14  ;;  %vm826_vm4 = vcmp.eq.f32.partialorder %v2353_v40, 19.0 }
  0xe0   : > { %v814_v55 = vmul.f32 2.0, %v807_v21  ;;  %v835_v4 = vmul.f32 %v1408_v42, %v833_v54  ;;  %v658_v25 = vadd.f32 %v657_v63, %v625_v13  ;;  %v690_v6 = vmul.f32 %v689_v60, %v2274_v27 }
  0xe1   : > { %v1410_v15 = vpop.eup %1409  ;;  %v722_v53 = vmul.f32 %v719_v2, %v714_v26  ;;  %v747_v12 = vadd.f32 %v746_v59, %v2323_v22  ;;  %v752_v8 = vmul.f32 %v751_v50, %v751_v50  ;;  %v784_v33 = vadd.f32 %v783_v47, %v774_v48 }
  0xe2   : > { %v815_v16 = vsub.f32 1.0, %v814_v55  ;;  %v836_v23 = vsub.f32 2.0, %v835_v4  ;;  %v786_v24 = vmul.f32 -0.5, %v2330_v20  ;;  %v810_v62 = vsub.f32 %v808_v46, %v809_v3 }
  0xe3   : > { %v1190_v57 = vsel %vm826_vm4, 1.0, %v2325_v9  ;;  %vm838_vm5 = vcmp.ge.f32.partialorder %v2238_v37, 0.0  ;;  %v780_v17 = vadd.f32 %v779_v44, %v777_v41  ;;  %vm859_vm6 = vcmp.eq.f32.partialorder %v2353_v40, 20.0 }
  0xe4   : > { %v816_v54 = vmul.f32 %v1188_v52, %v815_v16  ;;  %v837_v5 = vmul.f32 %v1408_v42, %v836_v23  ;;  %v691_v27 = vadd.f32 %v690_v6, %v658_v25  ;;  %v723_v31 = vmul.f32 %v722_v53, %v2289_v29 }
  0xe5   : > { %v812_v22 = vmul.f32 0.6931472, %v1410_v15  ;;  %1415 = vlog2.f32 %v866_v30  ;;  %v755_v7 = vmul.f32 %v752_v8, %v747_v12  ;;  %v785_v18 = vmul.f32 %v784_v33, %v784_v33 }
  0xe6   : > { %v1412_v51 = vpop.eup %1411  ;;  %v817_v1 = vadd.f32 %v816_v54, %v807_v21  ;;  %v839_v20 = vmul.f32 %v2340_v32, %v837_v5  ;;  %v841_v10 = vmax.f32 %v2238_v37, 0.0  ;;  %v842_v48 = vmul.f32 %v1190_v57, %v2238_v37 }
  0xe7   : > { %v868_v35 = vmul.f32 %v1412_v51, %v866_v30  ;;  %v787_v58 = vadd.f32 0.75, %v786_v24  ;;  %v819_v43 = vmul.f32 -0.5, %v1188_v52  ;;  %v813_v29 = vadd.f32 %v812_v22, %v810_v62 }
  0xe8   : > { %v1414_v45 = vpop.eup %1413  ;;  %v840_v39 = vsel %vm838_vm5, %v837_v5, %v839_v20  ;;  %v1192_v38 = vsel %vm859_vm6, 1.0, %v2325_v9  ;;  %v724_v34 = vadd.f32 %v723_v31, %v691_v27  ;;  %v756_v32 = vmul.f32 %v755_v7, %v754_v56 }
  0xe9   : > { %v847_v11 = vmul.f32 2.0, %v840_v39  ;;  %v869_v49 = vsub.f32 2.0, %v868_v35  ;;  %v788_v14 = vmul.f32 %v785_v18, %v780_v17  ;;  %v818_v13 = vmul.f32 %v817_v1, %v817_v1  ;;  %v906_v1 = vld [vmem:[#allocation2] sm:$0xff] (!%p1194_p0) }
  0xea   : > { %v843_v26 = vsub.f32 %v841_v10, %v842_v48  ;;  %v845_v59 = vmul.f32 0.6931472, %v1414_v45  ;;  %v852_v60 = vmul.f32 -0.5, %v1190_v57  ;;  %vm871_vm7 = vcmp.ge.f32.partialorder %v2298_v36, 0.0 }
  0xeb   : > { %v848_v30 = vsub.f32 1.0, %v847_v11  ;;  %v870_v63 = vmul.f32 %v1412_v51, %v869_v49  ;;  %v874_v2 = vmax.f32 %v2298_v36, 0.0  ;;  %v875_v40 = vmul.f32 %v1192_v38, %v2298_v36 }
  0xec   : > { %v757_v9 = vadd.f32 %v756_v32, %v724_v34  ;;  %v789_v61 = vmul.f32 %v788_v14, %v787_v58  ;;  %v820_v50 = vadd.f32 0.75, %v819_v43  ;;  %v821_v56 = vmul.f32 %v818_v13, %v813_v29 }
  0xed   : > { %v849_v37 = vmul.f32 %v1190_v57, %v848_v30  ;;  %v872_v52 = vmul.f32 %v2366_v28, %v870_v63  ;;  %v846_v42 = vadd.f32 %v845_v59, %v843_v26  ;;  %v853_v44 = vadd.f32 0.75, %v852_v60 }
  0xee   : > { %v876_v55 = vsub.f32 %v874_v2, %v875_v40  ;;  %v790_v4 = vadd.f32 %v789_v61, %v757_v9  ;;  %v822_v15 = vmul.f32 %v821_v56, %v820_v50  ;;  %v885_v36 = vmul.f32 -0.5, %v1192_v38 }
  0xef   : > { %v1416_v47 = vpop.eup %1415  ;;  %v850_v41 = vadd.f32 %v849_v37, %v840_v39  ;;  %v873_v21 = vsel %vm871_vm7, %v870_v63, %v872_v52  ;;  %v897_v5 = vlaneseq (!%p1194_p0)  ;;  %v902_v27 = vstv (!%p1194_p0), %s1195_s29 }
  0xf0   : > { %v880_v46 = vmul.f32 2.0, %v873_v21  ;;  %v878_v28 = vmul.f32 0.6931472, %v1416_v47  ;;  %v823_v12 = vadd.f32 %v822_v15, %v790_v4  ;;  %v886_v24 = vadd.f32 0.75, %v885_v36 }
  0xf1   : > { %v851_v3 = vmul.f32 %v850_v41, %v850_v41  ;;  %v898_v31 = vshrl.u32 (!%p1194_p0), %v897_v5, 7  ;;  %v900_v22 = vand.u32 (!%p1194_p0), 127, %v897_v5 }
  0xf2   : > { %v881_v25 = vsub.f32 1.0, %v880_v46  ;;  %v879_v33 = vadd.f32 %v878_v28, %v876_v55 }
  0xf3   : > { %v854_v6 = vmul.f32 %v851_v3, %v846_v42  ;;  %v903_v51 = vadd.s32 (!%p1194_p0), %v902_v27, %v898_v31 }
  0xf4   : > { %v882_v53 = vmul.f32 %v1192_v38, %v881_v25 }
  0xf5   : > { %v855_v8 = vmul.f32 %v854_v6, %v853_v44  ;;  %v904_v7 = vmul.u32 (!%p1194_p0), 128, %v903_v51 }
  0xf6   : > { %v883_v16 = vadd.f32 %v882_v53, %v873_v21 }
  0xf7   : > { %v856_v62 = vadd.f32 %v855_v8, %v823_v12  ;;  %v905_v18 = vadd.s32 (!%p1194_p0), %v904_v7, %v900_v22 }
  0xf8   : > { %v884_v23 = vmul.f32 %v883_v16, %v883_v16  ;;  %896 = sbr.rel (%p1194_p0) target bundleno = 260 (0x104), region = 44 }
  0xf9   : > { %vm907_vm8 = vcmp.lt.s32.totalorder (!%p1194_p0), %v905_v18, 512 }
  0xfa   : > { %v887_v57 = vmul.f32 %v884_v23, %v879_v33 }
  0xfc   : > { %v888_v17 = vmul.f32 %v887_v57, %v886_v24 }
  0xfe   : > { %v889_v54 = vadd.f32 %v888_v17, %v856_v62 }
 0x100   : > { %v908_v20 = vsel %vm907_vm8, %v889_v54, 0.0 }
 0x101   : > { %v910_v10 = vadd.f32 %v908_v20, %v906_v1 }
 0x103   : > { %911 = vst [vmem:[#allocation2] sm:$0xff] %v910_v10 }
 0x104 PF: > { %p1196_p2 = scmp.gt.s32.totalorder %s1967_s16, 512 }
 0x106   : > { %915 = sbr.rel (%p1196_p2) target bundleno = 270 (0x10e), region = 48 }
 0x10a   : > { %v916_v48 = vld [vmem:[#allocation2] sm:$0xff] (!%p1196_p2) }
 0x10b   : > { %v918_v35 = vadd.f32 (!%p1196_p2), %v916_v48, %v889_v54 }
 0x10d   : > { %919 = vst [vmem:[#allocation2] sm:$0xff] %v918_v35 }
 0x10e PF: > { %vm920_vm9 = vcmp.gt.f32.partialorder %v1810_v19, 0.5  ;;  %v987_v45 = vld [vmem:[#allocation3] sm:$0xff]  ;;  %v1197_v43 = vld [vmem:[%s1774_s7 + $0x8] sm:$0xff]  ;;  %v1198_v29 = vld [vmem:[%s1774_s7 + $0x10] sm:$0xff]  ;;  %s1223_s3 = smul.u32 640, %s1565_s12  ;;  %s1040_s19 = sshll.u32 %s2409_s20, 4  ;;  %s2449_s19 = int_to_ptr.vmem [resolvable:$true] %s1040_s19 }
 0x10f   : > { %v921_v58 = vld [vmem:[%s1774_s7] sm:$0xff]  ;;  %v1208_v39 = vsel %vm920_vm9, 1.0, %v1580_v0  ;;  %v1199_v11 = vld [vmem:[%s1774_s7 + $0x18] sm:$0xff]  ;;  %v1201_v34 = vld [vmem:[%s1774_s7 + $0x28] sm:$0xff]  ;;  %s1027_s12 = scalar_lea.sflag [#allocation9], %s1762_s5  ;;  %s1487_s30 = scalar_lea.vmem %s2449_s19, 640 }
 0x110   : > { %v1200_v38 = vld [vmem:[%s1774_s7 + $0x20] sm:$0xff]  ;;  %v991_v49 = vadd.f32 %v1208_v39, %v987_v45  ;;  %v1202_v32 = vld [vmem:[%s1774_s7 + $0x30] sm:$0xff]  ;;  %v1203_v14 = vld [vmem:[%s1774_s7 + $0x38] sm:$0xff]  ;;  %v944_v13 = vsub.f32 %v921_v58, %v1198_v29  ;;  %v945_v26 = vsub.f32 %v1197_v43, %v1199_v11  ;;  %v947_v37 = vadd.f32 %v1201_v34, %v1197_v43  ;;  %s2447_s6 = scalar_lea.hbm %s2501_s2, %s1223_s3  ;;  %p1488_p12 = scmp.ne.s32.totalorder %s2449_s19, %s1487_s30 }
 0x111   : > { %v946_v59 = vadd.f32 %v1200_v38, %v921_v58  ;;  %v1204_v30 = vld [vmem:[%s1774_s7 + $0x40] sm:$0xff]  ;;  %v1205_v63 = vld [vmem:[%s1774_s7 + $0x48] sm:$0xff]  ;;  %v1207_v60 = vld [vmem:[%s1774_s7 + $0x58] sm:$0xff]  ;;  %v948_v52 = vsub.f32 %v921_v58, %v1202_v32  ;;  %v949_v2 = vsub.f32 %v1197_v43, %v1203_v14  ;;  %p2511_p13 = scmp.ne.s32.totalorder %s2506_s22, 0  ;;  %s1581_s27 = smov [#allocation12]  }
 0x112   : > { %992 = vst [vmem:[#allocation3] sm:$0xff] %v991_v49  ;;  %v950_v0 = vadd.f32 %v1204_v30, %v921_v58  ;;  %v951_v40 = vadd.f32 %v1205_v63, %v1197_v43  ;;  %v999_v61 = vld [vmem:[#allocation5] sm:$0xff]  ;;  %v1000_v50 = vsel %vm920_vm9, %v1207_v60, 0.0  ;;  %1209 = vst [vmem:[%s2409_s20 + $0x8] sm:$0xff] %v991_v49  ;;  %v953_v47 = vsub.f32 %v947_v37, %v945_v26  ;;  %v1004_v20 = vld [vmem:[#allocation6] sm:$0xff]  ;;  %s1491_s18 = sshll.u32 %s1581_s27, 4  ;;  %s1492_s18 = int_to_ptr.vmem [resolvable:$false] %s1491_s18 }
 0x113   : > { %v952_v9 = vsub.f32 %v946_v59, %v944_v13  ;;  %v1206_v56 = vld [vmem:[%s1774_s7 + $0x50] sm:$0xff]  ;;  %v959_v42 = vmax.f32 %v944_v13, %v948_v52  ;;  %v963_v41 = vmax.f32 %v945_v26, %v949_v2  ;;  %v1002_v21 = vadd.f32 %v1000_v50, %v999_v61  ;;  %v993_v43 = vld [vmem:[#allocation4] sm:$0xff]  ;;  %p1489_p6 = pnand %p1488_p12, %p2511_p13  ;;  %s1493_s28 = scalar_lea.vmem %s1492_s18, 1280 }
 0x114   : > { %v1012_v46 = vld [vmem:[#allocation2] sm:$0xff]  ;;  %v955_v3 = vsub.f32 %v950_v0, %v948_v52  ;;  %v956_v44 = vsub.f32 %v951_v40, %v949_v2  ;;  %v958_v55 = vmin.f32 %v946_v59, %v950_v0  ;;  %v962_v4 = vmin.f32 %v947_v37, %v951_v40  ;;  %p1494_p9 = scmp.lt.s32.totalorder %s2449_s19, %s1492_s18  ;;  %p1495_p11 = scmp.lt.s32.totalorder %s1493_s28, %s1487_s30 }
 0x115   : > { %1013 = vst [vmem:[%s2409_s20] sm:$0xff] %v1012_v46  ;;  %v954_v15 = vmul.f32 %v953_v47, %v952_v9  ;;  %1003 = vst [vmem:[#allocation5] sm:$0xff] %v1002_v21  ;;  %v976_v28 = vand.u32 2147483647, %v1206_v56  ;;  %v980_v31 = vmax.f32 %v1206_v56, 0.0  ;;  %v981_v22 = vmul.f32 %v1207_v60, %v1206_v56  ;;  %p1490_p7 = pneg %p1489_p6 }
 0x116   : > { %1211 = vst [vmem:[%s2409_s20 + $0x18] sm:$0xff] %v1002_v21  ;;  %v957_v25 = vmul.f32 %v956_v44, %v955_v3  ;;  %v960_v6 = vsub.f32 %v958_v55, %v959_v42  ;;  %v964_v53 = vsub.f32 %v962_v4, %v963_v41  ;;  %p1496_p4 = por %p1495_p11, %p1494_p9 }
 0x117   : > { %v977_v36 = vsub.f32 0.0, %v976_v28  ;;  %v982_v51 = vsub.f32 %v980_v31, %v981_v22 }
 0x118   : > { %v961_v12 = vmax.f32 %v960_v6, 0.0  ;;  %v965_v8 = vmax.f32 %v964_v53, 0.0  ;;  %v967_v33 = vadd.f32 %v957_v25, %v954_v15  ;;  %p1497_p10 = pnand %p1496_p4, %p1490_p7 }
 0x119   : > { %v978_v16 = vmul.f32 1.442695, %v977_v36 }
 0x11a   : > { %v966_v23 = vmul.f32 %v965_v8, %v961_v12 }
 0x11b   : > { %1419 = vpow2.f32 %v978_v16 }
 0x11c   : > { %v968_v24 = vsub.f32 %v967_v33, %v966_v23 }
 0x11e   : > { %v969_v62 = vsel %vm920_vm9, %v968_v24, 1.0 }
 0x11f   : > { %1421 = vrcp.f32 %v969_v62 }
 0x125   : > { %v1420_v57 = vpop.eup %1419 }
 0x126   : > { %v983_v17 = vadd.f32 1.0, %v1420_v57 }
 0x128   : > { %1423 = vlog2.f32 %v983_v17 }
 0x129   : > { %v1422_v54 = vpop.eup %1421 }
 0x12a   : > { %v971_v5 = vmul.f32 %v1422_v54, %v966_v23 }
 0x12c   : > { %v972_v27 = vmax.f32 %v971_v5, 1e-06 }
 0x12e   : > { %1425 = vlog2.f32 %v972_v27 }
 0x132   : > { %v1424_v7 = vpop.eup %1423 }
 0x133   : > { %v985_v18 = vmul.f32 0.6931472, %v1424_v7 }
 0x135   : > { %v986_v1 = vadd.f32 %v985_v18, %v982_v51 }
 0x137   : > { %v1005_v10 = vsel %vm920_vm9, %v986_v1, 0.0 }
 0x138   : > { %v1426_v48 = vpop.eup %1425  ;;  %v1007_v35 = vadd.f32 %v1005_v10, %v1004_v20 }
 0x139   : > { %v974_v45 = vmul.f32 0.6931472, %v1426_v48 }
 0x13a   : > { %1008 = vst [vmem:[#allocation6] sm:$0xff] %v1007_v35  ;;  %1212 = vst [vmem:[%s2409_s20 + $0x20] sm:$0xff] %v1007_v35 }
 0x13b   : > { %v975_v58 = vsub.f32 0.0, %v974_v45 }
 0x13d   : > { %v994_v39 = vmul.f32 %v1207_v60, %v975_v58 }
 0x13f   : > { %v995_v29 = vsel %vm920_vm9, %v994_v39, 0.0 }
 0x140   : > { %v997_v11 = vadd.f32 %v995_v29, %v993_v43 }
 0x142   : > { %998 = vst [vmem:[#allocation4] sm:$0xff] %v997_v11  ;;  %1210 = vst [vmem:[%s2409_s20 + $0x10] sm:$0xff] %v997_v11 }
 0x143   : > { %1500 = shalt.err (!%p1497_p10)
}
 0x144   : > { %s1501_s25 = scalar_lea.hbm %s2447_s6, 640  ;;  %s1505_s8 = scalar_lea.hbm %s2501_s2, 1280 }
 0x145   : > { %p1502_p1 = scmp.ne.s32.totalorder %s2447_s6, %s1501_s25  ;;  %p1506_p8 = scmp.lt.u32.totalorder %s2447_s6, %s2501_s2 }
 0x146   : > { %p1507_p0 = scmp.lt.u32.totalorder %s1505_s8, %s1501_s25  ;;  %p1509_p12 = scmp.lt.u32.totalorder %s1501_s25, %s2447_s6 }
 0x147   : > { %p1503_p3 = pnand %p1502_p1, %p2511_p13 }
 0x148   : > { %p1508_p2 = por %p1507_p0, %p1506_p8 }
 0x149   : > { %p1504_p5 = pneg %p1503_p3 }
 0x14a   : > { %p1510_p6 = por %p1509_p12, %p1508_p2 }
 0x14c   : > { %p1511_p7 = pnand %p1510_p6, %p1504_p5 }
 0x14e   : > { %1514 = shalt.err (!%p1511_p7)
}
 0x14f   : > { %s1582_s20 = smov 128   ;;  %s1583_s29 = smov 8  }
 0x150   : > { %1228 = dma.vmem_to_hbm [thread:$0]  (%p2511_p13), %s2449_s19, 640, %s2447_s6, %s1027_s12, %s1582_s20, %s1582_s20, %s1583_s29  }
 0x151 PF: > { %s1055_s3 = sand.u32 1, %s1553_s9   ;;  %p2512_p9 = scmp.ne.s32.totalorder %s2507_s24, 0 }
 0x152   : > { %p2513_p11 = scmp.ge.s32.totalorder %s1573_s14, 2  ;;  %s1056_s15 = scalar_lea.sflag [#allocation9], %s1055_s3 }
 0x154   : > { %p1238_p4 = pnand %p2513_p11, %p2512_p9 }
 0x156   : > { %1548 = dma.done.wait (!%p1238_p4), %s1056_s15, 640  }
 0x157   : > { %1550 = vsyncadd (!%p1238_p4), %s1056_s15, 4294966656  ;;  %s21_s14 = sadd.s32 1, %s1573_s14   ;;  %s2514_s9 = smov %s1557_s10 }
 0x158   : > { %p18_p10 = scmp.ge.s32.totalorder %s21_s14, 4   ;;  %s2515_s10 = smov %s1561_s11 }
 0x159   : > { %s2516_s11 = smov %s1655_s23  ;;  %s2517_s12 = smov %s1569_s13 }
 0x15a   : > { %s2518_s13 = smov %s2520_s17  ;;  %20 = sbr.rel (!%p18_p10) target bundleno = 8 (0x8), region = 137 }
 0x161   :  { %1061 = vsyncpa [#allocation8], 1 }
 0x162   :  { %1063 = vsyncpa [#allocation8 + $0x1], 1 }
 0x163   :  { %1064 = vsyncpa [#allocation11], 1 }
 0x164   :  { %1066 = vsyncpa [#allocation11 + $0x1], 1 }
 0x165   :  { %1067 = vsyncpa [#allocation9], 1 }
 0x166   :  { %1069 = vsyncpa [#allocation9 + $0x1], 1 }

</bundles_post_ra>
